<compile_context>
chip_gen: v5e
topology: v5e:2x2
jax: 0.10.0
libtpu: 0.0.40
codegen_flags: <defaults>
</compile_context>

<pallas_src>
import numpy as np
import jax
import jax.numpy as jnp
from jax.experimental import pallas as pl
from jax.experimental.pallas import tpu as pltpu

EPS = 1e-10
NEG = -1e30  # finite "masked" sentinel (avoids inf/nan in the online softmax)


# ---------------------------------------------------------------------------
# Kernel 1: fused  Conv3x3(+BN folded)+ReLU  ->  gated attention / classifier logits
#   v0/v1/v2  : (TH, W+2, Cin)  row-shifted halo views of the padded image (one row-block)
#   wconv_ref : (9, Cin, L)     per-tap conv weights with eval-BN scale folded in
#   shift_ref : (1, L)          folded BN shift
#   wa/wb     : (L, D), ba/bb : (1, D)
#   wcls_ref  : (L, 2C)  (zeros in det half), wc_ref : (D, 2C) (zeros in cls half)
#   bcd_ref   : (1, 2C)  [bcls | bc]
#   o_ref     : (TH*W, 2C) packed [cls_logit | det_logit]
# ---------------------------------------------------------------------------
def conv_head_kernel(v0_ref, v1_ref, v2_ref, wconv_ref, shift_ref,
                     wa_ref, ba_ref, wb_ref, bb_ref,
                     wcls_ref, wc_ref, bcd_ref, o_ref):
    th, wp, cin = v0_ref.shape
    w_out = wp - 2
    tm = th * w_out
    l = wconv_ref.shape[-1]

    # 3x3 conv as 9 accumulating K=Cin matmuls (taps built from in-kernel column slices)
    acc = jnp.zeros((tm, l), jnp.float32)
    views = (v0_ref[...], v1_ref[...], v2_ref[...])
    for r in range(3):                     # static unroll: kernel row (row-shifted view)
        v = views[r]
        for dj in range(3):                # static unroll: kernel column
            tap = v[:, dj:dj + w_out, :].reshape(tm, cin)
            acc = acc + jnp.dot(tap, wconv_ref[3 * r + dj],
                                preferred_element_type=jnp.float32)
    h = jnp.maximum(acc + shift_ref[...], 0.0)      # BN shift + ReLU (Dropout = identity, eval)

    # gated attention: two independent (L, D) dots, tanh/sigmoid on the EUP
    a = jnp.tanh(jnp.dot(h, wa_ref[...], preferred_element_type=jnp.float32) + ba_ref[...])
    b = jax.nn.sigmoid(jnp.dot(h, wb_ref[...], preferred_element_type=jnp.float32) + bb_ref[...])
    gated = a * b

    # packed [cls_logit | det_logit] via two accumulating dots (no concat / block-diag)
    o_ref[...] = (jnp.dot(h, wcls_ref[...], preferred_element_type=jnp.float32)
                  + jnp.dot(gated, wc_ref[...], preferred_element_type=jnp.float32)
                  + bcd_ref[...])


def conv_head(views, wconv, shift, wa, ba, wb, bb, wcls_pad, wc_pad, bcd, *, th):
    v0, v1, v2 = views
    hpad, wp, cin = v0.shape
    w_out = wp - 2
    tm = th * w_out
    hwp = hpad * w_out
    l = wconv.shape[-1]
    d = wa.shape[-1]
    two_c = wcls_pad.shape[-1]
    grid = (hpad // th,)

    def resident(shape):
        n = len(shape)
        return pl.BlockSpec(shape, lambda i: (0,) * n)

    view_spec = pl.BlockSpec((th, wp, cin), lambda i: (i, 0, 0))

    flops = 2 * hwp * (9 * cin * l + 2 * l * d + l * two_c + d * two_c)
    transc = hwp * 2 * d
    bytes_acc = 4 * (3 * hpad * wp * cin + 9 * cin * l + l + 2 * l * d + 2 * d
                     + l * two_c + d * two_c + two_c + hwp * two_c)

    return pl.pallas_call(
        conv_head_kernel,
        out_shape=jax.ShapeDtypeStruct((hwp, two_c), jnp.float32),
        grid=grid,
        in_specs=[
            view_spec, view_spec, view_spec,
            resident(wconv.shape), resident(shift.shape),
            resident(wa.shape), resident(ba.shape),
            resident(wb.shape), resident(bb.shape),
            resident(wcls_pad.shape), resident(wc_pad.shape), resident(bcd.shape),
        ],
        out_specs=pl.BlockSpec((tm, two_c), lambda i: (i, 0)),
        compiler_params=pltpu.CompilerParams(
            dimension_semantics=("parallel",),            # v7x: >=2 tiles split across TCs
            vmem_limit_bytes=32 * 1024 * 1024),           # safe on v5e/v6e/v7x
        cost_estimate=pl.CostEstimate(flops=int(flops), transcendentals=int(transc),
                                      bytes_accessed=int(bytes_acc)),
    )(v0, v1, v2, wconv, shift, wa, ba, wb, bb, wcls_pad, wc_pad, bcd)


# ---------------------------------------------------------------------------
# Kernel 2: gridded two-pass dual softmax + final score (online over the instance axis)
#   grid = (2, HWp/TMF):  pass 0 accumulates running (max, sum-exp) of the masked det
#   logits; pass 1 normalizes, writes packed [final|cls_score|det_score] and the class sum.
#   VMEM use is O(TMF) -> scales to arbitrarily large HW.
# ---------------------------------------------------------------------------
def finalize_kernel(logits_ref, valid_ref, packed_ref, fsum_ref, m_ref, l_ref):
    p = pl.program_id(0)
    i = pl.program_id(1)
    n_cls = fsum_ref.shape[-1]

    @pl.when(jnp.logical_and(p == 0, i == 0))
    def _():
        m_ref[...] = jnp.full(m_ref.shape, NEG, jnp.float32)
        l_ref[...] = jnp.zeros(l_ref.shape, jnp.float32)
        fsum_ref[...] = jnp.zeros(fsum_ref.shape, jnp.float32)

    logits = logits_ref[...]
    valid = valid_ref[...]
    det = logits[:, n_cls:]
    det_masked = jnp.where(valid > 0.0, det, NEG)

    @pl.when(p == 0)                       # pass 0: running (max, sum-exp) over instances
    def _():
        m_old = m_ref[...]
        m_new = jnp.maximum(m_old, jnp.max(det_masked, axis=0, keepdims=True))
        l_ref[...] = (l_ref[...] * jnp.exp(m_old - m_new)
                      + jnp.sum(jnp.exp(det_masked - m_new) * valid, axis=0, keepdims=True))
        m_ref[...] = m_new
        packed_ref[...] = jnp.zeros(packed_ref.shape, jnp.float32)  # overwritten in pass 1

    @pl.when(p == 1)                       # pass 1: normalize + write per-instance scores
    def _():
        cls = logits[:, :n_cls]
        cm = jnp.max(cls, axis=1, keepdims=True)
        ce = jnp.exp(cls - cm)
        cls_score = ce * pl.reciprocal(jnp.sum(ce, axis=1, keepdims=True), approx=True)
        det_score = (jnp.exp(det_masked - m_ref[...]) * valid
                     * pl.reciprocal(l_ref[...], approx=True))
        final = cls_score * det_score
        packed_ref[...] = jnp.concatenate([final, cls_score, det_score], axis=1)
        fsum_ref[...] += jnp.sum(final, axis=0, keepdims=True)


def finalize(logits, valid, n_cls, *, tmf):
    hwp, two_c = logits.shape
    grid = (2, hwp // tmf)

    flops = 16 * hwp * n_cls
    transc = 4 * hwp * n_cls
    bytes_acc = 4 * (2 * (hwp * two_c + hwp) + hwp * 3 * n_cls + n_cls)

    return pl.pallas_call(
        finalize_kernel,
        out_shape=(jax.ShapeDtypeStruct((hwp, 3 * n_cls), jnp.float32),
                   jax.ShapeDtypeStruct((1, n_cls), jnp.float32)),
        grid=grid,
        in_specs=[pl.BlockSpec((tmf, two_c), lambda p, i: (i, 0)),
                  pl.BlockSpec((tmf, 1), lambda p, i: (i, 0))],
        out_specs=(pl.BlockSpec((tmf, 3 * n_cls), lambda p, i: (i, 0)),
                   pl.BlockSpec((1, n_cls), lambda p, i: (0, 0))),
        scratch_shapes=[pltpu.VMEM((1, n_cls), jnp.float32),   # running max
                        pltpu.VMEM((1, n_cls), jnp.float32)],  # running sum-exp
        compiler_params=pltpu.CompilerParams(
            dimension_semantics=("arbitrary", "arbitrary"),
            vmem_limit_bytes=32 * 1024 * 1024),
        cost_estimate=pl.CostEstimate(flops=int(flops), transcendentals=int(transc),
                                      bytes_accessed=int(bytes_acc)),
    )(logits, valid)


# ---------------------------------------------------------------------------
# SMMILe forward wrapper (host / plain-JAX glue)
# ---------------------------------------------------------------------------
def smmile_forward(x_chw, mask_np, params, return_features=True, tile_rows=8):
    cin, H, W = x_chw.shape
    L = params["conv_w"].shape[0]
    n_cls = params["wcls"].shape[-1]
    D = params["wa"].shape[-1]
    hw = H * W

    # host-side: f_h, f_w = np.where(mask == 1)  (same as the torch module)
    f_h, f_w = np.where(mask_np == 1)
    n = int(f_h.shape[0])
    if n == 0:
        raise ValueError("mask has no positions == 1; det softmax is undefined")
    flat_idx = jnp.asarray(f_h * W + f_w, jnp.int32)

    # row tiling: grid >= 2 so v7x's two TCs split it; raise tile_rows on v5e/v6e for
    # big slides to amortize the ~0.35us/step overhead (footprint is only ~TH*W*Cin*12 B).
    th = max(1, min(tile_rows, H))
    hpad = ((H + th - 1) // th) * th
    hwp = hpad * W
    tm = th * W

    # channels-last padded image + three row-shifted halo views (no im2col).
    # TODO(synk): a manual-DMA halo fetch (memory_space=pl.ANY + make_async_copy) would
    #             cut the 3x view reads to ~1x for very large slides.
    x_hwc = jnp.transpose(x_chw, (1, 2, 0)).astype(jnp.float32)        # (H, W, Cin)
    x_padded = jnp.pad(x_hwc, ((1, 1 + hpad - H), (1, 1), (0, 0)))     # (hpad+2, W+2, Cin)
    v0 = x_padded[0:hpad]
    v1 = x_padded[1:hpad + 1]
    v2 = x_padded[2:hpad + 2]

    # fold eval-mode BatchNorm: scale into the conv weight, keep the shift
    scale = params["bn_gamma"] / jnp.sqrt(params["bn_var"] + 1e-5)     # (L,)
    wconv = (jnp.transpose(params["conv_w"], (2, 3, 1, 0)).reshape(9, cin, L)
             * scale[None, None, :])                                   # (9, Cin, L)
    shift = (params["bn_beta"] - params["bn_mean"] * scale).reshape(1, L)

    # head weights for the two accumulating dots (no in-kernel concat)
    wcls_pad = jnp.zeros((L, 2 * n_cls), jnp.float32).at[:, :n_cls].set(params["wcls"])
    wc_pad = jnp.zeros((D, 2 * n_cls), jnp.float32).at[:, n_cls:].set(params["wc"])
    bcd = jnp.concatenate([params["bcls"], params["bc"]], axis=1)      # (1, 2C)

    # validity mask over all (padded) positions
    valid = jnp.asarray((mask_np == 1).astype(np.float32).reshape(hw, 1))
    valid = jnp.pad(valid, ((0, hwp - hw), (0, 0)))

    # kernel 1: fused conv+BN+ReLU + attention/classifier logits, tiled over image rows
    logits = conv_head((v0, v1, v2), wconv, shift,
                       params["wa"], params["ba"], params["wb"], params["bb"],
                       wcls_pad, wc_pad, bcd, th=th)

    # kernel 2: masked dual softmax + final score + class sum (two-pass online)
    packed, fsum = finalize(logits, valid, n_cls, tmf=tm)

    # gather the (tiny) per-instance outputs back to the N masked-in positions
    final_score = jnp.take(packed[:, :n_cls], flat_idx, axis=0)
    Y_prob = [jnp.clip(fsum[0], EPS, 1.0 - EPS)]
    Y_hat = jnp.argmax(Y_prob[0])
    final_score_sp = final_score              # no superpixel smoothing (superpixels=False)
    ref_score = final_score                   # instance_eval=False path

    results_dict = {"instance_loss": jnp.float32(0.0), "mrf_loss": jnp.float32(0.0)}
    if return_features:
        results_dict.update({
            "cls_logits": jnp.take(logits[:, :n_cls], flat_idx, axis=0),
            "cls_scores": jnp.take(packed[:, n_cls:2 * n_cls], flat_idx, axis=0),
            "det_logits": jnp.take(logits[:, n_cls:2 * n_cls], flat_idx, axis=0),
            "det_scores": jnp.take(packed[:, 2 * n_cls:], flat_idx, axis=0),
            "h_raw": jnp.take(x_hwc.reshape(hw, cin), flat_idx, axis=0),
        })
    return final_score_sp, Y_prob, Y_hat, ref_score, results_dict


# ---------------------------------------------------------------------------
# Pure-JAX reference (for correctness check)
# ---------------------------------------------------------------------------
def reference_forward(x_chw, mask_np, params):
    f_h, f_w = np.where(mask_np == 1)
    y = jax.lax.conv_general_dilated(
        x_chw[None], params["conv_w"], (1, 1), "SAME",
        dimension_numbers=("NCHW", "OIHW", "NCHW"))[0]
    scale = params["bn_gamma"] / jnp.sqrt(params["bn_var"] + 1e-5)
    shift = params["bn_beta"] - params["bn_mean"] * scale
    y = jnp.maximum(y * scale[:, None, None] + shift[:, None, None], 0.0)
    h = y[:, f_h, f_w].T
    a = jnp.tanh(h @ params["wa"] + params["ba"])
    b = jax.nn.sigmoid(h @ params["wb"] + params["bb"])
    det_logit = (a * b) @ params["wc"] + params["bc"]
    cls_logit = h @ params["wcls"] + params["bcls"]
    cls_score = jax.nn.softmax(cls_logit, axis=1)
    det_score = jax.nn.softmax(det_logit, axis=0)
    final = cls_score * det_score
    y_prob = jnp.clip(jnp.sum(final, axis=0), EPS, 1.0 - EPS)
    return final, y_prob


# ---------------------------------------------------------------------------
if __name__ == "__main__":
    # small config: fea_dim=32, size_arg='small' -> [32, 128, 64], n_classes=2
    FEA_DIM, L, D, N_CLS = 32, 128, 64, 2
    H = W = 32                                   # HW = 1024 -> row grid of 4 tiles (TH=8)

    key = jax.random.PRNGKey(0)
    ks = jax.random.split(key, 16)

    params = {
        "conv_w": 0.1 * jax.random.normal(ks[0], (L, FEA_DIM, 3, 3), jnp.float32),
        "bn_gamma": 0.5 + jax.random.uniform(ks[1], (L,), jnp.float32),
        "bn_beta": 0.05 * jax.random.normal(ks[2], (L,), jnp.float32),
        "bn_mean": 0.05 * jax.random.normal(ks[3], (L,), jnp.float32),
        "bn_var": 0.5 + jax.random.uniform(ks[4], (L,), jnp.float32),
        "wa": 0.1 * jax.random.normal(ks[5], (L, D), jnp.float32),
        "ba": 0.05 * jax.random.normal(ks[6], (1, D), jnp.float32),
        "wb": 0.1 * jax.random.normal(ks[7], (L, D), jnp.float32),
        "bb": 0.05 * jax.random.normal(ks[8], (1, D), jnp.float32),
        "wc": 0.1 * jax.random.normal(ks[9], (D, N_CLS), jnp.float32),
        "bc": 0.05 * jax.random.normal(ks[10], (1, N_CLS), jnp.float32),
        "wcls": 0.1 * jax.random.normal(ks[11], (L, N_CLS), jnp.float32),
        "bcls": 0.05 * jax.random.normal(ks[12], (1, N_CLS), jnp.float32),
    }

    x = jax.random.normal(ks[13], (FEA_DIM, H, W), jnp.float32)  # torch layout: (C, H, W)
    mask = np.ones((H, W), dtype=np.int32)
    mask[0, 0] = 0
    mask[5, 7] = 0
    mask[31, 31] = 0                                             # N = 1021 masked-in positions

    final_score_sp, Y_prob, Y_hat, ref_score, results = smmile_forward(x, mask, params)
    jax.block_until_ready(final_score_sp)
    jax.block_until_ready(Y_prob[0])

    # correctness check against pure-JAX reference (tolerance covers approx EUP reciprocal)
    ref_final, ref_prob = reference_forward(x, mask, params)
    assert np.allclose(np.asarray(final_score_sp), np.asarray(ref_final),
                       atol=1e-4, rtol=1e-3), "final_score mismatch"
    assert np.allclose(np.asarray(Y_prob[0]), np.asarray(ref_prob),
                       atol=2e-3, rtol=1e-2), "Y_prob mismatch"
    ref_prob_np = np.asarray(ref_prob)
    if abs(float(ref_prob_np[0] - ref_prob_np[1])) > 5e-3:       # only assert argmax on a clear margin
        assert int(Y_hat) == int(np.argmax(ref_prob_np)), "Y_hat mismatch"

    print("KERNEL_OK")
</pallas_src>

<mosaic_0001>
module attributes {stable_mosaic.version = 11 : i64} {
  func.func @conv_head_kernel(%arg0: i32, %arg1: memref<8x34x32xf32, #tpu.memory_space<vmem>>, %arg2: memref<8x34x32xf32, #tpu.memory_space<vmem>>, %arg3: memref<8x34x32xf32, #tpu.memory_space<vmem>>, %arg4: memref<9x32x128xf32, #tpu.memory_space<vmem>>, %arg5: memref<1x128xf32, #tpu.memory_space<vmem>>, %arg6: memref<128x64xf32, #tpu.memory_space<vmem>>, %arg7: memref<1x64xf32, #tpu.memory_space<vmem>>, %arg8: memref<128x64xf32, #tpu.memory_space<vmem>>, %arg9: memref<1x64xf32, #tpu.memory_space<vmem>>, %arg10: memref<128x4xf32, #tpu.memory_space<vmem>>, %arg11: memref<64x4xf32, #tpu.memory_space<vmem>>, %arg12: memref<1x4xf32, #tpu.memory_space<vmem>>, %arg13: memref<256x4xf32, #tpu.memory_space<vmem>>) attributes {dimension_semantics = [#tpu.dimension_semantics<parallel>], iteration_bounds = array<i64: 4>, scalar_prefetch = 0 : i64, scratch_operands = 0 : i64, tpu.core_type = #tpu.core_type<tc>, window_params = [{transform_indices = @transform_0, window_bounds = array<i64: 8, 34, 32>}, {transform_indices = @transform_1, window_bounds = array<i64: 8, 34, 32>}, {transform_indices = @transform_2, window_bounds = array<i64: 8, 34, 32>}, {pipeline_mode = #tpu.pipeline_mode<synchronous>, transform_indices = @transform_3, window_bounds = array<i64: 9, 32, 128>}, {pipeline_mode = #tpu.pipeline_mode<synchronous>, transform_indices = @transform_4, window_bounds = array<i64: 1, 128>}, {pipeline_mode = #tpu.pipeline_mode<synchronous>, transform_indices = @transform_5, window_bounds = array<i64: 128, 64>}, {pipeline_mode = #tpu.pipeline_mode<synchronous>, transform_indices = @transform_6, window_bounds = array<i64: 1, 64>}, {pipeline_mode = #tpu.pipeline_mode<synchronous>, transform_indices = @transform_7, window_bounds = array<i64: 128, 64>}, {pipeline_mode = #tpu.pipeline_mode<synchronous>, transform_indices = @transform_8, window_bounds = array<i64: 1, 64>}, {pipeline_mode = #tpu.pipeline_mode<synchronous>, transform_indices = @transform_9, window_bounds = array<i64: 128, 4>}, {pipeline_mode = #tpu.pipeline_mode<synchronous>, transform_indices = @transform_10, window_bounds = array<i64: 64, 4>}, {pipeline_mode = #tpu.pipeline_mode<synchronous>, transform_indices = @transform_11, window_bounds = array<i64: 1, 4>}, {transform_indices = @transform_12, window_bounds = array<i64: 256, 4>}]} {
    %cst = arith.constant 0.000000e+00 : f32
    %0 = vector.broadcast %cst : f32 to vector<256x128xf32>
    %c0 = arith.constant 0 : index
    %c0_0 = arith.constant 0 : index
    %c0_1 = arith.constant 0 : index
    %1 = vector.load %arg1[%c0, %c0_0, %c0_1] : memref<8x34x32xf32, #tpu.memory_space<vmem>>, vector<8x34x32xf32>
    %c0_2 = arith.constant 0 : index
    %c0_3 = arith.constant 0 : index
    %c0_4 = arith.constant 0 : index
    %2 = vector.load %arg2[%c0_2, %c0_3, %c0_4] : memref<8x34x32xf32, #tpu.memory_space<vmem>>, vector<8x34x32xf32>
    %c0_5 = arith.constant 0 : index
    %c0_6 = arith.constant 0 : index
    %c0_7 = arith.constant 0 : index
    %3 = vector.load %arg3[%c0_5, %c0_6, %c0_7] : memref<8x34x32xf32, #tpu.memory_space<vmem>>, vector<8x34x32xf32>
    %4 = vector.extract_strided_slice %1 {offsets = [0, 0, 0], sizes = [8, 32, 32], strides = [1, 1, 1]} : vector<8x34x32xf32> to vector<8x32x32xf32>
    %5 = vector.shape_cast %4 : vector<8x32x32xf32> to vector<256x32xf32>
    %c0_8 = arith.constant 0 : index
    %c0_9 = arith.constant 0 : index
    %c0_10 = arith.constant 0 : index
    %6 = vector.load %arg4[%c0_8, %c0_9, %c0_10] : memref<9x32x128xf32, #tpu.memory_space<vmem>>, vector<1x32x128xf32>
    %7 = vector.shape_cast %6 : vector<1x32x128xf32> to vector<32x128xf32>
    %cst_11 = arith.constant dense<0.000000e+00> : vector<256x128xf32>
    %8 = tpu.matmul %5, %7, %cst_11 {dimension_numbers = #tpu.dot_dimension_numbers<[1], [0], [0], [1], [0, 0, 1, 1], [], []>} : vector<256x32xf32>, vector<32x128xf32>, vector<256x128xf32> -> vector<256x128xf32>
    %9 = arith.addf %0, %8 : vector<256x128xf32>
    %10 = vector.extract_strided_slice %1 {offsets = [0, 1, 0], sizes = [8, 32, 32], strides = [1, 1, 1]} : vector<8x34x32xf32> to vector<8x32x32xf32>
    %11 = vector.shape_cast %10 : vector<8x32x32xf32> to vector<256x32xf32>
    %c1 = arith.constant 1 : index
    %c0_12 = arith.constant 0 : index
    %c0_13 = arith.constant 0 : index
    %12 = vector.load %arg4[%c1, %c0_12, %c0_13] : memref<9x32x128xf32, #tpu.memory_space<vmem>>, vector<1x32x128xf32>
    %13 = vector.shape_cast %12 : vector<1x32x128xf32> to vector<32x128xf32>
    %cst_14 = arith.constant dense<0.000000e+00> : vector<256x128xf32>
    %14 = tpu.matmul %11, %13, %cst_14 {dimension_numbers = #tpu.dot_dimension_numbers<[1], [0], [0], [1], [0, 0, 1, 1], [], []>} : vector<256x32xf32>, vector<32x128xf32>, vector<256x128xf32> -> vector<256x128xf32>
    %15 = arith.addf %9, %14 : vector<256x128xf32>
    %16 = vector.extract_strided_slice %1 {offsets = [0, 2, 0], sizes = [8, 32, 32], strides = [1, 1, 1]} : vector<8x34x32xf32> to vector<8x32x32xf32>
    %17 = vector.shape_cast %16 : vector<8x32x32xf32> to vector<256x32xf32>
    %c2 = arith.constant 2 : index
    %c0_15 = arith.constant 0 : index
    %c0_16 = arith.constant 0 : index
    %18 = vector.load %arg4[%c2, %c0_15, %c0_16] : memref<9x32x128xf32, #tpu.memory_space<vmem>>, vector<1x32x128xf32>
    %19 = vector.shape_cast %18 : vector<1x32x128xf32> to vector<32x128xf32>
    %cst_17 = arith.constant dense<0.000000e+00> : vector<256x128xf32>
    %20 = tpu.matmul %17, %19, %cst_17 {dimension_numbers = #tpu.dot_dimension_numbers<[1], [0], [0], [1], [0, 0, 1, 1], [], []>} : vector<256x32xf32>, vector<32x128xf32>, vector<256x128xf32> -> vector<256x128xf32>
    %21 = arith.addf %15, %20 : vector<256x128xf32>
    %22 = vector.extract_strided_slice %2 {offsets = [0, 0, 0], sizes = [8, 32, 32], strides = [1, 1, 1]} : vector<8x34x32xf32> to vector<8x32x32xf32>
    %23 = vector.shape_cast %22 : vector<8x32x32xf32> to vector<256x32xf32>
    %c3 = arith.constant 3 : index
    %c0_18 = arith.constant 0 : index
    %c0_19 = arith.constant 0 : index
    %24 = vector.load %arg4[%c3, %c0_18, %c0_19] : memref<9x32x128xf32, #tpu.memory_space<vmem>>, vector<1x32x128xf32>
    %25 = vector.shape_cast %24 : vector<1x32x128xf32> to vector<32x128xf32>
    %cst_20 = arith.constant dense<0.000000e+00> : vector<256x128xf32>
    %26 = tpu.matmul %23, %25, %cst_20 {dimension_numbers = #tpu.dot_dimension_numbers<[1], [0], [0], [1], [0, 0, 1, 1], [], []>} : vector<256x32xf32>, vector<32x128xf32>, vector<256x128xf32> -> vector<256x128xf32>
    %27 = arith.addf %21, %26 : vector<256x128xf32>
    %28 = vector.extract_strided_slice %2 {offsets = [0, 1, 0], sizes = [8, 32, 32], strides = [1, 1, 1]} : vector<8x34x32xf32> to vector<8x32x32xf32>
    %29 = vector.shape_cast %28 : vector<8x32x32xf32> to vector<256x32xf32>
    %c4 = arith.constant 4 : index
    %c0_21 = arith.constant 0 : index
    %c0_22 = arith.constant 0 : index
    %30 = vector.load %arg4[%c4, %c0_21, %c0_22] : memref<9x32x128xf32, #tpu.memory_space<vmem>>, vector<1x32x128xf32>
    %31 = vector.shape_cast %30 : vector<1x32x128xf32> to vector<32x128xf32>
    %cst_23 = arith.constant dense<0.000000e+00> : vector<256x128xf32>
    %32 = tpu.matmul %29, %31, %cst_23 {dimension_numbers = #tpu.dot_dimension_numbers<[1], [0], [0], [1], [0, 0, 1, 1], [], []>} : vector<256x32xf32>, vector<32x128xf32>, vector<256x128xf32> -> vector<256x128xf32>
    %33 = arith.addf %27, %32 : vector<256x128xf32>
    %34 = vector.extract_strided_slice %2 {offsets = [0, 2, 0], sizes = [8, 32, 32], strides = [1, 1, 1]} : vector<8x34x32xf32> to vector<8x32x32xf32>
    %35 = vector.shape_cast %34 : vector<8x32x32xf32> to vector<256x32xf32>
    %c5 = arith.constant 5 : index
    %c0_24 = arith.constant 0 : index
    %c0_25 = arith.constant 0 : index
    %36 = vector.load %arg4[%c5, %c0_24, %c0_25] : memref<9x32x128xf32, #tpu.memory_space<vmem>>, vector<1x32x128xf32>
    %37 = vector.shape_cast %36 : vector<1x32x128xf32> to vector<32x128xf32>
    %cst_26 = arith.constant dense<0.000000e+00> : vector<256x128xf32>
    %38 = tpu.matmul %35, %37, %cst_26 {dimension_numbers = #tpu.dot_dimension_numbers<[1], [0], [0], [1], [0, 0, 1, 1], [], []>} : vector<256x32xf32>, vector<32x128xf32>, vector<256x128xf32> -> vector<256x128xf32>
    %39 = arith.addf %33, %38 : vector<256x128xf32>
    %40 = vector.extract_strided_slice %3 {offsets = [0, 0, 0], sizes = [8, 32, 32], strides = [1, 1, 1]} : vector<8x34x32xf32> to vector<8x32x32xf32>
    %41 = vector.shape_cast %40 : vector<8x32x32xf32> to vector<256x32xf32>
    %c6 = arith.constant 6 : index
    %c0_27 = arith.constant 0 : index
    %c0_28 = arith.constant 0 : index
    %42 = vector.load %arg4[%c6, %c0_27, %c0_28] : memref<9x32x128xf32, #tpu.memory_space<vmem>>, vector<1x32x128xf32>
    %43 = vector.shape_cast %42 : vector<1x32x128xf32> to vector<32x128xf32>
    %cst_29 = arith.constant dense<0.000000e+00> : vector<256x128xf32>
    %44 = tpu.matmul %41, %43, %cst_29 {dimension_numbers = #tpu.dot_dimension_numbers<[1], [0], [0], [1], [0, 0, 1, 1], [], []>} : vector<256x32xf32>, vector<32x128xf32>, vector<256x128xf32> -> vector<256x128xf32>
    %45 = arith.addf %39, %44 : vector<256x128xf32>
    %46 = vector.extract_strided_slice %3 {offsets = [0, 1, 0], sizes = [8, 32, 32], strides = [1, 1, 1]} : vector<8x34x32xf32> to vector<8x32x32xf32>
    %47 = vector.shape_cast %46 : vector<8x32x32xf32> to vector<256x32xf32>
    %c7 = arith.constant 7 : index
    %c0_30 = arith.constant 0 : index
    %c0_31 = arith.constant 0 : index
    %48 = vector.load %arg4[%c7, %c0_30, %c0_31] : memref<9x32x128xf32, #tpu.memory_space<vmem>>, vector<1x32x128xf32>
    %49 = vector.shape_cast %48 : vector<1x32x128xf32> to vector<32x128xf32>
    %cst_32 = arith.constant dense<0.000000e+00> : vector<256x128xf32>
    %50 = tpu.matmul %47, %49, %cst_32 {dimension_numbers = #tpu.dot_dimension_numbers<[1], [0], [0], [1], [0, 0, 1, 1], [], []>} : vector<256x32xf32>, vector<32x128xf32>, vector<256x128xf32> -> vector<256x128xf32>
    %51 = arith.addf %45, %50 : vector<256x128xf32>
    %52 = vector.extract_strided_slice %3 {offsets = [0, 2, 0], sizes = [8, 32, 32], strides = [1, 1, 1]} : vector<8x34x32xf32> to vector<8x32x32xf32>
    %53 = vector.shape_cast %52 : vector<8x32x32xf32> to vector<256x32xf32>
    %c8 = arith.constant 8 : index
    %c0_33 = arith.constant 0 : index
    %c0_34 = arith.constant 0 : index
    %54 = vector.load %arg4[%c8, %c0_33, %c0_34] : memref<9x32x128xf32, #tpu.memory_space<vmem>>, vector<1x32x128xf32>
    %55 = vector.shape_cast %54 : vector<1x32x128xf32> to vector<32x128xf32>
    %cst_35 = arith.constant dense<0.000000e+00> : vector<256x128xf32>
    %56 = tpu.matmul %53, %55, %cst_35 {dimension_numbers = #tpu.dot_dimension_numbers<[1], [0], [0], [1], [0, 0, 1, 1], [], []>} : vector<256x32xf32>, vector<32x128xf32>, vector<256x128xf32> -> vector<256x128xf32>
    %57 = arith.addf %51, %56 : vector<256x128xf32>
    %c0_36 = arith.constant 0 : index
    %c0_37 = arith.constant 0 : index
    %58 = vector.load %arg5[%c0_36, %c0_37] : memref<1x128xf32, #tpu.memory_space<vmem>>, vector<1x128xf32>
    %59 = vector.broadcast %58 : vector<1x128xf32> to vector<256x128xf32>
    %60 = arith.addf %57, %59 : vector<256x128xf32>
    %cst_38 = arith.constant 0.000000e+00 : f32
    %61 = vector.broadcast %cst_38 : f32 to vector<256x128xf32>
    %62 = arith.maximumf %60, %61 : vector<256x128xf32>
    %c0_39 = arith.constant 0 : index
    %c0_40 = arith.constant 0 : index
    %63 = vector.load %arg6[%c0_39, %c0_40] : memref<128x64xf32, #tpu.memory_space<vmem>>, vector<128x64xf32>
    %cst_41 = arith.constant dense<0.000000e+00> : vector<256x64xf32>
    %64 = tpu.matmul %62, %63, %cst_41 {dimension_numbers = #tpu.dot_dimension_numbers<[1], [0], [0], [1], [0, 0, 1, 1], [], []>} : vector<256x128xf32>, vector<128x64xf32>, vector<256x64xf32> -> vector<256x64xf32>
    %c0_42 = arith.constant 0 : index
    %c0_43 = arith.constant 0 : index
    %65 = vector.load %arg7[%c0_42, %c0_43] : memref<1x64xf32, #tpu.memory_space<vmem>>, vector<1x64xf32>
    %66 = vector.broadcast %65 : vector<1x64xf32> to vector<256x64xf32>
    %67 = arith.addf %64, %66 : vector<256x64xf32>
    %68 = math.tanh %67 : vector<256x64xf32>
    %c0_44 = arith.constant 0 : index
    %c0_45 = arith.constant 0 : index
    %69 = vector.load %arg8[%c0_44, %c0_45] : memref<128x64xf32, #tpu.memory_space<vmem>>, vector<128x64xf32>
    %cst_46 = arith.constant dense<0.000000e+00> : vector<256x64xf32>
    %70 = tpu.matmul %62, %69, %cst_46 {dimension_numbers = #tpu.dot_dimension_numbers<[1], [0], [0], [1], [0, 0, 1, 1], [], []>} : vector<256x128xf32>, vector<128x64xf32>, vector<256x64xf32> -> vector<256x64xf32>
    %c0_47 = arith.constant 0 : index
    %c0_48 = arith.constant 0 : index
    %71 = vector.load %arg9[%c0_47, %c0_48] : memref<1x64xf32, #tpu.memory_space<vmem>>, vector<1x64xf32>
    %72 = vector.broadcast %71 : vector<1x64xf32> to vector<256x64xf32>
    %73 = arith.addf %70, %72 : vector<256x64xf32>
    %74 = arith.negf %73 : vector<256x64xf32>
    %75 = math.exp %74 : vector<256x64xf32>
    %cst_49 = arith.constant 1.000000e+00 : f32
    %76 = vector.broadcast %cst_49 : f32 to vector<256x64xf32>
    %77 = arith.addf %76, %75 : vector<256x64xf32>
    %78 = arith.divf %76, %77 : vector<256x64xf32>
    %79 = arith.mulf %68, %78 : vector<256x64xf32>
    %c0_50 = arith.constant 0 : index
    %c0_51 = arith.constant 0 : index
    %80 = vector.load %arg10[%c0_50, %c0_51] : memref<128x4xf32, #tpu.memory_space<vmem>>, vector<128x4xf32>
    %cst_52 = arith.constant dense<0.000000e+00> : vector<256x4xf32>
    %81 = tpu.matmul %62, %80, %cst_52 {dimension_numbers = #tpu.dot_dimension_numbers<[1], [0], [0], [1], [0, 0, 1, 1], [], []>} : vector<256x128xf32>, vector<128x4xf32>, vector<256x4xf32> -> vector<256x4xf32>
    %c0_53 = arith.constant 0 : index
    %c0_54 = arith.constant 0 : index
    %82 = vector.load %arg11[%c0_53, %c0_54] : memref<64x4xf32, #tpu.memory_space<vmem>>, vector<64x4xf32>
    %cst_55 = arith.constant dense<0.000000e+00> : vector<256x4xf32>
    %83 = tpu.matmul %79, %82, %cst_55 {dimension_numbers = #tpu.dot_dimension_numbers<[1], [0], [0], [1], [0, 0, 1, 1], [], []>} : vector<256x64xf32>, vector<64x4xf32>, vector<256x4xf32> -> vector<256x4xf32>
    %84 = arith.addf %81, %83 : vector<256x4xf32>
    %c0_56 = arith.constant 0 : index
    %c0_57 = arith.constant 0 : index
    %85 = vector.load %arg12[%c0_56, %c0_57] : memref<1x4xf32, #tpu.memory_space<vmem>>, vector<1x4xf32>
    %86 = vector.broadcast %85 : vector<1x4xf32> to vector<256x4xf32>
    %87 = arith.addf %84, %86 : vector<256x4xf32>
    %c0_58 = arith.constant 0 : index
    %c0_59 = arith.constant 0 : index
    %88 = vector.load %arg13[%c0_58, %c0_59] : memref<256x4xf32, #tpu.memory_space<vmem>>, vector<256x4xf32>
    tpu.vector_store %arg13[%c0_58, %c0_59], %87 {strides = array<i32>} : memref<256x4xf32, #tpu.memory_space<vmem>>, vector<256x4xf32>,
    return
  }
  func.func @transform_0(%arg0: i32) -> (i32, i32, i32) {
    %c0_i32 = arith.constant 0 : i32
    %c0_i32_0 = arith.constant 0 : i32
    %c0_i32_1 = arith.constant 0 : i32
    return %arg0, %c0_i32, %c0_i32_0 : i32, i32, i32
  }
  func.func @transform_1(%arg0: i32) -> (i32, i32, i32) {
    %c0_i32 = arith.constant 0 : i32
    %c0_i32_0 = arith.constant 0 : i32
    %c0_i32_1 = arith.constant 0 : i32
    return %arg0, %c0_i32, %c0_i32_0 : i32, i32, i32
  }
  func.func @transform_2(%arg0: i32) -> (i32, i32, i32) {
    %c0_i32 = arith.constant 0 : i32
    %c0_i32_0 = arith.constant 0 : i32
    %c0_i32_1 = arith.constant 0 : i32
    return %arg0, %c0_i32, %c0_i32_0 : i32, i32, i32
  }
  func.func @transform_3(%arg0: i32) -> (i32, i32, i32) {
    %c0_i32 = arith.constant 0 : i32
    %c0_i32_0 = arith.constant 0 : i32
    %c0_i32_1 = arith.constant 0 : i32
    %c0_i32_2 = arith.constant 0 : i32
    return %c0_i32, %c0_i32_0, %c0_i32_1 : i32, i32, i32
  }
  func.func @transform_4(%arg0: i32) -> (i32, i32) {
    %c0_i32 = arith.constant 0 : i32
    %c0_i32_0 = arith.constant 0 : i32
    %c0_i32_1 = arith.constant 0 : i32
    return %c0_i32, %c0_i32_0 : i32, i32
  }
  func.func @transform_5(%arg0: i32) -> (i32, i32) {
    %c0_i32 = arith.constant 0 : i32
    %c0_i32_0 = arith.constant 0 : i32
    %c0_i32_1 = arith.constant 0 : i32
    return %c0_i32, %c0_i32_0 : i32, i32
  }
  func.func @transform_6(%arg0: i32) -> (i32, i32) {
    %c0_i32 = arith.constant 0 : i32
    %c0_i32_0 = arith.constant 0 : i32
    %c0_i32_1 = arith.constant 0 : i32
    return %c0_i32, %c0_i32_0 : i32, i32
  }
  func.func @transform_7(%arg0: i32) -> (i32, i32) {
    %c0_i32 = arith.constant 0 : i32
    %c0_i32_0 = arith.constant 0 : i32
    %c0_i32_1 = arith.constant 0 : i32
    return %c0_i32, %c0_i32_0 : i32, i32
  }
  func.func @transform_8(%arg0: i32) -> (i32, i32) {
    %c0_i32 = arith.constant 0 : i32
    %c0_i32_0 = arith.constant 0 : i32
    %c0_i32_1 = arith.constant 0 : i32
    return %c0_i32, %c0_i32_0 : i32, i32
  }
  func.func @transform_9(%arg0: i32) -> (i32, i32) {
    %c0_i32 = arith.constant 0 : i32
    %c0_i32_0 = arith.constant 0 : i32
    %c0_i32_1 = arith.constant 0 : i32
    return %c0_i32, %c0_i32_0 : i32, i32
  }
  func.func @transform_10(%arg0: i32) -> (i32, i32) {
    %c0_i32 = arith.constant 0 : i32
    %c0_i32_0 = arith.constant 0 : i32
    %c0_i32_1 = arith.constant 0 : i32
    return %c0_i32, %c0_i32_0 : i32, i32
  }
  func.func @transform_11(%arg0: i32) -> (i32, i32) {
    %c0_i32 = arith.constant 0 : i32
    %c0_i32_0 = arith.constant 0 : i32
    %c0_i32_1 = arith.constant 0 : i32
    return %c0_i32, %c0_i32_0 : i32, i32
  }
  func.func @transform_12(%arg0: i32) -> (i32, i32) {
    %c0_i32 = arith.constant 0 : i32
    %c0_i32_0 = arith.constant 0 : i32
    return %arg0, %c0_i32 : i32, i32
  }
}

</mosaic_0001>

<bundles_post_ra>
// kernel: tpu_custom_call.1
= control target key start
LH: loop header
LB: loop body
LE: loop exit
PB: predicated region body
PF: predicated region fallthrough
CT: control target
= control target key end

     0   :  { %s5248_s21 = smov 0   ;;  %s7400_s0 = inlined_call_operand.vmem [shape: f32[32,34,32], index: 0, kind: input, shape index: {}]   ;;  %s7401_s1 = inlined_call_operand.vmem [shape: f32[32,34,32], index: 1, kind: input, shape index: {}]   ;;  %s7402_s2 = inlined_call_operand.vmem [shape: f32[32,34,32], index: 2, kind: input, shape index: {}]   ;;  %s7403_s3 = inlined_call_operand.vmem [shape: f32[9,32,128], index: 3, kind: input, shape index: {}]   ;;  %s7404_s4 = inlined_call_operand.vmem [shape: f32[1,128], index: 4, kind: input, shape index: {}]   ;;  %s7405_s5 = inlined_call_operand.vmem [shape: f32[128,64], index: 5, kind: input, shape index: {}]   ;;  %s7406_s6 = inlined_call_operand.vmem [shape: f32[1,64], index: 6, kind: input, shape index: {}]   ;;  %s7407_s7 = inlined_call_operand.vmem [shape: f32[128,64], index: 7, kind: input, shape index: {}]   ;;  %s7408_s8 = inlined_call_operand.vmem [shape: f32[1,64], index: 8, kind: input, shape index: {}]   ;;  %s7409_s9 = inlined_call_operand.vmem [shape: f32[128,4], index: 9, kind: input, shape index: {}]   ;;  %s7410_s10 = inlined_call_operand.vmem [shape: f32[64,4], index: 10, kind: input, shape index: {}]   ;;  %s7411_s11 = inlined_call_operand.vmem [shape: f32[1,4], index: 11, kind: input, shape index: {}]   ;;  %s7412_s12 = inlined_call_operand.vmem [shape: f32[1024,4], index: 12, kind: output, shape index: {}]  }
   0x1 LB: > { %s4508_s22 = sadd.s32 4294967295, %s5181_s21   ;;  %p4512_p0 = scmp.ge.s32.totalorder %s5181_s21, 1  ;;  %s5181_s21 = sphi %s5248_s21, %s22_s21  }
   0x2   : > { %p388_p1 = scmp.lt.s32.totalorder %s5181_s21, 5 }
   0x4   : > { %p389_p2 = pnand %p4512_p0, %p388_p1 }
   0x6   : > { %392 = sbr.rel (%p389_p2) target bundleno = 1149 (0x47d), region = 68 }
   0xb   : > { %v4524_v0 = vld [vmem:[%s7403_s3 + $0x38] sm:$0xff]  ;;  %v4523_v1 = vld [vmem:[%s7403_s3 + $0x30] sm:$0xff]  ;;  %s4513_s27 = sshll.u32 %s4508_s22, 3  ;;  %v4522_v2 = vld [vmem:[%s7403_s3 + $0x28] sm:$0xff]  ;;  %vm634_vm0 = vcmask 1046528   ;;  %vm712_vm1 = vcmask 261120  }
   0xc   : > { %789 = vmatpush.msra.mxu0 %v4524_v0  ;;  %4907 = vmatpush.msra.mxu1 %v4524_v0  ;;  %p444_p3 = scmp.lt.s32.totalorder %s4513_s27, 31  ;;  %v4521_v3 = vld [vmem:[%s7403_s3 + $0x20] sm:$0xff]  ;;  %v4592_v4 = vld [vmem:[%s7403_s3 + $0x58] sm:$0xff]  ;;  %v4591_v6 = vld [vmem:[%s7403_s3 + $0x50] sm:$0xff]  ;;  %vm1067_vm2 = vcmask 1045504   ;;  %vm4036_vm7 = vcmask 523264  }
   0xd   : > { %4908 = vmatpush.msra.mxu2 %v4524_v0  ;;  %4909 = vmatpush.msra.mxu3 %v4524_v0  ;;  %v593_v5 = vld [vmem:[%s7403_s3 + $0x18] sm:$0xff]  ;;  %v4590_v36 = vld [vmem:[%s7403_s3 + $0x48] sm:$0xff]  ;;  %v592_v47 = vld [vmem:[%s7403_s3 + $0x10] sm:$0xff]  ;;  %s4519_s29 = sshll.u32 %s4508_s22, 5 }
   0xe   : > { %790 = vmatpush.msra.mxu0 %v4523_v1  ;;  %4910 = vmatpush.msra.mxu1 %v4523_v1  ;;  %s7432_s27 = smov (!%p444_p3, %s4513_s27), 31  ;;  %v4589_v58 = vld [vmem:[%s7403_s3 + $0x40] sm:$0xff]  ;;  %p465_p4 = scmp.lt.s32.totalorder %s4519_s29, 127 }
   0xf   : > { %4911 = vmatpush.msra.mxu2 %v4523_v1  ;;  %4912 = vmatpush.msra.mxu3 %v4523_v1  ;;  %s5270_s14 = smul.u32 40, %s7432_s27 }
  0x10   : > { %791 = vmatpush.msra.mxu0 %v4522_v2  ;;  %4913 = vmatpush.msra.mxu1 %v4522_v2  ;;  %s7434_s29 = smov (!%p465_p4, %s4519_s29), 127 }
  0x11   : > { %4914 = vmatpush.msra.mxu2 %v4522_v2  ;;  %4915 = vmatpush.msra.mxu3 %v4522_v2  ;;  %s5282_s23 = scalar_lea.vmem %s7400_s0, %s5270_s14  ;;  %s5528_s28 = scalar_lea.vmem %s7401_s1, %s5270_s14 }
  0x12   : > { %792 = vmatpush.msra.mxu0 %v4521_v3  ;;  %4916 = vmatpush.msra.mxu1 %v4521_v3  ;;  %v5288_v7 = vld [vmem:[%s5282_s23] sm:$0xff]  ;;  %v5291_v8 = vld [vmem:[%s5282_s23 + $0x8] sm:$0xff]  ;;  %v5294_v9 = vld [vmem:[%s5282_s23 + $0x50] sm:$0xff]  ;;  %s6006_s25 = scalar_lea.vmem %s7402_s2, %s5270_s14  ;;  %s4520_s22 = sshll.u32 %s7434_s29, 3 }
  0x13   : > { %4917 = vmatpush.msra.mxu2 %v4521_v3  ;;  %4918 = vmatpush.msra.mxu3 %v4521_v3  ;;  %v635_v10 = vrot.slane %v5288_v7, 1  ;;  %v636_v11 = vrot.slane %v5291_v8, 1  ;;  %v5299_v12 = vld [vmem:[%s5282_s23 + $0x58] sm:$0xff]  ;;  %v653_v13 = vrot.slane %v5294_v9, 1  ;;  %v5303_v14 = vld [vmem:[%s5282_s23 + $0xa0] sm:$0xff]  ;;  %v5306_v15 = vld [vmem:[%s5282_s23 + $0xa8] sm:$0xff]  ;;  %s7140_s17 = scalar_lea.vmem %s7412_s12, %s4520_s22 }
  0x14   : > { %966 = vmatpush.msrb.mxu1 %v593_v5  ;;  %v654_v16 = vrot.slane %v5299_v12, 1  ;;  %v671_v17 = vrot.slane %v5303_v14, 1  ;;  %v672_v18 = vrot.slane %v5306_v15, 1  ;;  %v500_v19 = vld [vmem:[%s5282_s23 + $0xf0] sm:$0xff]  ;;  %v501_v20 = vld [vmem:[%s5282_s23 + $0xf8] sm:$0xff]  ;;  %v5318_v25 = vld [vmem:[%s5282_s23 + $0x60] sm:$0xff] }
  0x15   : > { %1221 = vmatpush.msrb.mxu2 %v4592_v4  ;;  %v5314_v21 = vld [vmem:[%s5282_s23 + $0x10] sm:$0xff]  ;;  %v637_v22 = vsel %vm634_vm0, %v635_v10, %v636_v11  ;;  %v689_v23 = vrot.slane %v500_v19, 1  ;;  %v690_v24 = vrot.slane %v501_v20, 1  ;;  %v502_v29 = vld [vmem:[%s5282_s23 + $0x100] sm:$0xff]  ;;  %v656_v32 = vrot.slane %v5318_v25, 1  ;;  %v5341_v39 = vld [vmem:[%s5282_s23 + $0x18] sm:$0xff] }
  0x16   : > { %v5321_v26 = vld [vmem:[%s5282_s23 + $0xb0] sm:$0xff]  ;;  %4525 = vmatmul.msk.f32.vlgmr.msra.gmra.mxu0 %vm712_vm1, %v637_v22  ;;  %v655_v27 = vsel %vm634_vm0, %v653_v13, %v654_v16  ;;  %v673_v28 = vsel %vm634_vm0, %v671_v17, %v672_v18  ;;  %v638_v31 = vrot.slane %v5314_v21, 1  ;;  %v692_v34 = vrot.slane %v502_v29, 1  ;;  %v5345_v41 = vld [vmem:[%s5282_s23 + $0x68] sm:$0xff]  ;;  %v5348_v42 = vld [vmem:[%s5282_s23 + $0xb8] sm:$0xff]  ;;  %967 = vmatpush.msrb.mxu1 %v592_v47 }
  0x17   : > { %1222 = vmatpush.msrb.mxu2 %v4591_v6  ;;  %4533 = vmatmul.msk.f32.vlgmr.msra.gmra.mxu1 %vm712_vm1, %v655_v27  ;;  %v691_v30 = vsel %vm634_vm0, %v689_v23, %v690_v24  ;;  %v674_v33 = vrot.slane %v5321_v26, 1  ;;  %v657_v37 = vsel %vm634_vm0, %v654_v16, %v656_v32  ;;  %v503_v43 = vld [vmem:[%s5282_s23 + $0x108] sm:$0xff]  ;;  %v640_v44 = vrot.slane %v5341_v39, 1  ;;  %v5365_v52 = vld [vmem:[%s5282_s23 + $0x20] sm:$0x3]  ;;  %v5392_v2 = vld [vmem:[%s5282_s23 + $0x30] sm:$0xff] }
  0x18   : > { %4541 = vmatmul.msk.f32.vlgmr.msra.gmra.mxu2 %vm712_vm1, %v673_v28  ;;  %4549 = vmatmul.msk.f32.vlgmr.msra.gmra.mxu3 %vm712_vm1, %v691_v30  ;;  %v639_v35 = vsel %vm634_vm0, %v636_v11, %v638_v31  ;;  %v693_v40 = vsel %vm634_vm0, %v690_v24, %v692_v34  ;;  %v658_v45 = vrot.slane %v5345_v41, 1  ;;  %v676_v46 = vrot.slane %v5348_v42, 1  ;;  %v5369_v54 = vld [vmem:[%s5282_s23 + $0x70] sm:$0x3]  ;;  %v5372_v55 = vld [vmem:[%s5282_s23 + $0xc0] sm:$0x3] }
  0x19   : > { %v675_v38 = vsel %vm634_vm0, %v672_v18, %v674_v33  ;;  %1223 = vmatpush.msrb.mxu2 %v4590_v36  ;;  %v694_v48 = vrot.slane %v503_v43, 1  ;;  %v641_v49 = vsel %vm634_vm0, %v638_v31, %v640_v44  ;;  %v504_v56 = vld [vmem:[%s5282_s23 + $0x110] sm:$0x3]  ;;  %v642_v57 = vrot.slane %v5365_v52, 1  ;;  %v5389_v1 = vld [vmem:[%s5282_s23 + $0x28] sm:$0xff]  ;;  %v5395_v3 = vld [vmem:[%s5282_s23 + $0x78] sm:$0xff] }
  0x1a   : > { %v659_v50 = vsel %vm634_vm0, %v656_v32, %v658_v45  ;;  %v677_v51 = vsel %vm634_vm0, %v674_v33, %v676_v46  ;;  %v660_v59 = vrot.slane %v5369_v54, 1  ;;  %v678_v60 = vrot.slane %v5372_v55, 1  ;;  %v5399_v5 = vld [vmem:[%s5282_s23 + $0x80] sm:$0xff]  ;;  %v5402_v6 = vld [vmem:[%s5282_s23 + $0xc8] sm:$0xff]  ;;  %v5405_v10 = vld [vmem:[%s5282_s23 + $0xd0] sm:$0xff] }
  0x1b   : > { %v695_v53 = vsel %vm634_vm0, %v692_v34, %v694_v48  ;;  %1224 = vmatpush.msrb.mxu2 %v4589_v58  ;;  %v696_v61 = vrot.slane %v504_v56, 1  ;;  %v643_v62 = vsel %vm634_vm0, %v640_v44, %v642_v57  ;;  %v505_v11 = vld [vmem:[%s5282_s23 + $0x118] sm:$0xff]  ;;  %v506_v13 = vld [vmem:[%s5282_s23 + $0x120] sm:$0xff]  ;;  %v644_v16 = vrot.slane %v5389_v1, 1  ;;  %v591_v24 = vld [vmem:[%s7403_s3 + $0x8] sm:$0xff] }
  0x1c   : > { %v661_v63 = vsel %vm634_vm0, %v658_v45, %v660_v59  ;;  %v679_v0 = vsel %vm634_vm0, %v676_v46, %v678_v60  ;;  %v645_v17 = vrot.slane %v5392_v2, 1  ;;  %v662_v18 = vrot.slane %v5395_v3, 1  ;;  %v4664_v19 = vld [vmem:[%s7403_s3 + $0x98] sm:$0xff]  ;;  %v4663_v28 = vld [vmem:[%s7403_s3 + $0x90] sm:$0xff]  ;;  %968 = vmatpush.msrb.mxu1 %v591_v24  ;;  %v4662_v32 = vld [vmem:[%s7403_s3 + $0x88] sm:$0xff] }
  0x1d   : > { %v697_v4 = vsel %vm634_vm0, %v694_v48, %v696_v61  ;;  %v663_v20 = vrot.slane %v5399_v5, 1  ;;  %v680_v22 = vrot.slane %v5402_v6, 1  ;;  %v681_v23 = vrot.slane %v5405_v10, 1  ;;  %1761 = vmatpush.msrb.mxu0 %v4664_v19  ;;  %v4628_v27 = vld [vmem:[%s7403_s3 + $0x78] sm:$0xff]  ;;  %v4627_v31 = vld [vmem:[%s7403_s3 + $0x70] sm:$0xff]  ;;  %v590_v33 = vld [vmem:[%s7403_s3] sm:$0xff] }
  0x1e   : > { %4526 = vmatmul.msk.f32.gmra.mxu0 %vm712_vm1, %v639_v35  ;;  %v698_v29 = vrot.slane %v505_v11, 1  ;;  %v699_v30 = vrot.slane %v506_v13, 1  ;;  %1467 = vmatpush.msrb.mxu3 %v4628_v27  ;;  %v4626_v34 = vld [vmem:[%s7403_s3 + $0x68] sm:$0xff]  ;;  %v646_v35 = vsel %vm634_vm0, %v644_v16, %v645_v17  ;;  %v5454_v44 = vld [vmem:[%s5282_s23 + $0xd8] sm:$0xff]  ;;  %v4661_v45 = vld [vmem:[%s7403_s3 + $0x80] sm:$0xff] }
  0x1f   : > { %4534 = vmatmul.msk.f32.gmra.mxu1 %vm712_vm1, %v657_v37  ;;  %1762 = vmatpush.msrb.mxu0 %v4663_v28  ;;  %v664_v36 = vsel %vm634_vm0, %v662_v18, %v663_v20  ;;  %v682_v37 = vsel %vm634_vm0, %v680_v22, %v681_v23  ;;  %v5451_v43 = vld [vmem:[%s5282_s23 + $0x88] sm:$0xff]  ;;  %v4736_v48 = vld [vmem:[%s7403_s3 + $0xd8] sm:$0xff]  ;;  %v5480_v59 = vld [vmem:[%s5282_s23 + $0x40] sm:$0xff] }
  0x20   : > { %4542 = vmatmul.msk.f32.gmra.mxu2 %vm712_vm1, %v675_v38  ;;  %4550 = vmatmul.msk.f32.gmra.mxu3 %vm712_vm1, %v693_v40  ;;  %v5447_v38 = vld [vmem:[%s5282_s23 + $0x38] sm:$0xff]  ;;  %v700_v40 = vsel %vm634_vm0, %v698_v29, %v699_v30  ;;  %v5461_v46 = vld [vmem:[%s5282_s23 + $0x128] sm:$0xff]  ;;  %v5484_v61 = vld [vmem:[%s5282_s23 + $0x90] sm:$0xff] }
  0x21   : > { %1468 = vmatpush.msrb.mxu3 %v4627_v31  ;;  %969 = vmatpush.msrb.mxu1 %v590_v33  ;;  %v647_v47 = vrot.slane %v5447_v38, 1  ;;  %v5504_v19 = vld [vmem:[%s5282_s23 + $0x48] sm:$0x3]  ;;  %v5508_v22 = vld [vmem:[%s5282_s23 + $0x98] sm:$0x3] }
  0x22   : > { %1763 = vmatpush.msrb.mxu0 %v4662_v32  ;;  %2293 = vmatpush.msra.mxu2 %v4736_v48  ;;  %v5515_v24 = vld [vmem:[%s5282_s23 + $0x138] sm:$0x3]  ;;  %v651_v27 = vrot.slane %v5504_v19, 1  ;;  %v669_v28 = vrot.slane %v5508_v22, 1 }
  0x23   : > { %1469 = vmatpush.msrb.mxu3 %v4626_v34  ;;  %v648_v56 = vsel %vm634_vm0, %v645_v17, %v647_v47  ;;  %v5534_v34 = vld [vmem:[%s5528_s28] sm:$0xff]  ;;  %v4700_v48 = vld [vmem:[%s7403_s3 + $0xb8] sm:$0xff] }
  0x24   : > { %1764 = vmatpush.msrb.mxu0 %v4661_v45  ;;  %v1068_v45 = vrot.slane %v5288_v7, 2  ;;  %2047 = vmatpush.msra.mxu1 %v4700_v48 }
  0x26   : > { %4527 = vmatmul.msk.f32.gmra.mxu0 %vm712_vm1, %v641_v49  ;;  %v4625_v49 = vld [vmem:[%s7403_s3 + $0x60] sm:$0xff] }
  0x27   : > { %4535 = vmatmul.msk.f32.gmra.mxu1 %vm712_vm1, %v659_v50  ;;  %v665_v50 = vrot.slane %v5451_v43, 1  ;;  %1470 = vmatpush.msrb.mxu3 %v4625_v49 }
  0x28   : > { %4543 = vmatmul.msk.f32.gmra.mxu2 %vm712_vm1, %v677_v51  ;;  %4551 = vmatmul.msk.f32.gmra.mxu3 %vm712_vm1, %v695_v53  ;;  %v683_v51 = vrot.slane %v5454_v44, 1  ;;  %v701_v53 = vrot.slane %v5461_v46, 1 }
  0x29   : > { %v666_v57 = vsel %vm634_vm0, %v663_v20, %v665_v50 }
  0x2a   : > { %v684_v58 = vsel %vm634_vm0, %v681_v23, %v683_v51  ;;  %v702_v60 = vsel %vm634_vm0, %v699_v30, %v701_v53  ;;  %v5511_v23 = vld [vmem:[%s5282_s23 + $0xe8] sm:$0x3]  ;;  %v705_v30 = vrot.slane %v5515_v24, 1 }
  0x2b   : > { %v687_v29 = vrot.slane %v5511_v23, 1 }
  0x2e   : > { %4528 = vmatmul.msk.f32.gmra.mxu0 %vm712_vm1, %v643_v62  ;;  %v5487_v62 = vld [vmem:[%s5282_s23 + $0xe0] sm:$0xff] }
  0x2f   : > { %4536 = vmatmul.msk.f32.gmra.mxu1 %vm712_vm1, %v661_v63  ;;  %v5491_v63 = vld [vmem:[%s5282_s23 + $0x130] sm:$0xff]  ;;  %v685_v11 = vrot.slane %v5487_v62, 1 }
  0x30   : > { %4544 = vmatmul.msk.f32.gmra.mxu2 %vm712_vm1, %v679_v0  ;;  %4552 = vmatmul.msk.f32.gmra.mxu3 %vm712_vm1, %v697_v4  ;;  %v649_v0 = vrot.slane %v5480_v59, 1  ;;  %v667_v4 = vrot.slane %v5484_v61, 1  ;;  %v703_v13 = vrot.slane %v5491_v63, 1 }
  0x31   : > { %v686_v18 = vsel %vm634_vm0, %v683_v51, %v685_v11  ;;  %v688_v33 = vsel %vm634_vm0, %v685_v11, %v687_v29  ;;  %v512_v51 = vld [vmem:[%s5528_s28 + $0x10] sm:$0xff]  ;;  %v1078_v29 = vrot.slane %v5392_v2, 2 }
  0x32   : > { %v650_v16 = vsel %vm634_vm0, %v647_v47, %v649_v0  ;;  %v668_v17 = vsel %vm634_vm0, %v665_v50, %v667_v4  ;;  %v704_v20 = vsel %vm634_vm0, %v701_v53, %v703_v13  ;;  %v652_v31 = vsel %vm634_vm0, %v649_v0, %v651_v27  ;;  %v516_v27 = vld [vmem:[%s5528_s28 + $0x30] sm:$0xff] }
  0x33   : > { %v670_v32 = vsel %vm634_vm0, %v667_v4, %v669_v28  ;;  %v1069_v47 = vrot.slane %v5291_v8, 2  ;;  %v1611_v53 = vrot.slane %v512_v51, 1  ;;  %v1073_v0 = vrot.slane %v5341_v39, 2 }
  0x34   : > { %v1618_v28 = vrot.slane %v516_v27, 1 }
  0x35   : > { %v1070_v50 = vsel %vm1067_vm2, %v1068_v45, %v1069_v47  ;;  %v518_v45 = vld [vmem:[%s5528_s28 + $0x40] sm:$0xff] }
  0x36   : > { %4529 = vmatmul.msk.f32.gmra.mxu0 %vm712_vm1, %v646_v35  ;;  %v5537_v35 = vld [vmem:[%s5528_s28 + $0x8] sm:$0xff] }
  0x37   : > { %4537 = vmatmul.msk.f32.gmra.mxu1 %vm712_vm1, %v664_v36  ;;  %v706_v36 = vsel %vm634_vm0, %v703_v13, %v705_v30  ;;  %v514_v13 = vld [vmem:[%s5528_s28 + $0x20] sm:$0x3] }
  0x38   : > { %4545 = vmatmul.msk.f32.gmra.mxu2 %vm712_vm1, %v682_v37  ;;  %4553 = vmatmul.msk.f32.gmra.mxu3 %vm712_vm1, %v700_v40  ;;  %v1608_v37 = vrot.slane %v5534_v34, 1  ;;  %v1609_v40 = vrot.slane %v5537_v35, 1 }
  0x3a   : > { %v1610_v49 = vsel %vm634_vm0, %v1608_v37, %v1609_v40 }
  0x3e   : > { %4530 = vmatmul.msk.f32.gmra.mxu0 %vm712_vm1, %v648_v56  ;;  %v1071_v56 = vrot.slane %v5314_v21, 2 }
  0x3f   : > { %4538 = vmatmul.msk.f32.gmra.mxu1 %vm712_vm1, %v666_v57  ;;  %v1612_v57 = vsel %vm634_vm0, %v1609_v40, %v1611_v53 }
  0x40   : > { %4546 = vmatmul.msk.f32.gmra.mxu2 %vm712_vm1, %v684_v58  ;;  %4554 = vmatmul.msk.f32.gmra.mxu3 %vm712_vm1, %v702_v60  ;;  %v1072_v58 = vsel %vm1067_vm2, %v1069_v47, %v1071_v56  ;;  %v513_v60 = vld [vmem:[%s5528_s28 + $0x18] sm:$0xff]  ;;  %v1074_v11 = vsel %vm1067_vm2, %v1071_v56, %v1073_v0  ;;  %v1082_v47 = vrot.slane %v5480_v59, 2 }
  0x46   : > { %4531 = vmatmul.msk.f32.gmra.mxu0 %vm712_vm1, %v650_v16  ;;  %v1075_v16 = vrot.slane %v5365_v52, 2  ;;  %v1077_v52 = vrot.slane %v5389_v1, 2 }
  0x47   : > { %4539 = vmatmul.msk.f32.gmra.mxu1 %vm712_vm1, %v668_v17 }
  0x48   : > { %4547 = vmatmul.msk.f32.gmra.mxu2 %vm712_vm1, %v686_v18  ;;  %4555 = vmatmul.msk.f32.gmra.mxu3 %vm712_vm1, %v704_v20  ;;  %v1076_v18 = vsel %vm1067_vm2, %v1073_v0, %v1075_v16  ;;  %v515_v20 = vld [vmem:[%s5528_s28 + $0x28] sm:$0xff]  ;;  %v4699_v0 = vld [vmem:[%s7403_s3 + $0xb0] sm:$0xff] }
  0x49   : > { %2048 = vmatpush.msra.mxu1 %v4699_v0 }
  0x4e   : > { %4532 = vmatmul.msk.f32.gmra.mxu0 %vm712_vm1, %v652_v31  ;;  %v1079_v31 = vsel %vm1067_vm2, %v1077_v52, %v1078_v29  ;;  %v523_v52 = vld [vmem:[%s5528_s28 + $0x68] sm:$0xff] }
  0x4f   : > { %4540 = vmatmul.msk.f32.gmra.mxu1 %vm712_vm1, %v670_v32  ;;  %v517_v32 = vld [vmem:[%s5528_s28 + $0x38] sm:$0xff] }
  0x50   : > { %4548 = vmatmul.msk.f32.gmra.mxu2 %vm712_vm1, %v688_v33  ;;  %4556 = vmatmul.msk.f32.gmra.mxu3 %vm712_vm1, %v706_v36  ;;  %v4735_v33 = vld [vmem:[%s7403_s3 + $0xd0] sm:$0xff]  ;;  %v1080_v36 = vrot.slane %v5447_v38, 2 }
  0x51   : > { %2294 = vmatpush.msra.mxu2 %v4735_v33 }
  0x52   : > { %v1081_v40 = vsel %vm1067_vm2, %v1078_v29, %v1080_v36  ;;  %v1631_v29 = vrot.slane %v523_v52, 1 }
  0x56   : > { %4665 = vmatmul.msk.f32.vlgmr.msrb.gmra.mxu0 %vm712_vm1, %v1610_v49  ;;  %v1083_v49 = vsel %vm1067_vm2, %v1080_v36, %v1082_v47 }
  0x57   : > { %4557 = vmatmul.msk.f32.vlgmr.msrb.gmra.mxu1 %vm712_vm1, %v5288_v7  ;;  %v1613_v7 = vrot.slane %v513_v60, 1 }
  0x58   : > { %4593 = vmatmul.msk.f32.vlgmr.msrb.gmra.mxu2 %vm712_vm1, %v1070_v50  ;;  %4629 = vmatmul.msk.f32.vlgmr.msrb.gmra.mxu3 %vm712_vm1, %v5534_v34  ;;  %v519_v50 = vld [vmem:[%s5528_s28 + $0x48] sm:$0x3] }
  0x59   : > { %v1614_v4 = vsel %vm634_vm0, %v1611_v53, %v1613_v7 }
  0x5e   : > { %4666 = vmatmul.msk.f32.gmra.mxu0 %vm712_vm1, %v1612_v57  ;;  %v520_v57 = vld [vmem:[%s5528_s28 + $0x50] sm:$0xff] }
  0x5f   : > { %4558 = vmatmul.msk.f32.gmra.mxu1 %vm712_vm1, %v5291_v8  ;;  %v1615_v8 = vrot.slane %v514_v13, 1 }
  0x60   : > { %4594 = vmatmul.msk.f32.gmra.mxu2 %vm712_vm1, %v1072_v58  ;;  %4630 = vmatmul.msk.f32.gmra.mxu3 %vm712_vm1, %v5537_v35  ;;  %v521_v58 = vld [vmem:[%s5528_s28 + $0x58] sm:$0xff] }
  0x61   : > { %v1616_v17 = vsel %vm634_vm0, %v1613_v7, %v1615_v8  ;;  %v1087_v7 = vrot.slane %v5299_v12, 2  ;;  %v522_v8 = vld [vmem:[%s5528_s28 + $0x60] sm:$0xff] }
  0x62   : > { %v1629_v16 = vrot.slane %v522_v8, 1 }
  0x64   : > { %v1632_v33 = vsel %vm634_vm0, %v1629_v16, %v1631_v29 }
  0x66   : > { %4667 = vmatmul.msk.f32.gmra.mxu0 %vm712_vm1, %v1614_v4 }
  0x67   : > { %4559 = vmatmul.msk.f32.gmra.mxu1 %vm712_vm1, %v5314_v21  ;;  %v1617_v21 = vrot.slane %v515_v20, 1 }
  0x68   : > { %4595 = vmatmul.msk.f32.gmra.mxu2 %vm712_vm1, %v1074_v11  ;;  %4631 = vmatmul.msk.f32.gmra.mxu3 %vm712_vm1, %v512_v51  ;;  %v1084_v51 = vrot.slane %v5504_v19, 2  ;;  %v1086_v19 = vrot.slane %v5294_v9, 2 }
  0x69   : > { %v1619_v30 = vsel %vm634_vm0, %v1617_v21, %v1618_v28 }
  0x6a   : > { %v1085_v56 = vsel %vm1067_vm2, %v1082_v47, %v1084_v51  ;;  %v1088_v13 = vsel %vm1067_vm2, %v1086_v19, %v1087_v7  ;;  %v4772_v47 = vld [vmem:[%s7403_s3 + $0xf8] sm:$0xff] }
  0x6b   : > { %2587 = vmatpush.msra.mxu3 %v4772_v47  ;;  %v525_v51 = vld [vmem:[%s5528_s28 + $0x78] sm:$0xff] }
  0x6e   : > { %4668 = vmatmul.msk.f32.gmra.mxu0 %vm712_vm1, %v1616_v17  ;;  %v1089_v17 = vrot.slane %v5318_v25, 2 }
  0x6f   : > { %4560 = vmatmul.msk.f32.gmra.mxu1 %vm712_vm1, %v5341_v39  ;;  %v1620_v39 = vrot.slane %v517_v32, 1 }
  0x70   : > { %4596 = vmatmul.msk.f32.gmra.mxu2 %vm712_vm1, %v1076_v18  ;;  %4632 = vmatmul.msk.f32.gmra.mxu3 %vm712_vm1, %v513_v60  ;;  %v1627_v60 = vrot.slane %v521_v58, 1 }
  0x71   : > { %v1621_v37 = vsel %vm634_vm0, %v1618_v28, %v1620_v39 }
  0x72   : > { %v1630_v21 = vsel %vm634_vm0, %v1627_v60, %v1629_v16  ;;  %v4734_v16 = vld [vmem:[%s7403_s3 + $0xc8] sm:$0xff] }
  0x73   : > { %2295 = vmatpush.msra.mxu2 %v4734_v16  ;;  %v1104_v16 = vrot.slane %v5303_v14, 2 }
  0x76   : > { %4669 = vmatmul.msk.f32.gmra.mxu0 %vm712_vm1, %v1619_v30  ;;  %v1091_v30 = vrot.slane %v5345_v41, 2 }
  0x77   : > { %4561 = vmatmul.msk.f32.gmra.mxu1 %vm712_vm1, %v5389_v1  ;;  %v1622_v1 = vrot.slane %v518_v45, 1 }
  0x78   : > { %4597 = vmatmul.msk.f32.gmra.mxu2 %vm712_vm1, %v1079_v31  ;;  %4633 = vmatmul.msk.f32.gmra.mxu3 %vm712_vm1, %v515_v20 }
  0x79   : > { %v1623_v48 = vsel %vm634_vm0, %v1620_v39, %v1622_v1 }
  0x7e   : > { %4670 = vmatmul.msk.f32.gmra.mxu0 %vm712_vm1, %v1621_v37  ;;  %v1092_v37 = vsel %vm1067_vm2, %v1089_v17, %v1091_v30 }
  0x7f   : > { %4562 = vmatmul.msk.f32.gmra.mxu1 %vm712_vm1, %v5392_v2  ;;  %v1624_v2 = vrot.slane %v519_v50, 1 }
  0x80   : > { %4598 = vmatmul.msk.f32.gmra.mxu2 %vm712_vm1, %v1081_v40  ;;  %4634 = vmatmul.msk.f32.gmra.mxu3 %vm712_vm1, %v516_v27 }
  0x81   : > { %v1625_v53 = vsel %vm634_vm0, %v1622_v1, %v1624_v2 }
  0x86   : > { %4671 = vmatmul.msk.f32.gmra.mxu0 %vm712_vm1, %v1623_v48 }
  0x87   : > { %4563 = vmatmul.msk.f32.gmra.mxu1 %vm712_vm1, %v5447_v38  ;;  %v1626_v38 = vrot.slane %v520_v57, 1 }
  0x88   : > { %4599 = vmatmul.msk.f32.gmra.mxu2 %vm712_vm1, %v1083_v49  ;;  %4635 = vmatmul.msk.f32.gmra.mxu3 %vm712_vm1, %v517_v32 }
  0x89   : > { %v1628_v11 = vsel %vm634_vm0, %v1626_v38, %v1627_v60  ;;  %v4808_v60 = vld [vmem:[%s7403_s3 + $0x118] sm:$0xff] }
  0x8a   : > { %2873 = vmatpush.msra.mxu0 %v4808_v60 }
  0x8e   : > { %4672 = vmatmul.msk.f32.gmra.mxu0 %vm712_vm1, %v1625_v53  ;;  %v526_v53 = vld [vmem:[%s5528_s28 + $0x80] sm:$0xff] }
  0x8f   : > { %4564 = vmatmul.msk.f32.gmra.mxu1 %vm712_vm1, %v5480_v59 }
  0x90   : > { %4600 = vmatmul.msk.f32.gmra.mxu2 %vm712_vm1, %v1085_v56  ;;  %4636 = vmatmul.msk.f32.gmra.mxu3 %vm712_vm1, %v518_v45  ;;  %v1093_v45 = vrot.slane %v5369_v54, 2  ;;  %v1635_v54 = vrot.slane %v525_v51, 1  ;;  %v1636_v56 = vrot.slane %v526_v53, 1 }
  0x92   : > { %v1094_v2 = vsel %vm1067_vm2, %v1091_v30, %v1093_v45 }
  0x93   : > { %v5635_v4 = vpop.f32.mrf.mxu0 }
  0x94   : > { %v5638_v59 = vpop.f32.mrf.mxu1 }
  0x96   : > { %4673 = vmatmul.msk.f32.gmra.mxu0 %vm712_vm1, %v1628_v11 }
  0x97   : > { %4565 = vmatmul.msk.f32.gmra.mxu1 %vm712_vm1, %v5294_v9  ;;  %v1090_v9 = vsel %vm1067_vm2, %v1087_v7, %v1089_v17  ;;  %v1098_v17 = vrot.slane %v5451_v43, 2 }
  0x98   : > { %4601 = vmatmul.msk.f32.gmra.mxu2 %vm712_vm1, %v1088_v13  ;;  %4637 = vmatmul.msk.f32.gmra.mxu3 %vm712_vm1, %v520_v57  ;;  %v1095_v57 = vrot.slane %v5395_v3, 2  ;;  %v527_v13 = vld [vmem:[%s5528_s28 + $0x88] sm:$0xff] }
  0x9b   : > { %v5648_v18 = vpop.f32.mrf.mxu2  ;;  %v5650_v20 = vpop.f32.mrf.mxu0 }
  0x9c   : > { %v5652_v27 = vpop.f32.mrf.mxu3  ;;  %v5655_v28 = vpop.f32.mrf.mxu1 }
  0x9e   : > { %4674 = vmatmul.msk.f32.gmra.mxu0 %vm712_vm1, %v1630_v21 }
  0x9f   : > { %4566 = vmatmul.msk.f32.gmra.mxu1 %vm712_vm1, %v5299_v12  ;;  %v524_v12 = vld [vmem:[%s5528_s28 + $0x70] sm:$0x3] }
  0xa0   : > { %4602 = vmatmul.msk.f32.gmra.mxu2 %vm712_vm1, %v1090_v9  ;;  %4638 = vmatmul.msk.f32.gmra.mxu3 %vm712_vm1, %v521_v58  ;;  %v1633_v40 = vrot.slane %v524_v12, 1  ;;  %v1096_v58 = vrot.slane %v5399_v5, 2  ;;  %v1100_v12 = vrot.slane %v5484_v61, 2 }
  0xa2   : > { %v1634_v50 = vsel %vm634_vm0, %v1631_v29, %v1633_v40  ;;  %v1097_v11 = vsel %vm1067_vm2, %v1095_v57, %v1096_v58  ;;  %v1099_v30 = vsel %vm1067_vm2, %v1096_v58, %v1098_v17 }
  0xa3   : > { %v5665_v31 = vpop.f32.mrf.mxu2  ;;  %v5667_v32 = vpop.f32.mrf.mxu0 }
  0xa4   : > { %v5669_v39 = vpop.f32.mrf.mxu3  ;;  %v5672_v36 = vpop.f32.mrf.mxu1 }
  0xa6   : > { %4675 = vmatmul.msk.f32.gmra.mxu0 %vm712_vm1, %v1632_v33  ;;  %v528_v33 = vld [vmem:[%s5528_s28 + $0x90] sm:$0xff] }
  0xa7   : > { %4567 = vmatmul.msk.f32.gmra.mxu1 %vm712_vm1, %v5318_v25 }
  0xa8   : > { %4603 = vmatmul.msk.f32.gmra.mxu2 %vm712_vm1, %v1092_v37  ;;  %4639 = vmatmul.msk.f32.gmra.mxu3 %vm712_vm1, %v522_v8  ;;  %v1638_v8 = vrot.slane %v527_v13, 1  ;;  %v1640_v37 = vrot.slane %v528_v33, 1 }
  0xab   : > { %v5682_v1 = vpop.f32.mrf.mxu2  ;;  %v5687_v48 = vpop.f32.mrf.mxu0 }
  0xac   : > { %v5689_v49 = vpop.f32.mrf.mxu3  ;;  %v5692_v25 = vpop.f32.mrf.mxu1 }
  0xae   : > { %4676 = vmatmul.msk.f32.gmra.mxu0 %vm712_vm1, %v1634_v50  ;;  %v1641_v50 = vsel %vm634_vm0, %v1638_v8, %v1640_v37 }
  0xaf   : > { %4568 = vmatmul.msk.f32.gmra.mxu1 %vm712_vm1, %v5345_v41  ;;  %v1637_v41 = vsel %vm634_vm0, %v1635_v54, %v1636_v56  ;;  %v1102_v54 = vrot.slane %v5508_v22, 2 }
  0xb0   : > { %4604 = vmatmul.msk.f32.gmra.mxu2 %vm712_vm1, %v1094_v2  ;;  %4640 = vmatmul.msk.f32.gmra.mxu3 %vm712_vm1, %v523_v52 }
  0xb3   : > { %v5704_v38 = vpop.f32.mrf.mxu2  ;;  %v5709_v19 = vpop.f32.mrf.mxu0 }
  0xb4   : > { %v5711_v7 = vpop.f32.mrf.mxu3  ;;  %v5714_v0 = vpop.f32.mrf.mxu1 }
  0xb6   : > { %4677 = vmatmul.msk.f32.gmra.mxu0 %vm712_vm1, %v1637_v41 }
  0xb7   : > { %4569 = vmatmul.msk.f32.gmra.mxu1 %vm712_vm1, %v5395_v3  ;;  %v1639_v3 = vsel %vm634_vm0, %v1636_v56, %v1638_v8  ;;  %v531_v8 = vld [vmem:[%s5528_s28 + $0xa8] sm:$0xff] }
  0xb8   : > { %4605 = vmatmul.msk.f32.gmra.mxu2 %vm712_vm1, %v1097_v11  ;;  %4641 = vmatmul.msk.f32.gmra.mxu3 %vm712_vm1, %v525_v51  ;;  %v529_v51 = vld [vmem:[%s5528_s28 + $0x98] sm:$0x3]  ;;  %v1103_v11 = vsel %vm1067_vm2, %v1100_v12, %v1102_v54  ;;  %v1107_v54 = vrot.slane %v5321_v26, 2 }
  0xbb   : > { %v5727_v21 = vpop.f32.mrf.mxu2  ;;  %v5729_v9 = vpop.f32.mrf.mxu0 }
  0xbc   : > { %v5731_v52 = vpop.f32.mrf.mxu3  ;;  %v5734_v29 = vpop.f32.mrf.mxu1 }
  0xbe   : > { %4678 = vmatmul.msk.f32.gmra.mxu0 %vm712_vm1, %v1639_v3 }
  0xbf   : > { %4570 = vmatmul.msk.f32.gmra.mxu1 %vm712_vm1, %v5399_v5  ;;  %v1101_v5 = vsel %vm1067_vm2, %v1098_v17, %v1100_v12  ;;  %v1105_v17 = vrot.slane %v5306_v15, 2 }
  0xc0   : > { %4606 = vmatmul.msk.f32.gmra.mxu2 %vm712_vm1, %v1099_v30  ;;  %4642 = vmatmul.msk.f32.gmra.mxu3 %vm712_vm1, %v526_v53  ;;  %v1642_v53 = vrot.slane %v529_v51, 1  ;;  %v532_v51 = vld [vmem:[%s5528_s28 + $0xb0] sm:$0xff] }
  0xc2   : > { %v1643_v60 = vsel %vm634_vm0, %v1640_v37, %v1642_v53  ;;  %v1647_v53 = vrot.slane %v532_v51, 1 }
  0xc3   : > { %v5744_v40 = vpop.f32.mrf.mxu2  ;;  %v5746_v45 = vpop.f32.mrf.mxu0 }
  0xc4   : > { %v5748_v47 = vpop.f32.mrf.mxu3  ;;  %v5751_v2 = vpop.f32.mrf.mxu1 }
  0xc6   : > { %4679 = vmatmul.msk.f32.gmra.mxu0 %vm712_vm1, %v1641_v50 }
  0xc7   : > { %4571 = vmatmul.msk.f32.gmra.mxu1 %vm712_vm1, %v5451_v43  ;;  %v530_v43 = vld [vmem:[%s5528_s28 + $0xa0] sm:$0xff] }
  0xc8   : > { %4607 = vmatmul.msk.f32.gmra.mxu2 %vm712_vm1, %v1101_v5  ;;  %4643 = vmatmul.msk.f32.gmra.mxu3 %vm712_vm1, %v527_v13  ;;  %v1644_v22 = vrot.slane %v530_v43, 1  ;;  %v1645_v13 = vrot.slane %v531_v8, 1  ;;  %v1106_v5 = vsel %vm1067_vm2, %v1104_v16, %v1105_v17 }
  0xca   : > { %v1646_v12 = vsel %vm634_vm0, %v1644_v22, %v1645_v13 }
  0xcb   : > { %v5761_v56 = vpop.f32.mrf.mxu2  ;;  %v5763_v57 = vpop.f32.mrf.mxu0 }
  0xcc   : > { %v5765_v58 = vpop.f32.mrf.mxu3  ;;  %v5768_v41 = vpop.f32.mrf.mxu1 }
  0xce   : > { %4680 = vmatmul.msk.f32.gmra.mxu0 %vm712_vm1, %v1643_v60 }
  0xcf   : > { %4572 = vmatmul.msk.f32.gmra.mxu1 %vm712_vm1, %v5484_v61  ;;  %v4698_v61 = vld [vmem:[%s7403_s3 + $0xa8] sm:$0xff] }
  0xd0   : > { %4608 = vmatmul.msk.f32.gmra.mxu2 %vm712_vm1, %v1103_v11  ;;  %4644 = vmatmul.msk.f32.gmra.mxu3 %vm712_vm1, %v528_v33 }
  0xd1   : > { %2049 = vmatpush.msra.mxu1 %v4698_v61  ;;  %v1648_v61 = vsel %vm634_vm0, %v1645_v13, %v1647_v53  ;;  %v1109_v13 = vrot.slane %v5348_v42, 2 }
  0xd3   : > { %v5780_v3 = vpop.f32.mrf.mxu2  ;;  %v1766_v37 = vpop.f32.mrf.mxu0 }
  0xd4   : > { %v5782_v30 = vpop.f32.mrf.mxu3  ;;  %v971_v50 = vpop.f32.mrf.mxu1 }
  0xd5   : > { %7413 = vst [vmem:[#allocation2_spill] sm:$0xff] %v5782_v30  ;;  %v972_v33 = vadd.f32 %v971_v50, %v5635_v4  ;;  %v533_v4 = vld [vmem:[%s5528_s28 + $0xb8] sm:$0xff] }
  0xd6   : > { %4681 = vmatmul.msk.f32.gmra.mxu0 %vm712_vm1, %v1646_v12  ;;  %v1108_v12 = vsel %vm1067_vm2, %v1105_v17, %v1107_v54 }
  0xd7   : > { %4573 = vmatmul.msk.f32.gmra.mxu1 %vm712_vm1, %v5303_v14 }
  0xd8   : > { %4609 = vmatmul.msk.f32.gmra.mxu2 %vm712_vm1, %v1106_v5  ;;  %4645 = vmatmul.msk.f32.gmra.mxu3 %vm712_vm1, %v530_v43  ;;  %v1649_v43 = vrot.slane %v533_v4, 1 }
  0xdb   : > { %v1226_v60 = vpop.f32.mrf.mxu2  ;;  %v1769_v16 = vpop.f32.mrf.mxu0 }
  0xdc   : > { %v1322_v11 = vadd.f32 %v1226_v60, %v972_v33  ;;  %v1472_v22 = vpop.f32.mrf.mxu3  ;;  %v974_v30 = vpop.f32.mrf.mxu1 }
  0xdd   : > { %v975_v14 = vadd.f32 %v974_v30, %v5650_v20  ;;  %v1110_v20 = vsel %vm1067_vm2, %v1107_v54, %v1109_v13  ;;  %v534_v30 = vld [vmem:[%s5528_s28 + $0xc0] sm:$0x3] }
  0xde   : > { %v1568_v50 = vadd.f32 %v1472_v22, %v1322_v11  ;;  %4682 = vmatmul.msk.f32.gmra.mxu0 %vm712_vm1, %v1648_v61  ;;  %v1650_v22 = vsel %vm634_vm0, %v1647_v53, %v1649_v43  ;;  %v1111_v53 = vrot.slane %v5372_v55, 2 }
  0xdf   : > { %4574 = vmatmul.msk.f32.gmra.mxu1 %vm712_vm1, %v5306_v15 }
  0xe0   : > { %4610 = vmatmul.msk.f32.gmra.mxu2 %vm712_vm1, %v1108_v12  ;;  %v5805_v5 = vadd.f32 %v1766_v37, %v1568_v50  ;;  %4646 = vmatmul.msk.f32.gmra.mxu3 %vm712_vm1, %v531_v8  ;;  %v1651_v8 = vrot.slane %v534_v30, 1  ;;  %v1114_v30 = vrot.slane %v5405_v10, 2 }
  0xe3   : > { %v1229_v17 = vpop.f32.mrf.mxu2  ;;  %v1772_v11 = vpop.f32.mrf.mxu0 }
  0xe4   : > { %v1323_v33 = vadd.f32 %v1229_v17, %v975_v14  ;;  %v1475_v60 = vpop.f32.mrf.mxu3  ;;  %v977_v61 = vpop.f32.mrf.mxu1 }
  0xe5   : > { %v978_v37 = vadd.f32 %v977_v61, %v5667_v32  ;;  %v4771_v32 = vld [vmem:[%s7403_s3 + $0xf0] sm:$0xff] }
  0xe6   : > { %v1569_v15 = vadd.f32 %v1475_v60, %v1323_v33  ;;  %4683 = vmatmul.msk.f32.gmra.mxu0 %vm712_vm1, %v1650_v22  ;;  %v1652_v33 = vsel %vm634_vm0, %v1649_v43, %v1651_v8  ;;  %v1112_v60 = vsel %vm1067_vm2, %v1109_v13, %v1111_v53  ;;  %v535_v22 = vld [vmem:[%s5528_s28 + $0xc8] sm:$0xff]  ;;  %2588 = vmatpush.msra.mxu3 %v4771_v32  ;;  %v1113_v13 = vrot.slane %v5402_v6, 2  ;;  %v4733_v32 = vld [vmem:[%s7403_s3 + $0xc0] sm:$0xff] }
  0xe7   : > { %4575 = vmatmul.msk.f32.gmra.mxu1 %vm712_vm1, %v5321_v26  ;;  %2296 = vmatpush.msra.mxu2 %v4733_v32  ;;  %v539_v32 = vld [vmem:[%s5528_s28 + $0xe8] sm:$0x3] }
  0xe8   : > { %4611 = vmatmul.msk.f32.gmra.mxu2 %vm712_vm1, %v1110_v20  ;;  %v5817_v12 = vadd.f32 %v1769_v16, %v1569_v15  ;;  %4647 = vmatmul.msk.f32.gmra.mxu3 %vm712_vm1, %v532_v51  ;;  %v536_v16 = vld [vmem:[%s5528_s28 + $0xd0] sm:$0xff]  ;;  %v1653_v51 = vrot.slane %v535_v22, 1 }
  0xe9   : > { %v1654_v43 = vrot.slane %v536_v16, 1 }
  0xeb   : > { %v1232_v54 = vpop.f32.mrf.mxu2  ;;  %v1775_v17 = vpop.f32.mrf.mxu0  ;;  %v1655_v53 = vsel %vm634_vm0, %v1653_v51, %v1654_v43 }
  0xec   : > { %v1324_v50 = vadd.f32 %v1232_v54, %v978_v37  ;;  %v1478_v14 = vpop.f32.mrf.mxu3  ;;  %v980_v26 = vpop.f32.mrf.mxu1 }
  0xed   : > { %v981_v55 = vadd.f32 %v980_v26, %v5687_v48 }
  0xee   : > { %v1570_v61 = vadd.f32 %v1478_v14, %v1324_v50  ;;  %4684 = vmatmul.msk.f32.gmra.mxu0 %vm712_vm1, %v1652_v33  ;;  %v537_v50 = vld [vmem:[%s5528_s28 + $0xd8] sm:$0xff] }
  0xef   : > { %4576 = vmatmul.msk.f32.gmra.mxu1 %vm712_vm1, %v5348_v42  ;;  %v4807_v42 = vld [vmem:[%s7403_s3 + $0x110] sm:$0xff]  ;;  %v1656_v33 = vrot.slane %v537_v50, 1 }
  0xf0   : > { %4612 = vmatmul.msk.f32.gmra.mxu2 %vm712_vm1, %v1112_v60  ;;  %v5833_v20 = vadd.f32 %v1772_v11, %v1570_v61  ;;  %4648 = vmatmul.msk.f32.gmra.mxu3 %vm712_vm1, %v533_v4  ;;  %v1115_v11 = vsel %vm1067_vm2, %v1113_v13, %v1114_v30  ;;  %v1116_v60 = vrot.slane %v5454_v44, 2 }
  0xf1   : > { %2874 = vmatpush.msra.mxu0 %v4807_v42 }
  0xf3   : > { %v1235_v15 = vpop.f32.mrf.mxu2  ;;  %v1778_v48 = vpop.f32.mrf.mxu0 }
  0xf4   : > { %v1325_v37 = vadd.f32 %v1235_v15, %v981_v55  ;;  %v1481_v8 = vpop.f32.mrf.mxu3  ;;  %v983_v54 = vpop.f32.mrf.mxu1  ;;  %v1117_v15 = vsel %vm1067_vm2, %v1114_v30, %v1116_v60 }
  0xf5   : > { %v984_v14 = vadd.f32 %v983_v54, %v5709_v19 }
  0xf6   : > { %v1571_v4 = vadd.f32 %v1481_v8, %v1325_v37  ;;  %4685 = vmatmul.msk.f32.gmra.mxu0 %vm712_vm1, %v1655_v53  ;;  %v538_v37 = vld [vmem:[%s5528_s28 + $0xe0] sm:$0xff] }
  0xf7   : > { %4577 = vmatmul.msk.f32.gmra.mxu1 %vm712_vm1, %v5402_v6  ;;  %v1657_v6 = vsel %vm634_vm0, %v1654_v43, %v1656_v33  ;;  %v1118_v43 = vrot.slane %v5487_v62, 2 }
  0xf8   : > { %4613 = vmatmul.msk.f32.gmra.mxu2 %vm712_vm1, %v1115_v11  ;;  %v5852_v26 = vadd.f32 %v1775_v17, %v1571_v4  ;;  %4649 = vmatmul.msk.f32.gmra.mxu3 %vm712_vm1, %v535_v22  ;;  %v1658_v22 = vrot.slane %v538_v37, 1 }
  0xfa   : > { %v1659_v4 = vsel %vm634_vm0, %v1656_v33, %v1658_v22  ;;  %v1120_v33 = vrot.slane %v5511_v23, 2 }
  0xfb   : > { %v1238_v61 = vpop.f32.mrf.mxu2  ;;  %v1781_v51 = vpop.f32.mrf.mxu0 }
  0xfc   : > { %v1326_v19 = vadd.f32 %v1238_v61, %v984_v14  ;;  %v1484_v55 = vpop.f32.mrf.mxu3  ;;  %v986_v13 = vpop.f32.mrf.mxu1 }
  0xfd   : > { %v987_v17 = vadd.f32 %v986_v13, %v5729_v9  ;;  %v1119_v9 = vsel %vm1067_vm2, %v1116_v60, %v1118_v43 }
  0xfe   : > { %v1572_v8 = vadd.f32 %v1484_v55, %v1326_v19  ;;  %4686 = vmatmul.msk.f32.gmra.mxu0 %vm712_vm1, %v1657_v6 }
  0xff   : > { %4578 = vmatmul.msk.f32.gmra.mxu1 %vm712_vm1, %v5405_v10 }
 0x100   : > { %4614 = vmatmul.msk.f32.gmra.mxu2 %vm712_vm1, %v1117_v15  ;;  %v5864_v53 = vadd.f32 %v1778_v48, %v1572_v8  ;;  %4650 = vmatmul.msk.f32.gmra.mxu3 %vm712_vm1, %v536_v16  ;;  %v1660_v16 = vrot.slane %v539_v32, 1  ;;  %v540_v15 = vld [vmem:[%s5528_s28 + $0xf0] sm:$0xff]  ;;  %v541_v8 = vld [vmem:[%s5528_s28 + $0xf8] sm:$0xff]  ;;  %v4697_v32 = vld [vmem:[%s7403_s3 + $0xa0] sm:$0xff] }
 0x101   : > { %v1662_v23 = vrot.slane %v540_v15, 1  ;;  %2050 = vmatpush.msra.mxu1 %v4697_v32 }
 0x102   : > { %v1661_v13 = vsel %vm634_vm0, %v1658_v22, %v1660_v16 }
 0x103   : > { %v1241_v30 = vpop.f32.mrf.mxu2  ;;  %v1784_v11 = vpop.f32.mrf.mxu0 }
 0x104   : > { %v1327_v42 = vadd.f32 %v1241_v30, %v987_v17  ;;  %v1487_v54 = vpop.f32.mrf.mxu3  ;;  %v989_v14 = vpop.f32.mrf.mxu1 }
 0x105   : > { %v990_v48 = vadd.f32 %v989_v14, %v5746_v45 }
 0x106   : > { %v1573_v10 = vadd.f32 %v1487_v54, %v1327_v42  ;;  %4687 = vmatmul.msk.f32.gmra.mxu0 %vm712_vm1, %v1659_v4  ;;  %v5125_v42 = vld [vmem:[%s5282_s23 + $0xf8] sm:$0xff] }
 0x107   : > { %4579 = vmatmul.msk.f32.gmra.mxu1 %vm712_vm1, %v5454_v44  ;;  %v1121_v44 = vsel %vm1067_vm2, %v1118_v43, %v1120_v33  ;;  %v5124_v43 = vld [vmem:[%s5282_s23 + $0xf0] sm:$0xff]  ;;  %v1123_v54 = vrot.slane %v5125_v42, 2 }
 0x108   : > { %4615 = vmatmul.msk.f32.gmra.mxu2 %vm712_vm1, %v1119_v9  ;;  %v5876_v61 = vadd.f32 %v1781_v51, %v1573_v10  ;;  %4651 = vmatmul.msk.f32.gmra.mxu3 %vm712_vm1, %v537_v50  ;;  %v1663_v51 = vrot.slane %v541_v8, 1  ;;  %v1122_v30 = vrot.slane %v5124_v43, 2 }
 0x10b   : > { %v1244_v60 = vpop.f32.mrf.mxu2  ;;  %v1787_v6 = vpop.f32.mrf.mxu0 }
 0x10c   : > { %v1328_v19 = vadd.f32 %v1244_v60, %v990_v48  ;;  %v1490_v55 = vpop.f32.mrf.mxu3  ;;  %v992_v45 = vpop.f32.mrf.mxu1  ;;  %v542_v48 = vld [vmem:[%s5528_s28 + $0x100] sm:$0xff] }
 0x10d   : > { %v993_v50 = vadd.f32 %v992_v45, %v5763_v57  ;;  %v1665_v16 = vrot.slane %v542_v48, 1  ;;  %v5126_v60 = vld [vmem:[%s5282_s23 + $0x100] sm:$0xff] }
 0x10e   : > { %v1574_v17 = vadd.f32 %v1490_v55, %v1328_v19  ;;  %4688 = vmatmul.msk.f32.gmra.mxu0 %vm712_vm1, %v1661_v13  ;;  %v1125_v19 = vrot.slane %v5126_v60, 2 }
 0x10f   : > { %4580 = vmatmul.msk.f32.gmra.mxu1 %vm712_vm1, %v5487_v62  ;;  %v1664_v62 = vsel %vm634_vm0, %v1662_v23, %v1663_v51 }
 0x110   : > { %4616 = vmatmul.msk.f32.gmra.mxu2 %vm712_vm1, %v1121_v44  ;;  %v5889_v22 = vadd.f32 %v1784_v11, %v1574_v17  ;;  %4652 = vmatmul.msk.f32.gmra.mxu3 %vm712_vm1, %v538_v37  ;;  %v1124_v11 = vsel %vm1067_vm2, %v1122_v30, %v1123_v54  ;;  %v543_v30 = vld [vmem:[%s5528_s28 + $0x108] sm:$0xff] }
 0x113   : > { %v1247_v4 = vpop.f32.mrf.mxu2  ;;  %v1790_v9 = vpop.f32.mrf.mxu0 }
 0x114   : > { %v1329_v14 = vadd.f32 %v1247_v4, %v993_v50  ;;  %v1493_v57 = vpop.f32.mrf.mxu3  ;;  %v995_v10 = vpop.f32.mrf.mxu1  ;;  %v1666_v50 = vsel %vm634_vm0, %v1663_v51, %v1665_v16 }
 0x115   : > { %v996_v55 = vadd.f32 %v995_v10, %v5638_v59  ;;  %v1667_v59 = vrot.slane %v543_v30, 1 }
 0x116   : > { %v1575_v37 = vadd.f32 %v1493_v57, %v1329_v14  ;;  %4689 = vmatmul.msk.f32.gmra.mxu0 %vm712_vm1, %v1664_v62 }
 0x117   : > { %4581 = vmatmul.msk.f32.gmra.mxu1 %vm712_vm1, %v5124_v43  ;;  %v1126_v43 = vsel %vm1067_vm2, %v1123_v54, %v1125_v19  ;;  %v1668_v10 = vsel %vm634_vm0, %v1665_v16, %v1667_v59 }
 0x118   : > { %4617 = vmatmul.msk.f32.gmra.mxu2 %vm712_vm1, %v1124_v11  ;;  %v5903_v33 = vadd.f32 %v1787_v6, %v1575_v37  ;;  %4653 = vmatmul.msk.f32.gmra.mxu3 %vm712_vm1, %v540_v15  ;;  %v5127_v15 = vld [vmem:[%s5282_s23 + $0x108] sm:$0xff]  ;;  %v544_v37 = vld [vmem:[%s5528_s28 + $0x110] sm:$0x3] }
 0x119   : > { %v1127_v14 = vrot.slane %v5127_v15, 2 }
 0x11b   : > { %v1250_v13 = vpop.f32.mrf.mxu2  ;;  %v1793_v17 = vpop.f32.mrf.mxu0 }
 0x11c   : > { %v1330_v45 = vadd.f32 %v1250_v13, %v996_v55  ;;  %v1496_v44 = vpop.f32.mrf.mxu3  ;;  %v998_v23 = vpop.f32.mrf.mxu1 }
 0x11d   : > { %v999_v51 = vadd.f32 %v998_v23, %v5655_v28  ;;  %v1669_v28 = vrot.slane %v544_v37, 1  ;;  %v4770_v23 = vld [vmem:[%s7403_s3 + $0xe8] sm:$0xff] }
 0x11e   : > { %v1576_v4 = vadd.f32 %v1496_v44, %v1330_v45  ;;  %4690 = vmatmul.msk.f32.gmra.mxu0 %vm712_vm1, %v1666_v50  ;;  %2589 = vmatpush.msra.mxu3 %v4770_v23  ;;  %v4769_v23 = vld [vmem:[%s7403_s3 + $0xe0] sm:$0xff] }
 0x11f   : > { %4582 = vmatmul.msk.f32.gmra.mxu1 %vm712_vm1, %v5125_v42  ;;  %v1128_v42 = vsel %vm1067_vm2, %v1125_v19, %v1127_v14 }
 0x120   : > { %4618 = vmatmul.msk.f32.gmra.mxu2 %vm712_vm1, %v1126_v43  ;;  %v5914_v6 = vadd.f32 %v1790_v9, %v1576_v4  ;;  %4654 = vmatmul.msk.f32.gmra.mxu3 %vm712_vm1, %v541_v8  ;;  %v5128_v9 = vld [vmem:[%s5282_s23 + $0x110] sm:$0x3]  ;;  %v546_v4 = vld [vmem:[%s5528_s28 + $0x120] sm:$0xff] }
 0x121   : > { %v1129_v16 = vrot.slane %v5128_v9, 2  ;;  %2590 = vmatpush.msra.mxu3 %v4769_v23 }
 0x123   : > { %v1253_v54 = vpop.f32.mrf.mxu2  ;;  %v1796_v32 = vpop.f32.mrf.mxu0  ;;  %v1130_v43 = vsel %vm1067_vm2, %v1127_v14, %v1129_v16  ;;  %v5130_v14 = vld [vmem:[%s5282_s23 + $0x120] sm:$0xff] }
 0x124   : > { %v1331_v57 = vadd.f32 %v1253_v54, %v999_v51  ;;  %v1499_v62 = vpop.f32.mrf.mxu3  ;;  %v1001_v11 = vpop.f32.mrf.mxu1 }
 0x125   : > { %v1002_v13 = vadd.f32 %v1001_v11, %v5672_v36  ;;  %v1894_v11 = vrot.slane %v5534_v34, 2 }
 0x126   : > { %v1577_v55 = vadd.f32 %v1499_v62, %v1331_v57  ;;  %4691 = vmatmul.msk.f32.gmra.mxu0 %vm712_vm1, %v1668_v10  ;;  %v5129_v57 = vld [vmem:[%s5282_s23 + $0x118] sm:$0xff]  ;;  %v1132_v10 = vrot.slane %v5130_v14, 2 }
 0x127   : > { %4583 = vmatmul.msk.f32.gmra.mxu1 %vm712_vm1, %v5126_v60  ;;  %v1670_v60 = vsel %vm634_vm0, %v1667_v59, %v1669_v28  ;;  %v1672_v59 = vrot.slane %v546_v4, 1  ;;  %v1131_v62 = vrot.slane %v5129_v57, 2 }
 0x128   : > { %4619 = vmatmul.msk.f32.gmra.mxu2 %vm712_vm1, %v1128_v42  ;;  %v5925_v8 = vadd.f32 %v1793_v17, %v1577_v55  ;;  %4655 = vmatmul.msk.f32.gmra.mxu3 %vm712_vm1, %v542_v48  ;;  %v545_v48 = vld [vmem:[%s5528_s28 + $0x118] sm:$0xff]  ;;  %v1895_v42 = vrot.slane %v5537_v35, 2 }
 0x129   : > { %v1671_v36 = vrot.slane %v545_v48, 1 }
 0x12b   : > { %v1256_v19 = vpop.f32.mrf.mxu2  ;;  %v1799_v50 = vpop.f32.mrf.mxu0 }
 0x12c   : > { %v1332_v45 = vadd.f32 %v1256_v19, %v1002_v13  ;;  %v1502_v44 = vpop.f32.mrf.mxu3  ;;  %v1004_v17 = vpop.f32.mrf.mxu1  ;;  %v1133_v13 = vsel %vm1067_vm2, %v1131_v62, %v1132_v10  ;;  %v547_v19 = vld [vmem:[%s5528_s28 + $0x128] sm:$0xff] }
 0x12d   : > { %v1005_v37 = vadd.f32 %v1004_v17, %v5692_v25  ;;  %v4805_v25 = vld [vmem:[%s7403_s3 + $0x100] sm:$0xff] }
 0x12e   : > { %v1578_v51 = vadd.f32 %v1502_v44, %v1332_v45  ;;  %4692 = vmatmul.msk.f32.gmra.mxu0 %vm712_vm1, %v1670_v60  ;;  %v5960_v45 = vsel %vm1067_vm2, %v1894_v11, %v1895_v42  ;;  %v1674_v44 = vrot.slane %v547_v19, 1  ;;  %v3254_v60 = vld [vmem:[%s7407_s7 + $0x78] sm:$0xff] }
 0x12f   : > { %4584 = vmatmul.msk.f32.gmra.mxu1 %vm712_vm1, %v5127_v15  ;;  %3259 = vmatpush.msrb.mxu2 %v3254_v60 }
 0x130   : > { %4620 = vmatmul.msk.f32.gmra.mxu2 %vm712_vm1, %v1130_v43  ;;  %v5940_v54 = vadd.f32 %v1796_v32, %v1578_v51  ;;  %4656 = vmatmul.msk.f32.gmra.mxu3 %vm712_vm1, %v543_v30  ;;  %v1673_v32 = vsel %vm634_vm0, %v1671_v36, %v1672_v59  ;;  %v4806_v30 = vld [vmem:[%s7403_s3 + $0x108] sm:$0xff]  ;;  %v1134_v43 = vrot.slane %v5461_v46, 2 }
 0x131   : > { %2875 = vmatpush.msra.mxu0 %v4806_v30 }
 0x133   : > { %v1259_v15 = vpop.f32.mrf.mxu2  ;;  %v1802_v9 = vpop.f32.mrf.mxu0  ;;  %2876 = vmatpush.msra.mxu0 %v4805_v25  ;;  %v549_v25 = vld [vmem:[%s5528_s28 + $0x138] sm:$0x3] }
 0x134   : > { %v1333_v55 = vadd.f32 %v1259_v15, %v1005_v37  ;;  %v1505_v28 = vpop.f32.mrf.mxu3  ;;  %v1007_v16 = vpop.f32.mrf.mxu1  ;;  %v1675_v37 = vsel %vm634_vm0, %v1672_v59, %v1674_v44 }
 0x135   : > { %v1008_v51 = vadd.f32 %v1007_v16, %v5714_v0 }
 0x136   : > { %v1579_v34 = vadd.f32 %v1505_v28, %v1333_v55  ;;  %4693 = vmatmul.msk.f32.gmra.mxu0 %vm712_vm1, %v1673_v32  ;;  %v1135_v55 = vsel %vm1067_vm2, %v1132_v10, %v1134_v43 }
 0x137   : > { %4585 = vmatmul.msk.f32.gmra.mxu1 %vm712_vm1, %v5129_v57 }
 0x138   : > { %4621 = vmatmul.msk.f32.gmra.mxu2 %vm712_vm1, %v1133_v13  ;;  %v5971_v17 = vadd.f32 %v1799_v50, %v1579_v34  ;;  %4657 = vmatmul.msk.f32.gmra.mxu3 %vm712_vm1, %v545_v48  ;;  %v548_v50 = vld [vmem:[%s5528_s28 + $0x130] sm:$0xff]  ;;  %v1136_v48 = vrot.slane %v5491_v63, 2  ;;  %v1678_v63 = vrot.slane %v549_v25, 1  ;;  %v3089_v25 = vld [vmem:[%s7405_s5 + $0x78] sm:$0xff] }
 0x139   : > { %v1676_v46 = vrot.slane %v548_v50, 1  ;;  %3094 = vmatpush.msrb.mxu1 %v3089_v25 }
 0x13a   : > { %v1137_v34 = vsel %vm1067_vm2, %v1134_v43, %v1136_v48 }
 0x13b   : > { %v1262_v36 = vpop.f32.mrf.mxu2  ;;  %v1805_v11 = vpop.f32.mrf.mxu0  ;;  %v1677_v13 = vsel %vm634_vm0, %v1674_v44, %v1676_v46  ;;  %v1138_v44 = vrot.slane %v5515_v24, 2  ;;  %v550_v24 = vld [vmem:[%s6006_s25] sm:$0xff] }
 0x13c   : > { %v1334_v57 = vadd.f32 %v1262_v36, %v1008_v51  ;;  %v1508_v62 = vpop.f32.mrf.mxu3  ;;  %v1010_v15 = vpop.f32.mrf.mxu1 }
 0x13d   : > { %v1011_v59 = vadd.f32 %v1010_v15, %v5734_v29  ;;  %v3253_v29 = vld [vmem:[%s7407_s7 + $0x70] sm:$0xff] }
 0x13e   : > { %v1580_v28 = vadd.f32 %v1508_v62, %v1334_v57  ;;  %4694 = vmatmul.msk.f32.gmra.mxu0 %vm712_vm1, %v1675_v37  ;;  %3260 = vmatpush.msrb.mxu2 %v3253_v29  ;;  %v1679_v62 = vsel %vm634_vm0, %v1676_v46, %v1678_v63  ;;  %v551_v37 = vld [vmem:[%s6006_s25 + $0x8] sm:$0xff] }
 0x13f   : > { %4586 = vmatmul.msk.f32.gmra.mxu1 %vm712_vm1, %v5130_v14  ;;  %v3252_v63 = vld [vmem:[%s7407_s7 + $0x68] sm:$0xff] }
 0x140   : > { %4622 = vmatmul.msk.f32.gmra.mxu2 %vm712_vm1, %v1135_v55  ;;  %v5982_v0 = vadd.f32 %v1802_v9, %v1580_v28  ;;  %4658 = vmatmul.msk.f32.gmra.mxu3 %vm712_vm1, %v546_v4  ;;  %v5131_v9 = vld [vmem:[%s5282_s23 + $0x128] sm:$0xff]  ;;  %v2720_v55 = vrot.slane %v550_v24, 2  ;;  %v2721_v28 = vrot.slane %v551_v37, 2 }
 0x141   : > { %3261 = vmatpush.msrb.mxu2 %v3252_v63 }
 0x143   : > { %v1265_v10 = vpop.f32.mrf.mxu2  ;;  %v1808_v16 = vpop.f32.mrf.mxu0 }
 0x144   : > { %v1335_v32 = vadd.f32 %v1265_v10, %v1011_v59  ;;  %v1511_v30 = vpop.f32.mrf.mxu3  ;;  %v1013_v14 = vpop.f32.mrf.mxu1  ;;  %v2435_v10 = vrot.slane %v551_v37, 1 }
 0x145   : > { %v1014_v23 = vadd.f32 %v1013_v14, %v5751_v2  ;;  %v5132_v2 = vld [vmem:[%s5282_s23 + $0x130] sm:$0xff] }
 0x146   : > { %v1581_v60 = vadd.f32 %v1511_v30, %v1335_v32  ;;  %4695 = vmatmul.msk.f32.gmra.mxu0 %vm712_vm1, %v1677_v13 }
 0x147   : > { %4587 = vmatmul.msk.f32.gmra.mxu1 %vm712_vm1, %v5131_v9 }
 0x148   : > { %4623 = vmatmul.msk.f32.gmra.mxu2 %vm712_vm1, %v1137_v34  ;;  %v5997_v4 = vadd.f32 %v1805_v11, %v1581_v60  ;;  %4659 = vmatmul.msk.f32.gmra.mxu3 %vm712_vm1, %v547_v19  ;;  %v1139_v11 = vsel %vm1067_vm2, %v1136_v48, %v1138_v44  ;;  %v2434_v48 = vrot.slane %v550_v24, 1  ;;  %v2722_v34 = vsel %vm1067_vm2, %v2720_v55, %v2721_v28  ;;  %v5133_v44 = vld [vmem:[%s5528_s28 + $0x10] sm:$0xff] }
 0x14b   : > { %v1268_v43 = vpop.f32.mrf.mxu2  ;;  %v1811_v57 = vpop.f32.mrf.mxu0 }
 0x14c   : > { %v1336_v51 = vadd.f32 %v1268_v43, %v1014_v23  ;;  %v1514_v36 = vpop.f32.mrf.mxu3  ;;  %v1016_v19 = vpop.f32.mrf.mxu1  ;;  %v1897_v23 = vrot.slane %v5133_v44, 2  ;;  %v5135_v44 = vld [vmem:[%s5528_s28 + $0x20] sm:$0x3] }
 0x14d   : > { %v1017_v46 = vadd.f32 %v1016_v19, %v5768_v41 }
 0x14e   : > { %v1582_v15 = vadd.f32 %v1514_v36, %v1336_v51  ;;  %4696 = vmatmul.msk.f32.gmra.mxu0 %vm712_vm1, %v1679_v62 }
 0x14f   : > { %4588 = vmatmul.msk.f32.gmra.mxu1 %vm712_vm1, %v5132_v2 }
 0x150   : > { %4624 = vmatmul.msk.f32.gmra.mxu2 %vm712_vm1, %v1139_v11  ;;  %v6016_v59 = vadd.f32 %v1808_v16, %v1582_v15  ;;  %4660 = vmatmul.msk.f32.gmra.mxu3 %vm712_vm1, %v548_v50  ;;  %v552_v16 = vld [vmem:[%s6006_s25 + $0x10] sm:$0xff]  ;;  %v2436_v50 = vsel %vm634_vm0, %v2434_v48, %v2435_v10  ;;  %v553_v15 = vld [vmem:[%s6006_s25 + $0x18] sm:$0xff] }
 0x151   : > { %v2723_v41 = vrot.slane %v552_v16, 2  ;;  %v2437_v51 = vrot.slane %v552_v16, 1  ;;  %v2439_v48 = vrot.slane %v553_v15, 1 }
 0x153   : > { %v1271_v32 = vpop.f32.mrf.mxu2  ;;  %v1814_v14 = vpop.f32.mrf.mxu0  ;;  %v2724_v11 = vsel %vm1067_vm2, %v2721_v28, %v2723_v41  ;;  %v2438_v55 = vsel %vm634_vm0, %v2435_v10, %v2437_v51  ;;  %v5134_v28 = vld [vmem:[%s5528_s28 + $0x18] sm:$0xff] }
 0x154   : > { %v1337_v30 = vadd.f32 %v1271_v32, %v1017_v46  ;;  %v1517_v13 = vpop.f32.mrf.mxu3  ;;  %v1019_v60 = vpop.f32.mrf.mxu1  ;;  %v1899_v35 = vrot.slane %v5134_v28, 2 }
 0x155   : > { %v1020_v43 = vadd.f32 %v1019_v60, %v5648_v18  ;;  %v2725_v18 = vrot.slane %v553_v15, 2  ;;  %v554_v60 = vld [vmem:[%s6006_s25 + $0x20] sm:$0x3] }
 0x156   : > { %v1583_v9 = vadd.f32 %v1517_v13, %v1337_v30  ;;  %4809 = vmatmul.msk.f32.vlgmr.msra.gmra.mxu0 %vm712_vm1, %v2722_v34  ;;  %v1900_v25 = vsel %vm1067_vm2, %v1897_v23, %v1899_v35 }
 0x157   : > { %4701 = vmatmul.msk.f32.vlgmr.msra.gmra.mxu1 %vm712_vm1, %v5960_v45  ;;  %v2726_v34 = vsel %vm1067_vm2, %v2723_v41, %v2725_v18  ;;  %v3251_v41 = vld [vmem:[%s7407_s7 + $0x60] sm:$0xff] }
 0x158   : > { %4737 = vmatmul.msk.f32.vlgmr.msra.gmra.mxu2 %vm712_vm1, %v550_v24  ;;  %v6033_v29 = vadd.f32 %v1811_v57, %v1583_v9  ;;  %4773 = vmatmul.msk.f32.vlgmr.msra.gmra.mxu3 %vm712_vm1, %v2436_v50  ;;  %v1898_v57 = vsel %vm1067_vm2, %v1895_v42, %v1897_v23  ;;  %v2727_v50 = vrot.slane %v554_v60, 2  ;;  %v1901_v23 = vrot.slane %v5135_v44, 2 }
 0x159   : > { %3262 = vmatpush.msrb.mxu2 %v3251_v41  ;;  %v557_v41 = vld [vmem:[%s6006_s25 + $0x38] sm:$0xff] }
 0x15b   : > { %v1274_v36 = vpop.f32.mrf.mxu2  ;;  %v1817_v19 = vpop.f32.mrf.mxu0 }
 0x15c   : > { %v1338_v45 = vadd.f32 %v1274_v36, %v1020_v43  ;;  %v1520_v62 = vpop.f32.mrf.mxu3  ;;  %v1022_v24 = vpop.f32.mrf.mxu1 }
 0x15d   : > { %v1023_v42 = vadd.f32 %v1022_v24, %v5665_v31  ;;  %v2440_v31 = vsel %vm634_vm0, %v2437_v51, %v2439_v48  ;;  %v2441_v51 = vrot.slane %v554_v60, 1 }
 0x15e   : > { %v1584_v2 = vadd.f32 %v1520_v62, %v1338_v45  ;;  %4810 = vmatmul.msk.f32.gmra.mxu0 %vm712_vm1, %v2724_v11  ;;  %v2728_v11 = vsel %vm1067_vm2, %v2725_v18, %v2727_v50  ;;  %v5136_v18 = vld [vmem:[%s5528_s28 + $0x28] sm:$0xff] }
 0x15f   : > { %4702 = vmatmul.msk.f32.gmra.mxu1 %vm712_vm1, %v1898_v57  ;;  %v555_v57 = vld [vmem:[%s6006_s25 + $0x28] sm:$0xff]  ;;  %v2442_v28 = vsel %vm634_vm0, %v2439_v48, %v2441_v51 }
 0x160   : > { %4738 = vmatmul.msk.f32.gmra.mxu2 %vm712_vm1, %v551_v37  ;;  %v6047_v46 = vadd.f32 %v1814_v14, %v1584_v2  ;;  %4774 = vmatmul.msk.f32.gmra.mxu3 %vm712_vm1, %v2438_v55  ;;  %v3088_v37 = vld [vmem:[%s7405_s5 + $0x70] sm:$0xff]  ;;  %v2443_v48 = vrot.slane %v555_v57, 1 }
 0x161   : > { %3095 = vmatpush.msrb.mxu1 %v3088_v37  ;;  %v556_v2 = vld [vmem:[%s6006_s25 + $0x30] sm:$0xff] }
 0x162   : > { %v2444_v37 = vrot.slane %v556_v2, 1 }
 0x163   : > { %v1277_v32 = vpop.f32.mrf.mxu2  ;;  %v1820_v13 = vpop.f32.mrf.mxu0 }
 0x164   : > { %v1339_v30 = vadd.f32 %v1277_v32, %v1023_v42  ;;  %v1523_v10 = vpop.f32.mrf.mxu3  ;;  %v1025_v14 = vpop.f32.mrf.mxu1  ;;  %v2730_v42 = vrot.slane %v556_v2, 2 }
 0x165   : > { %v1026_v43 = vadd.f32 %v1025_v14, %v5682_v1  ;;  %v2729_v1 = vrot.slane %v555_v57, 2 }
 0x166   : > { %v1585_v9 = vadd.f32 %v1523_v10, %v1339_v30  ;;  %4811 = vmatmul.msk.f32.gmra.mxu0 %vm712_vm1, %v2726_v34  ;;  %v5137_v30 = vld [vmem:[%s5528_s28 + $0x30] sm:$0xff] }
 0x167   : > { %4703 = vmatmul.msk.f32.gmra.mxu1 %vm712_vm1, %v1900_v25  ;;  %v1904_v10 = vrot.slane %v5137_v30, 2 }
 0x168   : > { %4739 = vmatmul.msk.f32.gmra.mxu2 %vm712_vm1, %v552_v16  ;;  %v6065_v63 = vadd.f32 %v1817_v19, %v1585_v9  ;;  %4775 = vmatmul.msk.f32.gmra.mxu3 %vm712_vm1, %v2440_v31  ;;  %v1902_v19 = vsel %vm1067_vm2, %v1899_v35, %v1901_v23  ;;  %v1903_v35 = vrot.slane %v5136_v18, 2  ;;  %v2732_v23 = vrot.slane %v557_v41, 2 }
 0x16a   : > { %v1905_v50 = vsel %vm1067_vm2, %v1903_v35, %v1904_v10 }
 0x16b   : > { %v1280_v36 = vpop.f32.mrf.mxu2  ;;  %v1823_v62 = vpop.f32.mrf.mxu0 }
 0x16c   : > { %v1340_v45 = vadd.f32 %v1280_v36, %v1026_v43  ;;  %v1526_v16 = vpop.f32.mrf.mxu3  ;;  %v1028_v24 = vpop.f32.mrf.mxu1  ;;  %v3250_v43 = vld [vmem:[%s7407_s7 + $0x58] sm:$0xff] }
 0x16d   : > { %v1029_v34 = vadd.f32 %v1028_v24, %v5704_v38  ;;  %v2445_v38 = vsel %vm634_vm0, %v2443_v48, %v2444_v37  ;;  %v5138_v36 = vld [vmem:[%s5528_s28 + $0x38] sm:$0xff]  ;;  %3263 = vmatpush.msrb.mxu2 %v3250_v43 }
 0x16e   : > { %v1586_v55 = vadd.f32 %v1526_v16, %v1340_v45  ;;  %4812 = vmatmul.msk.f32.gmra.mxu0 %vm712_vm1, %v2728_v11  ;;  %v1906_v45 = vrot.slane %v5138_v36, 2  ;;  %v2446_v11 = vrot.slane %v557_v41, 1  ;;  %v5140_v36 = vld [vmem:[%s5528_s28 + $0x48] sm:$0x3] }
 0x16f   : > { %4704 = vmatmul.msk.f32.gmra.mxu1 %vm712_vm1, %v1902_v19 }
 0x170   : > { %4740 = vmatmul.msk.f32.gmra.mxu2 %vm712_vm1, %v553_v15  ;;  %v6078_v32 = vadd.f32 %v1820_v13, %v1586_v55  ;;  %4776 = vmatmul.msk.f32.gmra.mxu3 %vm712_vm1, %v2442_v28  ;;  %v2731_v15 = vsel %vm1067_vm2, %v2729_v1, %v2730_v42  ;;  %v3087_v13 = vld [vmem:[%s7405_s5 + $0x68] sm:$0xff]  ;;  %v2733_v28 = vsel %vm1067_vm2, %v2730_v42, %v2732_v23  ;;  %v5139_v42 = vld [vmem:[%s5528_s28 + $0x40] sm:$0xff] }
 0x171   : > { %3096 = vmatpush.msrb.mxu1 %v3087_v13  ;;  %v1907_v18 = vsel %vm1067_vm2, %v1904_v10, %v1906_v45  ;;  %v2447_v30 = vsel %vm634_vm0, %v2444_v37, %v2446_v11  ;;  %v1908_v48 = vrot.slane %v5139_v42, 2 }
 0x173   : > { %v1283_v14 = vpop.f32.mrf.mxu2  ;;  %v1826_v9 = vpop.f32.mrf.mxu0 }
 0x174   : > { %v1341_v25 = vadd.f32 %v1283_v14, %v1029_v34  ;;  %v1529_v60 = vpop.f32.mrf.mxu3  ;;  %v1031_v31 = vpop.f32.mrf.mxu1 }
 0x175   : > { %v1032_v16 = vadd.f32 %v1031_v31, %v5727_v21  ;;  %v1909_v31 = vsel %vm1067_vm2, %v1906_v45, %v1908_v48  ;;  %v1910_v45 = vrot.slane %v5140_v36, 2 }
 0x176   : > { %v1587_v44 = vadd.f32 %v1529_v60, %v1341_v25  ;;  %4813 = vmatmul.msk.f32.gmra.mxu0 %vm712_vm1, %v2731_v15 }
 0x177   : > { %4705 = vmatmul.msk.f32.gmra.mxu1 %vm712_vm1, %v1905_v50  ;;  %v559_v50 = vld [vmem:[%s6006_s25 + $0x48] sm:$0x3] }
 0x178   : > { %4741 = vmatmul.msk.f32.gmra.mxu2 %vm712_vm1, %v555_v57  ;;  %v6097_v51 = vadd.f32 %v1823_v62, %v1587_v44  ;;  %4777 = vmatmul.msk.f32.gmra.mxu3 %vm712_vm1, %v2445_v38  ;;  %v558_v62 = vld [vmem:[%s6006_s25 + $0x40] sm:$0xff]  ;;  %v2736_v38 = vrot.slane %v559_v50, 2 }
 0x179   : > { %v2734_v21 = vrot.slane %v558_v62, 2  ;;  %v2448_v14 = vrot.slane %v558_v62, 1 }
 0x17b   : > { %v1286_v24 = vpop.f32.mrf.mxu2  ;;  %v1829_v55 = vpop.f32.mrf.mxu0  ;;  %v2735_v13 = vsel %vm1067_vm2, %v2732_v23, %v2734_v21  ;;  %v3249_v23 = vld [vmem:[%s7407_s7 + $0x50] sm:$0xff] }
 0x17c   : > { %v1342_v19 = vadd.f32 %v1286_v24, %v1032_v16  ;;  %v1532_v57 = vpop.f32.mrf.mxu3  ;;  %v1034_v1 = vpop.f32.mrf.mxu1  ;;  %3264 = vmatpush.msrb.mxu2 %v3249_v23  ;;  %v562_v23 = vld [vmem:[%s6006_s25 + $0x60] sm:$0xff] }
 0x17d   : > { %v1035_v10 = vadd.f32 %v1034_v1, %v5744_v40  ;;  %v2449_v40 = vsel %vm634_vm0, %v2446_v11, %v2448_v14  ;;  %v2450_v11 = vrot.slane %v559_v50, 1 }
 0x17e   : > { %v1588_v35 = vadd.f32 %v1532_v57, %v1342_v19  ;;  %4814 = vmatmul.msk.f32.gmra.mxu0 %vm712_vm1, %v2733_v28  ;;  %v2737_v28 = vsel %vm1067_vm2, %v2734_v21, %v2736_v38  ;;  %v5141_v21 = vld [vmem:[%s5528_s28 + $0x50] sm:$0xff] }
 0x17f   : > { %4706 = vmatmul.msk.f32.gmra.mxu1 %vm712_vm1, %v1907_v18  ;;  %v560_v18 = vld [vmem:[%s6006_s25 + $0x50] sm:$0xff]  ;;  %v2451_v42 = vsel %vm634_vm0, %v2448_v14, %v2450_v11 }
 0x180   : > { %4742 = vmatmul.msk.f32.gmra.mxu2 %vm712_vm1, %v556_v2  ;;  %v6109_v34 = vadd.f32 %v1826_v9, %v1588_v35  ;;  %4778 = vmatmul.msk.f32.gmra.mxu3 %vm712_vm1, %v2447_v30  ;;  %v3086_v2 = vld [vmem:[%s7405_s5 + $0x60] sm:$0xff]  ;;  %v561_v35 = vld [vmem:[%s6006_s25 + $0x58] sm:$0xff]  ;;  %v2452_v14 = vrot.slane %v560_v18, 1 }
 0x181   : > { %3097 = vmatpush.msrb.mxu1 %v3086_v2  ;;  %v2453_v2 = vrot.slane %v561_v35, 1 }
 0x183   : > { %v1289_v25 = vpop.f32.mrf.mxu2  ;;  %v1832_v15 = vpop.f32.mrf.mxu0 }
 0x184   : > { %v1343_v60 = vadd.f32 %v1289_v25, %v1035_v10  ;;  %v1535_v37 = vpop.f32.mrf.mxu3  ;;  %v1037_v9 = vpop.f32.mrf.mxu1  ;;  %v2739_v10 = vrot.slane %v561_v35, 2 }
 0x185   : > { %v1038_v16 = vadd.f32 %v1037_v9, %v5761_v56  ;;  %v2738_v56 = vrot.slane %v560_v18, 2 }
 0x186   : > { %v1589_v44 = vadd.f32 %v1535_v37, %v1343_v60  ;;  %4815 = vmatmul.msk.f32.gmra.mxu0 %vm712_vm1, %v2735_v13  ;;  %v5142_v60 = vld [vmem:[%s5528_s28 + $0x58] sm:$0xff] }
 0x187   : > { %4707 = vmatmul.msk.f32.gmra.mxu1 %vm712_vm1, %v1909_v31  ;;  %v1913_v37 = vrot.slane %v5142_v60, 2 }
 0x188   : > { %4743 = vmatmul.msk.f32.gmra.mxu2 %vm712_vm1, %v557_v41  ;;  %v6127_v43 = vadd.f32 %v1829_v55, %v1589_v44  ;;  %4779 = vmatmul.msk.f32.gmra.mxu3 %vm712_vm1, %v2449_v40  ;;  %v1911_v55 = vsel %vm1067_vm2, %v1908_v48, %v1910_v45  ;;  %v1912_v48 = vrot.slane %v5141_v21, 2  ;;  %v2741_v45 = vrot.slane %v562_v23, 2 }
 0x18a   : > { %v1914_v38 = vsel %vm1067_vm2, %v1912_v48, %v1913_v37 }
 0x18b   : > { %v1292_v24 = vpop.f32.mrf.mxu2  ;;  %v1835_v57 = vpop.f32.mrf.mxu0 }
 0x18c   : > { %v1344_v19 = vadd.f32 %v1292_v24, %v1038_v16  ;;  %v1538_v41 = vpop.f32.mrf.mxu3  ;;  %v1040_v1 = vpop.f32.mrf.mxu1  ;;  %v3248_v16 = vld [vmem:[%s7407_s7 + $0x48] sm:$0xff]  ;;  %v5143_v24 = vld [vmem:[%s5528_s28 + $0x60] sm:$0xff] }
 0x18d   : > { %v1041_v13 = vadd.f32 %v1040_v1, %v5780_v3  ;;  %v2454_v3 = vsel %vm634_vm0, %v2452_v14, %v2453_v2  ;;  %3265 = vmatpush.msrb.mxu2 %v3248_v16 }
 0x18e   : > { %v1590_v30 = vadd.f32 %v1538_v41, %v1344_v19  ;;  %4816 = vmatmul.msk.f32.gmra.mxu0 %vm712_vm1, %v2737_v28  ;;  %v1915_v19 = vrot.slane %v5143_v24, 2  ;;  %v2455_v28 = vrot.slane %v562_v23, 1  ;;  %v5145_v24 = vld [vmem:[%s5528_s28 + $0x70] sm:$0x3] }
 0x18f   : > { %4708 = vmatmul.msk.f32.gmra.mxu1 %vm712_vm1, %v1911_v55 }
 0x190   : > { %4744 = vmatmul.msk.f32.gmra.mxu2 %vm712_vm1, %v558_v62  ;;  %v6140_v25 = vadd.f32 %v1832_v15, %v1590_v30  ;;  %4780 = vmatmul.msk.f32.gmra.mxu3 %vm712_vm1, %v2451_v42  ;;  %v2740_v62 = vsel %vm1067_vm2, %v2738_v56, %v2739_v10  ;;  %v3085_v15 = vld [vmem:[%s7405_s5 + $0x58] sm:$0xff]  ;;  %v2742_v42 = vsel %vm1067_vm2, %v2739_v10, %v2741_v45  ;;  %v5144_v10 = vld [vmem:[%s5528_s28 + $0x68] sm:$0xff] }
 0x191   : > { %3098 = vmatpush.msrb.mxu1 %v3085_v15  ;;  %v1916_v21 = vsel %vm1067_vm2, %v1913_v37, %v1915_v19  ;;  %v2456_v60 = vsel %vm634_vm0, %v2453_v2, %v2455_v28  ;;  %v1917_v14 = vrot.slane %v5144_v10, 2 }
 0x193   : > { %v1295_v9 = vpop.f32.mrf.mxu2  ;;  %v1838_v44 = vpop.f32.mrf.mxu0 }
 0x194   : > { %v1345_v31 = vadd.f32 %v1295_v9, %v1041_v13  ;;  %v1541_v50 = vpop.f32.mrf.mxu3  ;;  %v1043_v40 = vpop.f32.mrf.mxu1 }
 0x195   : > { %v1044_v41 = vadd.f32 %v1043_v40, %v5652_v27  ;;  %v1918_v40 = vsel %vm1067_vm2, %v1915_v19, %v1917_v14  ;;  %v1919_v19 = vrot.slane %v5145_v24, 2 }
 0x196   : > { %v1591_v36 = vadd.f32 %v1541_v50, %v1345_v31  ;;  %4817 = vmatmul.msk.f32.gmra.mxu0 %vm712_vm1, %v2740_v62 }
 0x197   : > { %4709 = vmatmul.msk.f32.gmra.mxu1 %vm712_vm1, %v1914_v38  ;;  %v564_v38 = vld [vmem:[%s6006_s25 + $0x70] sm:$0x3] }
 0x198   : > { %4745 = vmatmul.msk.f32.gmra.mxu2 %vm712_vm1, %v560_v18  ;;  %v6159_v11 = vadd.f32 %v1835_v57, %v1591_v36  ;;  %4781 = vmatmul.msk.f32.gmra.mxu3 %vm712_vm1, %v2454_v3  ;;  %v563_v57 = vld [vmem:[%s6006_s25 + $0x68] sm:$0xff]  ;;  %v2745_v3 = vrot.slane %v564_v38, 2 }
 0x199   : > { %v2743_v27 = vrot.slane %v563_v57, 2  ;;  %v2457_v9 = vrot.slane %v563_v57, 1 }
 0x19b   : > { %v1298_v1 = vpop.f32.mrf.mxu2  ;;  %v1841_v30 = vpop.f32.mrf.mxu0  ;;  %v2744_v15 = vsel %vm1067_vm2, %v2741_v45, %v2743_v27  ;;  %v3247_v45 = vld [vmem:[%s7407_s7 + $0x40] sm:$0xff] }
 0x19c   : > { %v1346_v55 = vadd.f32 %v1298_v1, %v1044_v41  ;;  %v1544_v18 = vpop.f32.mrf.mxu3  ;;  %v1046_v56 = vpop.f32.mrf.mxu1  ;;  %3266 = vmatpush.msrb.mxu2 %v3247_v45  ;;  %v567_v45 = vld [vmem:[%s6006_s25 + $0x88] sm:$0xff] }
 0x19d   : > { %v1047_v37 = vadd.f32 %v1046_v56, %v5669_v39  ;;  %v2458_v39 = vsel %vm634_vm0, %v2455_v28, %v2457_v9  ;;  %v2459_v28 = vrot.slane %v564_v38, 1 }
 0x19e   : > { %v1592_v48 = vadd.f32 %v1544_v18, %v1346_v55  ;;  %4818 = vmatmul.msk.f32.gmra.mxu0 %vm712_vm1, %v2742_v42  ;;  %v2746_v42 = vsel %vm1067_vm2, %v2743_v27, %v2745_v3  ;;  %v5146_v27 = vld [vmem:[%s5528_s28 + $0x78] sm:$0xff] }
 0x19f   : > { %4710 = vmatmul.msk.f32.gmra.mxu1 %vm712_vm1, %v1916_v21  ;;  %v565_v21 = vld [vmem:[%s6006_s25 + $0x78] sm:$0xff]  ;;  %v2460_v10 = vsel %vm634_vm0, %v2457_v9, %v2459_v28 }
 0x1a0   : > { %4746 = vmatmul.msk.f32.gmra.mxu2 %vm712_vm1, %v561_v35  ;;  %v6171_v13 = vadd.f32 %v1838_v44, %v1592_v48  ;;  %4782 = vmatmul.msk.f32.gmra.mxu3 %vm712_vm1, %v2456_v60  ;;  %v3084_v35 = vld [vmem:[%s7405_s5 + $0x50] sm:$0xff]  ;;  %v566_v48 = vld [vmem:[%s6006_s25 + $0x80] sm:$0xff]  ;;  %v2461_v9 = vrot.slane %v565_v21, 1 }
 0x1a1   : > { %3099 = vmatpush.msrb.mxu1 %v3084_v35  ;;  %v2462_v35 = vrot.slane %v566_v48, 1 }
 0x1a3   : > { %v1301_v31 = vpop.f32.mrf.mxu2  ;;  %v1844_v62 = vpop.f32.mrf.mxu0 }
 0x1a4   : > { %v1347_v50 = vadd.f32 %v1301_v31, %v1047_v37  ;;  %v1547_v2 = vpop.f32.mrf.mxu3  ;;  %v1049_v44 = vpop.f32.mrf.mxu1  ;;  %v2748_v37 = vrot.slane %v566_v48, 2 }
 0x1a5   : > { %v1050_v41 = vadd.f32 %v1049_v44, %v5689_v49  ;;  %v2747_v49 = vrot.slane %v565_v21, 2 }
 0x1a6   : > { %v1593_v36 = vadd.f32 %v1547_v2, %v1347_v50  ;;  %4819 = vmatmul.msk.f32.gmra.mxu0 %vm712_vm1, %v2744_v15  ;;  %v5147_v50 = vld [vmem:[%s5528_s28 + $0x80] sm:$0xff] }
 0x1a7   : > { %4711 = vmatmul.msk.f32.gmra.mxu1 %vm712_vm1, %v1918_v40  ;;  %v1922_v2 = vrot.slane %v5147_v50, 2 }
 0x1a8   : > { %4747 = vmatmul.msk.f32.gmra.mxu2 %vm712_vm1, %v562_v23  ;;  %v6189_v16 = vadd.f32 %v1841_v30, %v1593_v36  ;;  %4783 = vmatmul.msk.f32.gmra.mxu3 %vm712_vm1, %v2458_v39  ;;  %v1920_v30 = vsel %vm1067_vm2, %v1917_v14, %v1919_v19  ;;  %v1921_v14 = vrot.slane %v5146_v27, 2  ;;  %v2750_v19 = vrot.slane %v567_v45, 2 }
 0x1aa   : > { %v1923_v3 = vsel %vm1067_vm2, %v1921_v14, %v1922_v2 }
 0x1ab   : > { %v1304_v1 = vpop.f32.mrf.mxu2  ;;  %v1847_v18 = vpop.f32.mrf.mxu0 }
 0x1ac   : > { %v1348_v55 = vadd.f32 %v1304_v1, %v1050_v41  ;;  %v1550_v23 = vpop.f32.mrf.mxu3  ;;  %v1052_v56 = vpop.f32.mrf.mxu1  ;;  %v3246_v41 = vld [vmem:[%s7407_s7 + $0x38] sm:$0xff]  ;;  %v5148_v1 = vld [vmem:[%s5528_s28 + $0x88] sm:$0xff] }
 0x1ad   : > { %v1053_v15 = vadd.f32 %v1052_v56, %v5711_v7  ;;  %v2463_v7 = vsel %vm634_vm0, %v2461_v9, %v2462_v35  ;;  %3267 = vmatpush.msrb.mxu2 %v3246_v41 }
 0x1ae   : > { %v1594_v60 = vadd.f32 %v1550_v23, %v1348_v55  ;;  %4820 = vmatmul.msk.f32.gmra.mxu0 %vm712_vm1, %v2746_v42  ;;  %v1924_v55 = vrot.slane %v5148_v1, 2  ;;  %v2464_v42 = vrot.slane %v567_v45, 1  ;;  %v5150_v1 = vld [vmem:[%s5528_s28 + $0x98] sm:$0x3] }
 0x1af   : > { %4712 = vmatmul.msk.f32.gmra.mxu1 %vm712_vm1, %v1920_v30 }
 0x1b0   : > { %4748 = vmatmul.msk.f32.gmra.mxu2 %vm712_vm1, %v563_v57  ;;  %v6202_v31 = vadd.f32 %v1844_v62, %v1594_v60  ;;  %4784 = vmatmul.msk.f32.gmra.mxu3 %vm712_vm1, %v2460_v10  ;;  %v2749_v57 = vsel %vm1067_vm2, %v2747_v49, %v2748_v37  ;;  %v3083_v62 = vld [vmem:[%s7405_s5 + $0x48] sm:$0xff]  ;;  %v2751_v10 = vsel %vm1067_vm2, %v2748_v37, %v2750_v19  ;;  %v5149_v37 = vld [vmem:[%s5528_s28 + $0x90] sm:$0xff] }
 0x1b1   : > { %3100 = vmatpush.msrb.mxu1 %v3083_v62  ;;  %v1925_v27 = vsel %vm1067_vm2, %v1922_v2, %v1924_v55  ;;  %v2465_v50 = vsel %vm634_vm0, %v2462_v35, %v2464_v42  ;;  %v1926_v9 = vrot.slane %v5149_v37, 2 }
 0x1b2   : > { %7414 = vst [vmem:[#allocation3_spill] sm:$0xff] %v6202_v31  ;;  %v589_v31 = vld [vmem:[%s6006_s25 + $0x138] sm:$0x3] }
 0x1b3   : > { %v1307_v44 = vpop.f32.mrf.mxu2  ;;  %v1850_v36 = vpop.f32.mrf.mxu0 }
 0x1b4   : > { %v1349_v40 = vadd.f32 %v1307_v44, %v1053_v15  ;;  %v1553_v38 = vpop.f32.mrf.mxu3  ;;  %v1055_v39 = vpop.f32.mrf.mxu1 }
 0x1b5   : > { %v1056_v23 = vadd.f32 %v1055_v39, %v5731_v52  ;;  %v1927_v39 = vsel %vm1067_vm2, %v1924_v55, %v1926_v9  ;;  %v1928_v55 = vrot.slane %v5150_v1, 2  ;;  %v572_v1 = vld [vmem:[%s6006_s25 + $0xb0] sm:$0xff] }
 0x1b6   : > { %v1595_v24 = vadd.f32 %v1553_v38, %v1349_v40  ;;  %4821 = vmatmul.msk.f32.gmra.mxu0 %vm712_vm1, %v2749_v57 }
 0x1b7   : > { %4713 = vmatmul.msk.f32.gmra.mxu1 %vm712_vm1, %v1923_v3  ;;  %v569_v3 = vld [vmem:[%s6006_s25 + $0x98] sm:$0x3] }
 0x1b8   : > { %4749 = vmatmul.msk.f32.gmra.mxu2 %vm712_vm1, %v565_v21  ;;  %v6221_v28 = vadd.f32 %v1847_v18, %v1595_v24  ;;  %4785 = vmatmul.msk.f32.gmra.mxu3 %vm712_vm1, %v2463_v7  ;;  %v568_v18 = vld [vmem:[%s6006_s25 + $0x90] sm:$0xff]  ;;  %v2754_v7 = vrot.slane %v569_v3, 2 }
 0x1b9   : > { %v2752_v52 = vrot.slane %v568_v18, 2  ;;  %v2466_v44 = vrot.slane %v568_v18, 1 }
 0x1ba   : > { %7415 = vst [vmem:[#allocation4_spill] sm:$0xff] %v6221_v28 }
 0x1bb   : > { %v1310_v56 = vpop.f32.mrf.mxu2  ;;  %v1853_v60 = vpop.f32.mrf.mxu0  ;;  %v2753_v62 = vsel %vm1067_vm2, %v2750_v19, %v2752_v52  ;;  %v3245_v19 = vld [vmem:[%s7407_s7 + $0x30] sm:$0xff] }
 0x1bc   : > { %v1350_v30 = vadd.f32 %v1310_v56, %v1056_v23  ;;  %v1556_v21 = vpop.f32.mrf.mxu3  ;;  %v1058_v49 = vpop.f32.mrf.mxu1  ;;  %3268 = vmatpush.msrb.mxu2 %v3245_v19 }
 0x1bd   : > { %v1059_v2 = vadd.f32 %v1058_v49, %v5748_v47  ;;  %v2467_v47 = vsel %vm634_vm0, %v2464_v42, %v2466_v44  ;;  %v2468_v42 = vrot.slane %v569_v3, 1 }
 0x1be   : > { %v1596_v14 = vadd.f32 %v1556_v21, %v1350_v30  ;;  %4822 = vmatmul.msk.f32.gmra.mxu0 %vm712_vm1, %v2751_v10  ;;  %v2755_v10 = vsel %vm1067_vm2, %v2752_v52, %v2754_v7  ;;  %v5151_v52 = vld [vmem:[%s5528_s28 + $0xa0] sm:$0xff] }
 0x1bf   : > { %4714 = vmatmul.msk.f32.gmra.mxu1 %vm712_vm1, %v1925_v27  ;;  %v570_v27 = vld [vmem:[%s6006_s25 + $0xa0] sm:$0xff]  ;;  %v2469_v37 = vsel %vm634_vm0, %v2466_v44, %v2468_v42  ;;  %v2759_v42 = vrot.slane %v572_v1, 2 }
 0x1c0   : > { %4750 = vmatmul.msk.f32.gmra.mxu2 %vm712_vm1, %v566_v48  ;;  %v6233_v15 = vadd.f32 %v1850_v36, %v1596_v14  ;;  %4786 = vmatmul.msk.f32.gmra.mxu3 %vm712_vm1, %v2465_v50  ;;  %v3082_v48 = vld [vmem:[%s7405_s5 + $0x40] sm:$0xff]  ;;  %v571_v14 = vld [vmem:[%s6006_s25 + $0xa8] sm:$0xff]  ;;  %v2470_v44 = vrot.slane %v570_v27, 1 }
 0x1c1   : > { %3101 = vmatpush.msrb.mxu1 %v3082_v48 }
 0x1c2   : > { %7416 = vst [vmem:[#allocation5_spill] sm:$0xff] %v6233_v15 }
 0x1c3   : > { %v1313_v40 = vpop.f32.mrf.mxu2  ;;  %v1856_v57 = vpop.f32.mrf.mxu0 }
 0x1c4   : > { %v1351_v38 = vadd.f32 %v1313_v40, %v1059_v2  ;;  %v1559_v35 = vpop.f32.mrf.mxu3  ;;  %v1061_v36 = vpop.f32.mrf.mxu1  ;;  %v2757_v2 = vrot.slane %v571_v14, 2 }
 0x1c5   : > { %v1062_v23 = vadd.f32 %v1061_v36, %v5765_v58  ;;  %v2756_v58 = vrot.slane %v570_v27, 2  ;;  %v2471_v36 = vrot.slane %v571_v14, 1 }
 0x1c6   : > { %v1597_v24 = vadd.f32 %v1559_v35, %v1351_v38  ;;  %4823 = vmatmul.msk.f32.gmra.mxu0 %vm712_vm1, %v2753_v62  ;;  %v5152_v38 = vld [vmem:[%s5528_s28 + $0xa8] sm:$0xff]  ;;  %v7419_v62 = vld [vmem:[#allocation2_spill] sm:$0xff] }
 0x1c7   : > { %4715 = vmatmul.msk.f32.gmra.mxu1 %vm712_vm1, %v1927_v39  ;;  %v1931_v35 = vrot.slane %v5152_v38, 2  ;;  %v573_v38 = vld [vmem:[%s6006_s25 + $0xb8] sm:$0xff] }
 0x1c8   : > { %4751 = vmatmul.msk.f32.gmra.mxu2 %vm712_vm1, %v567_v45  ;;  %v6251_v41 = vadd.f32 %v1853_v60, %v1597_v24  ;;  %4787 = vmatmul.msk.f32.gmra.mxu3 %vm712_vm1, %v2467_v47  ;;  %v1929_v60 = vsel %vm1067_vm2, %v1926_v9, %v1928_v55  ;;  %v1930_v9 = vrot.slane %v5151_v52, 2 }
 0x1ca   : > { %7417 = vst [vmem:[#allocation6_spill] sm:$0xff] %v6251_v41  ;;  %v1932_v19 = vsel %vm1067_vm2, %v1930_v9, %v1931_v35 }
 0x1cb   : > { %v1316_v56 = vpop.f32.mrf.mxu2  ;;  %v1859_v21 = vpop.f32.mrf.mxu0 }
 0x1cc   : > { %v1352_v30 = vadd.f32 %v1316_v56, %v1062_v23  ;;  %v1562_v45 = vpop.f32.mrf.mxu3  ;;  %v1064_v49 = vpop.f32.mrf.mxu1  ;;  %v2472_v23 = vsel %vm634_vm0, %v2470_v44, %v2471_v36  ;;  %v3244_v56 = vld [vmem:[%s7407_s7 + $0x28] sm:$0xff] }
 0x1cd   : > { %v1065_v48 = vadd.f32 %v1064_v49, %v7419_v62  ;;  %3269 = vmatpush.msrb.mxu2 %v3244_v56  ;;  %v2761_v62 = vrot.slane %v573_v38, 2 }
 0x1ce   : > { %v1598_v50 = vadd.f32 %v1562_v45, %v1352_v30  ;;  %4824 = vmatmul.msk.f32.gmra.mxu0 %vm712_vm1, %v2755_v10  ;;  %v5153_v45 = vld [vmem:[%s5528_s28 + $0xb0] sm:$0xff] }
 0x1cf   : > { %4716 = vmatmul.msk.f32.gmra.mxu1 %vm712_vm1, %v1929_v60  ;;  %v1933_v10 = vrot.slane %v5153_v45, 2  ;;  %v2473_v60 = vrot.slane %v572_v1, 1 }
 0x1d0   : > { %4752 = vmatmul.msk.f32.gmra.mxu2 %vm712_vm1, %v568_v18  ;;  %v6264_v40 = vadd.f32 %v1856_v57, %v1598_v50  ;;  %4788 = vmatmul.msk.f32.gmra.mxu3 %vm712_vm1, %v2469_v37  ;;  %v2758_v18 = vsel %vm1067_vm2, %v2756_v58, %v2757_v2  ;;  %v3081_v57 = vld [vmem:[%s7405_s5 + $0x38] sm:$0xff]  ;;  %v2760_v58 = vsel %vm1067_vm2, %v2757_v2, %v2759_v42 }
 0x1d1   : > { %3102 = vmatpush.msrb.mxu1 %v3081_v57  ;;  %v1934_v9 = vsel %vm1067_vm2, %v1931_v35, %v1933_v10  ;;  %v5154_v2 = vld [vmem:[%s5528_s28 + $0xb8] sm:$0xff] }
 0x1d2   : > { %7418 = vst [vmem:[#allocation7_spill] sm:$0xff] %v6264_v40  ;;  %v4027_v35 = vld [vmem:[%s7409_s9 + $0x78] sm:$0xff] }
 0x1d3   : > { %v1319_v39 = vpop.f32.mrf.mxu2  ;;  %v6270_v47 = vpop.f32.mrf.mxu0  ;;  %4246 = vmatpush.msrb.mxu0 %v4027_v35  ;;  %v5156_v35 = vld [vmem:[%s5528_s28 + $0xc8] sm:$0xff] }
 0x1d4   : > { %v1353_v3 = vadd.f32 %v1319_v39, %v1065_v48  ;;  %v1565_v24 = vpop.f32.mrf.mxu3  ;;  %v2052_v7 = vpop.f32.mrf.mxu1  ;;  %v1935_v48 = vrot.slane %v5154_v2, 2  ;;  %v2475_v39 = vrot.slane %v573_v38, 1 }
 0x1d5   : > { %v2148_v49 = vadd.f32 %v2052_v7, %v5805_v5  ;;  %v2474_v5 = vsel %vm634_vm0, %v2471_v36, %v2473_v60 }
 0x1d6   : > { %v1599_v55 = vadd.f32 %v1565_v24, %v1353_v3  ;;  %4825 = vmatmul.msk.f32.gmra.mxu0 %vm712_vm1, %v2758_v18  ;;  %v3080_v18 = vld [vmem:[%s7405_s5 + $0x30] sm:$0xff]  ;;  %v1936_v7 = vsel %vm1067_vm2, %v1933_v10, %v1935_v48 }
 0x1d7   : > { %4717 = vmatmul.msk.f32.gmra.mxu1 %vm712_vm1, %v1932_v19  ;;  %v574_v19 = vld [vmem:[%s6006_s25 + $0xc0] sm:$0x3] }
 0x1d8   : > { %4753 = vmatmul.msk.f32.gmra.mxu2 %vm712_vm1, %v570_v27  ;;  %v6285_v30 = vadd.f32 %v1859_v21, %v1599_v55  ;;  %4789 = vmatmul.msk.f32.gmra.mxu3 %vm712_vm1, %v2472_v23  ;;  %v4035_v21 = vld [vmem:[%s7410_s10 + $0x38] sm:$0xff]  ;;  %v2763_v55 = vrot.slane %v574_v19, 2  ;;  %v3243_v23 = vld [vmem:[%s7407_s7 + $0x20] sm:$0xff]  ;;  %v2477_v10 = vrot.slane %v574_v19, 1 }
 0x1d9   : > { %4141 = vmatpush.msrb.mxu3 %v4035_v21  ;;  %3103 = vmatpush.msrb.mxu1 %v3080_v18 }
 0x1da   : > { %7420 = vst [vmem:[#allocation2_spill] sm:$0xff] %v6285_v30  ;;  %3270 = vmatpush.msrb.mxu2 %v3243_v23 }
 0x1db   : > { %v2298_v50 = vpop.f32.mrf.mxu2  ;;  %v6292_v27 = vpop.f32.mrf.mxu0 }
 0x1dc   : > { %v6290_v37 = vadd.f32 %v2298_v50, %v2148_v49  ;;  %v2055_v52 = vpop.f32.mrf.mxu1  ;;  %v2764_v50 = vsel %vm1067_vm2, %v2761_v62, %v2763_v55 }
 0x1dd   : > { %v2149_v44 = vadd.f32 %v2055_v52, %v5817_v12  ;;  %v2476_v12 = vsel %vm634_vm0, %v2473_v60, %v2475_v39  ;;  %v575_v52 = vld [vmem:[%s6006_s25 + $0xc8] sm:$0xff] }
 0x1de   : > { %4826 = vmatmul.msk.f32.gmra.mxu0 %vm712_vm1, %v2760_v58 }
 0x1df   : > { %4718 = vmatmul.msk.f32.gmra.mxu1 %vm712_vm1, %v1934_v9  ;;  %v576_v9 = vld [vmem:[%s6006_s25 + $0xd0] sm:$0xff] }
 0x1e0   : > { %4754 = vmatmul.msk.f32.gmra.mxu2 %vm712_vm1, %v571_v14  ;;  %4790 = vmatmul.msk.f32.gmra.mxu3 %vm712_vm1, %v2474_v5  ;;  %v2762_v14 = vsel %vm1067_vm2, %v2759_v42, %v2761_v62  ;;  %v5155_v42 = vld [vmem:[%s5528_s28 + $0xc0] sm:$0x3]  ;;  %v2478_v5 = vsel %vm634_vm0, %v2475_v39, %v2477_v10  ;;  %v2766_v2 = vrot.slane %v576_v9, 2  ;;  %v1939_v62 = vrot.slane %v5156_v35, 2  ;;  %v5158_v10 = vld [vmem:[%s5528_s28 + $0xd8] sm:$0xff]  ;;  %v4034_v35 = vld [vmem:[%s7410_s10 + $0x30] sm:$0xff] }
 0x1e1   : > { %v1937_v56 = vrot.slane %v5155_v42, 2  ;;  %v2480_v18 = vrot.slane %v576_v9, 1  ;;  %v577_v42 = vld [vmem:[%s6006_s25 + $0xd8] sm:$0xff]  ;;  %4142 = vmatpush.msrb.mxu3 %v4034_v35 }
 0x1e3   : > { %v2301_v36 = vpop.f32.mrf.mxu2  ;;  %v6312_v24 = vpop.f32.mrf.mxu0  ;;  %v1938_v21 = vsel %vm1067_vm2, %v1935_v48, %v1937_v56  ;;  %v4026_v48 = vld [vmem:[%s7409_s9 + $0x70] sm:$0xff]  ;;  %v2768_v56 = vrot.slane %v577_v42, 2 }
 0x1e4   : > { %v6310_v3 = vadd.f32 %v2301_v36, %v2149_v44  ;;  %v2058_v57 = vpop.f32.mrf.mxu1  ;;  %v5157_v44 = vld [vmem:[%s5528_s28 + $0xd0] sm:$0xff]  ;;  %4247 = vmatpush.msrb.mxu0 %v4026_v48  ;;  %v578_v48 = vld [vmem:[%s6006_s25 + $0xe0] sm:$0xff] }
 0x1e5   : > { %v2150_v45 = vadd.f32 %v2058_v57, %v5833_v20  ;;  %v2765_v20 = vrot.slane %v575_v52, 2  ;;  %v1940_v36 = vrot.slane %v5157_v44, 2 }
 0x1e6   : > { %4827 = vmatmul.msk.f32.gmra.mxu0 %vm712_vm1, %v2762_v14  ;;  %v2479_v14 = vrot.slane %v575_v52, 1 }
 0x1e7   : > { %4719 = vmatmul.msk.f32.gmra.mxu1 %vm712_vm1, %v1936_v7  ;;  %v2767_v19 = vsel %vm1067_vm2, %v2765_v20, %v2766_v2  ;;  %v1941_v23 = vsel %vm1067_vm2, %v1939_v62, %v1940_v36 }
 0x1e8   : > { %4755 = vmatmul.msk.f32.gmra.mxu2 %vm712_vm1, %v572_v1  ;;  %4791 = vmatmul.msk.f32.gmra.mxu3 %vm712_vm1, %v2476_v12  ;;  %v3079_v12 = vld [vmem:[%s7405_s5 + $0x28] sm:$0xff] }
 0x1e9   : > { %3104 = vmatpush.msrb.mxu1 %v3079_v12 }
 0x1eb   : > { %v2304_v49 = vpop.f32.mrf.mxu2  ;;  %v6332_v1 = vpop.f32.mrf.mxu0 }
 0x1ec   : > { %v6330_v60 = vadd.f32 %v2304_v49, %v2150_v45  ;;  %v2061_v58 = vpop.f32.mrf.mxu1  ;;  %v3242_v45 = vld [vmem:[%s7407_s7 + $0x18] sm:$0xff]  ;;  %v1942_v49 = vrot.slane %v5158_v10, 2  ;;  %v579_v10 = vld [vmem:[%s6006_s25 + $0xe8] sm:$0x3] }
 0x1ed   : > { %v2151_v39 = vadd.f32 %v2061_v58, %v5852_v26  ;;  %v2481_v26 = vsel %vm634_vm0, %v2479_v14, %v2480_v18  ;;  %3271 = vmatpush.msrb.mxu2 %v3242_v45  ;;  %v2482_v58 = vrot.slane %v577_v42, 1  ;;  %v2486_v35 = vrot.slane %v579_v10, 1 }
 0x1ee   : > { %4828 = vmatmul.msk.f32.gmra.mxu0 %vm712_vm1, %v2764_v50  ;;  %v1943_v44 = vsel %vm1067_vm2, %v1940_v36, %v1942_v49  ;;  %v4025_v36 = vld [vmem:[%s7409_s9 + $0x68] sm:$0xff] }
 0x1ef   : > { %4720 = vmatmul.msk.f32.gmra.mxu1 %vm712_vm1, %v1938_v21  ;;  %4248 = vmatpush.msrb.mxu0 %v4025_v36  ;;  %v580_v36 = vld [vmem:[%s6006_s25 + $0xf0] sm:$0xff] }
 0x1f0   : > { %4756 = vmatmul.msk.f32.gmra.mxu2 %vm712_vm1, %v573_v38  ;;  %4792 = vmatmul.msk.f32.gmra.mxu3 %vm712_vm1, %v2478_v5 }
 0x1f3   : > { %v2307_v57 = vpop.f32.mrf.mxu2  ;;  %v6351_v7 = vpop.f32.mrf.mxu0 }
 0x1f4   : > { %v6349_v38 = vadd.f32 %v2307_v57, %v2151_v39  ;;  %v2064_v55 = vpop.f32.mrf.mxu1  ;;  %v2770_v39 = vrot.slane %v578_v48, 2 }
 0x1f5   : > { %v2152_v50 = vadd.f32 %v2064_v55, %v5864_v53  ;;  %v2483_v53 = vsel %vm634_vm0, %v2480_v18, %v2482_v58  ;;  %v3078_v55 = vld [vmem:[%s7405_s5 + $0x20] sm:$0xff] }
 0x1f6   : > { %4829 = vmatmul.msk.f32.gmra.mxu0 %vm712_vm1, %v2767_v19  ;;  %v2484_v19 = vrot.slane %v578_v48, 1  ;;  %3105 = vmatpush.msrb.mxu1 %v3078_v55 }
 0x1f7   : > { %4721 = vmatmul.msk.f32.gmra.mxu1 %vm712_vm1, %v1941_v23 }
 0x1f8   : > { %4757 = vmatmul.msk.f32.gmra.mxu2 %vm712_vm1, %v575_v52  ;;  %4793 = vmatmul.msk.f32.gmra.mxu3 %vm712_vm1, %v2481_v26  ;;  %v2769_v52 = vsel %vm1067_vm2, %v2766_v2, %v2768_v56  ;;  %v5159_v2 = vld [vmem:[%s5528_s28 + $0xe0] sm:$0xff] }
 0x1f9   : > { %v1944_v14 = vrot.slane %v5159_v2, 2 }
 0x1fb   : > { %v2310_v21 = vpop.f32.mrf.mxu2  ;;  %v6371_v20 = vpop.f32.mrf.mxu0  ;;  %v1945_v45 = vsel %vm1067_vm2, %v1942_v49, %v1944_v14  ;;  %v5160_v49 = vld [vmem:[%s5528_s28 + $0xe8] sm:$0x3] }
 0x1fc   : > { %v6369_v5 = vadd.f32 %v2310_v21, %v2152_v50  ;;  %v2067_v62 = vpop.f32.mrf.mxu1  ;;  %v6401_v50 = vpop.f32.mrf.mxu3  ;;  %v3241_v21 = vld [vmem:[%s7407_s7 + $0x10] sm:$0xff] }
 0x1fd   : > { %v2153_v57 = vadd.f32 %v2067_v62, %v5876_v61  ;;  %v2485_v61 = vsel %vm634_vm0, %v2482_v58, %v2484_v19  ;;  %3272 = vmatpush.msrb.mxu2 %v3241_v21 }
 0x1fe   : > { %4830 = vmatmul.msk.f32.gmra.mxu0 %vm712_vm1, %v2769_v52  ;;  %v1946_v52 = vrot.slane %v5160_v49, 2 }
 0x1ff   : > { %4722 = vmatmul.msk.f32.gmra.mxu1 %vm712_vm1, %v1943_v44 }
 0x200   : > { %4758 = vmatmul.msk.f32.gmra.mxu2 %vm712_vm1, %v576_v9  ;;  %4794 = vmatmul.msk.f32.gmra.mxu3 %vm712_vm1, %v2483_v53  ;;  %v2771_v9 = vsel %vm1067_vm2, %v2768_v56, %v2770_v39  ;;  %v2772_v56 = vrot.slane %v579_v10, 2  ;;  %v1947_v2 = vsel %vm1067_vm2, %v1944_v14, %v1946_v52  ;;  %v5162_v14 = vld [vmem:[%s5528_s28 + $0xf8] sm:$0xff] }
 0x203   : > { %v2313_v18 = vpop.f32.mrf.mxu2  ;;  %v6395_v26 = vpop.f32.mrf.mxu0 }
 0x204   : > { %v6389_v12 = vadd.f32 %v2313_v18, %v2153_v57  ;;  %v2070_v23 = vpop.f32.mrf.mxu1  ;;  %v581_v57 = vld [vmem:[%s6006_s25 + $0xf8] sm:$0xff]  ;;  %v2487_v18 = vsel %vm634_vm0, %v2484_v19, %v2486_v35  ;;  %v4024_v19 = vld [vmem:[%s7409_s9 + $0x60] sm:$0xff]  ;;  %v6429_v10 = vpop.f32.mrf.mxu3 }
 0x205   : > { %v2154_v58 = vadd.f32 %v2070_v23, %v5889_v22  ;;  %v2774_v22 = vrot.slane %v580_v36, 2  ;;  %v2775_v55 = vrot.slane %v581_v57, 2  ;;  %v2489_v21 = vrot.slane %v581_v57, 1  ;;  %4249 = vmatpush.msrb.mxu0 %v4024_v19 }
 0x206   : > { %4831 = vmatmul.msk.f32.gmra.mxu0 %vm712_vm1, %v2771_v9 }
 0x207   : > { %4723 = vmatmul.msk.f32.gmra.mxu1 %vm712_vm1, %v1945_v45  ;;  %v1949_v45 = vrot.slane %v5162_v14, 2  ;;  %v2776_v52 = vsel %vm1067_vm2, %v2774_v22, %v2775_v55  ;;  %v5163_v22 = vld [vmem:[%s5528_s28 + $0x100] sm:$0xff] }
 0x208   : > { %4759 = vmatmul.msk.f32.gmra.mxu2 %vm712_vm1, %v577_v42  ;;  %4795 = vmatmul.msk.f32.gmra.mxu3 %vm712_vm1, %v2485_v61  ;;  %v2773_v42 = vsel %vm1067_vm2, %v2770_v39, %v2772_v56  ;;  %v5161_v39 = vld [vmem:[%s5528_s28 + $0xf0] sm:$0xff]  ;;  %v2488_v56 = vrot.slane %v580_v36, 1 }
 0x209   : > { %v1948_v23 = vrot.slane %v5161_v39, 2  ;;  %v1951_v39 = vrot.slane %v5163_v22, 2  ;;  %v4022_v22 = vld [vmem:[%s7409_s9 + $0x50] sm:$0xff] }
 0x20b   : > { %v2316_v62 = vpop.f32.mrf.mxu2  ;;  %v6418_v9 = vpop.f32.mrf.mxu0 }
 0x20c   : > { %v6411_v44 = vadd.f32 %v2316_v62, %v2154_v58  ;;  %v2073_v53 = vpop.f32.mrf.mxu1  ;;  %v3077_v58 = vld [vmem:[%s7405_s5 + $0x18] sm:$0xff]  ;;  %v1950_v62 = vsel %vm1067_vm2, %v1948_v23, %v1949_v45 }
 0x20d   : > { %v2155_v61 = vadd.f32 %v2073_v53, %v5903_v33  ;;  %3106 = vmatpush.msrb.mxu1 %v3077_v58  ;;  %v2490_v33 = vsel %vm634_vm0, %v2488_v56, %v2489_v21  ;;  %v1952_v58 = vsel %vm1067_vm2, %v1949_v45, %v1951_v39 }
 0x20e   : > { %4832 = vmatmul.msk.f32.gmra.mxu0 %vm712_vm1, %v2773_v42  ;;  %v582_v42 = vld [vmem:[%s6006_s25 + $0x100] sm:$0xff] }
 0x20f   : > { %4724 = vmatmul.msk.f32.gmra.mxu1 %vm712_vm1, %v1947_v2  ;;  %v2777_v53 = vrot.slane %v582_v42, 2  ;;  %v3240_v2 = vld [vmem:[%s7407_s7 + $0x8] sm:$0xff]  ;;  %v2491_v14 = vrot.slane %v582_v42, 1 }
 0x210   : > { %4760 = vmatmul.msk.f32.gmra.mxu2 %vm712_vm1, %v578_v48  ;;  %4796 = vmatmul.msk.f32.gmra.mxu3 %vm712_vm1, %v2487_v18 }
 0x211   : > { %3273 = vmatpush.msrb.mxu2 %v3240_v2  ;;  %v2778_v56 = vsel %vm1067_vm2, %v2775_v55, %v2777_v53  ;;  %v4023_v55 = vld [vmem:[%s7409_s9 + $0x58] sm:$0xff] }
 0x212   : > { %4250 = vmatpush.msrb.mxu0 %v4023_v55 }
 0x213   : > { %v2319_v48 = vpop.f32.mrf.mxu2  ;;  %v6447_v18 = vpop.f32.mrf.mxu0 }
 0x214   : > { %v6432_v49 = vadd.f32 %v2319_v48, %v2155_v61  ;;  %v2076_v35 = vpop.f32.mrf.mxu1  ;;  %v6452_v61 = vpop.f32.mrf.mxu3  ;;  %v4033_v48 = vld [vmem:[%s7410_s10 + $0x28] sm:$0xff]  ;;  %4251 = vmatpush.msrb.mxu0 %v4022_v22  ;;  %v4019_v22 = vld [vmem:[%s7409_s9 + $0x38] sm:$0xff] }
 0x215   : > { %v2156_v23 = vadd.f32 %v2076_v35, %v5914_v6  ;;  %4143 = vmatpush.msrb.mxu3 %v4033_v48  ;;  %v2492_v6 = vsel %vm634_vm0, %v2489_v21, %v2491_v14  ;;  %v3076_v48 = vld [vmem:[%s7405_s5 + $0x10] sm:$0xff] }
 0x216   : > { %4833 = vmatmul.msk.f32.gmra.mxu0 %vm712_vm1, %v2776_v52  ;;  %3107 = vmatpush.msrb.mxu1 %v3076_v48 }
 0x217   : > { %4725 = vmatmul.msk.f32.gmra.mxu1 %vm712_vm1, %v1950_v62  ;;  %v583_v62 = vld [vmem:[%s6006_s25 + $0x108] sm:$0xff] }
 0x218   : > { %4761 = vmatmul.msk.f32.gmra.mxu2 %vm712_vm1, %v580_v36  ;;  %4797 = vmatmul.msk.f32.gmra.mxu3 %vm712_vm1, %v2490_v33  ;;  %v2779_v35 = vrot.slane %v583_v62, 2  ;;  %v5164_v33 = vld [vmem:[%s5528_s28 + $0x108] sm:$0xff]  ;;  %v2493_v21 = vrot.slane %v583_v62, 1 }
 0x219   : > { %v1953_v45 = vrot.slane %v5164_v33, 2 }
 0x21a   : > { %v2494_v33 = vsel %vm634_vm0, %v2491_v14, %v2493_v21  ;;  %v5165_v14 = vld [vmem:[%s5528_s28 + $0x110] sm:$0x3] }
 0x21b   : > { %v2322_v19 = vpop.f32.mrf.mxu2 }
 0x21c   : > { %v6454_v36 = vadd.f32 %v2322_v19, %v2156_v23  ;;  %v2079_v52 = vpop.f32.mrf.mxu1  ;;  %v6475_v23 = vpop.f32.mrf.mxu0 }
 0x21d   : > { %v2157_v2 = vadd.f32 %v2079_v52, %v5925_v8  ;;  %v4021_v8 = vld [vmem:[%s7409_s9 + $0x48] sm:$0xff]  ;;  %v6488_v55 = vpop.f32.mrf.mxu3 }
 0x21e   : > { %4834 = vmatmul.msk.f32.gmra.mxu0 %vm712_vm1, %v2778_v56  ;;  %v2780_v56 = vsel %vm1067_vm2, %v2777_v53, %v2779_v35  ;;  %v4020_v53 = vld [vmem:[%s7409_s9 + $0x40] sm:$0xff] }
 0x21f   : > { %4726 = vmatmul.msk.f32.gmra.mxu1 %vm712_vm1, %v1952_v58  ;;  %v1954_v58 = vsel %vm1067_vm2, %v1951_v39, %v1953_v45  ;;  %4252 = vmatpush.msrb.mxu0 %v4021_v8  ;;  %v3239_v39 = vld [vmem:[%s7407_s7] sm:$0xff] }
 0x220   : > { %4762 = vmatmul.msk.f32.gmra.mxu2 %vm712_vm1, %v581_v57  ;;  %4798 = vmatmul.msk.f32.gmra.mxu3 %vm712_vm1, %v2492_v6  ;;  %v584_v6 = vld [vmem:[%s6006_s25 + $0x110] sm:$0x3] }
 0x221   : > { %4253 = vmatpush.msrb.mxu0 %v4020_v53  ;;  %v2495_v48 = vrot.slane %v584_v6, 1  ;;  %3274 = vmatpush.msrb.mxu2 %v3239_v39  ;;  %v4017_v39 = vld [vmem:[%s7409_s9 + $0x28] sm:$0xff] }
 0x223   : > { %v2325_v57 = vpop.f32.mrf.mxu2  ;;  %4254 = vmatpush.msrb.mxu0 %v4019_v22 }
 0x224   : > { %v6477_v19 = vadd.f32 %v2325_v57, %v2157_v2  ;;  %v2082_v52 = vpop.f32.mrf.mxu1  ;;  %v2781_v2 = vrot.slane %v584_v6, 2  ;;  %v1955_v57 = vrot.slane %v5165_v14, 2  ;;  %v6512_v40 = vpop.f32.mrf.mxu0  ;;  %v2496_v6 = vsel %vm634_vm0, %v2493_v21, %v2495_v48  ;;  %v5166_v21 = vld [vmem:[%s5528_s28 + $0x118] sm:$0xff] }
 0x225   : > { %v6522_v22 = vpop.f32.mrf.mxu3  ;;  %v1957_v14 = vrot.slane %v5166_v21, 2  ;;  %v3075_v21 = vld [vmem:[%s7405_s5 + $0x8] sm:$0xff] }
 0x226   : > { %4835 = vmatmul.msk.f32.gmra.mxu0 %vm712_vm1, %v2780_v56  ;;  %v2158_v56 = vadd.f32 %v2082_v52, %v5940_v54  ;;  %v2782_v30 = vsel %vm1067_vm2, %v2779_v35, %v2781_v2  ;;  %v1956_v53 = vsel %vm1067_vm2, %v1953_v45, %v1955_v57  ;;  %v585_v54 = vld [vmem:[%s6006_s25 + $0x118] sm:$0xff]  ;;  %v586_v52 = vld [vmem:[%s6006_s25 + $0x120] sm:$0xff]  ;;  %3108 = vmatpush.msrb.mxu1 %v3075_v21 }
 0x227   : > { %4727 = vmatmul.msk.f32.gmra.mxu1 %vm712_vm1, %v1954_v58  ;;  %v2783_v35 = vrot.slane %v585_v54, 2  ;;  %v2784_v45 = vrot.slane %v586_v52, 2  ;;  %v4016_v2 = vld [vmem:[%s7409_s9 + $0x20] sm:$0xff]  ;;  %v2497_v48 = vrot.slane %v585_v54, 1 }
 0x228   : > { %4763 = vmatmul.msk.f32.gmra.mxu2 %vm712_vm1, %v582_v42  ;;  %4799 = vmatmul.msk.f32.gmra.mxu3 %vm712_vm1, %v2494_v33  ;;  %v4018_v42 = vld [vmem:[%s7409_s9 + $0x30] sm:$0xff]  ;;  %v5167_v57 = vld [vmem:[%s5528_s28 + $0x120] sm:$0xff] }
 0x229   : > { %4255 = vmatpush.msrb.mxu0 %v4018_v42  ;;  %v2498_v42 = vrot.slane %v586_v52, 1 }
 0x22b   : > { %v2328_v8 = vpop.f32.mrf.mxu2  ;;  %4256 = vmatpush.msrb.mxu0 %v4017_v39  ;;  %v2499_v39 = vsel %vm634_vm0, %v2497_v48, %v2498_v42  ;;  %v4013_v48 = vld [vmem:[%s7409_s9 + $0x8] sm:$0xff] }
 0x22c   : > { %v6509_v58 = vadd.f32 %v2328_v8, %v2158_v56  ;;  %v2085_v33 = vpop.f32.mrf.mxu1  ;;  %v1958_v56 = vrot.slane %v5167_v57, 2 }
 0x22d   : > { %4257 = vmatpush.msrb.mxu0 %v4016_v2  ;;  %v4014_v2 = vld [vmem:[%s7409_s9 + $0x10] sm:$0xff]  ;;  %v6561_v21 = vpop.f32.mrf.mxu3 }
 0x22e   : > { %4836 = vmatmul.msk.f32.gmra.mxu0 %vm712_vm1, %v2782_v30  ;;  %v2159_v30 = vadd.f32 %v2085_v33, %v5971_v17  ;;  %v1959_v17 = vsel %vm1067_vm2, %v1957_v14, %v1958_v56  ;;  %v587_v33 = vld [vmem:[%s6006_s25 + $0x128] sm:$0xff] }
 0x22f   : > { %4728 = vmatmul.msk.f32.gmra.mxu1 %vm712_vm1, %v1956_v53  ;;  %v2786_v14 = vrot.slane %v587_v33, 2 }
 0x230   : > { %4764 = vmatmul.msk.f32.gmra.mxu2 %vm712_vm1, %v583_v62  ;;  %4800 = vmatmul.msk.f32.gmra.mxu3 %vm712_vm1, %v2496_v6  ;;  %v4015_v62 = vld [vmem:[%s7409_s9 + $0x18] sm:$0xff]  ;;  %v2785_v6 = vsel %vm1067_vm2, %v2783_v35, %v2784_v45  ;;  %v3074_v35 = vld [vmem:[%s7405_s5] sm:$0xff] }
 0x231   : > { %4258 = vmatpush.msrb.mxu0 %v4015_v62  ;;  %3109 = vmatpush.msrb.mxu1 %v3074_v35  ;;  %v5168_v62 = vld [vmem:[%s5528_s28 + $0x128] sm:$0xff]  ;;  %v2500_v35 = vrot.slane %v587_v33, 1  ;;  %v2787_v15 = vsel %vm1067_vm2, %v2784_v45, %v2786_v14 }
 0x233   : > { %v2331_v8 = vpop.f32.mrf.mxu2  ;;  %4259 = vmatpush.msrb.mxu0 %v4014_v2 }
 0x234   : > { %v6536_v53 = vadd.f32 %v2331_v8, %v2159_v30  ;;  %v2088_v57 = vpop.f32.mrf.mxu1  ;;  %v6551_v30 = vpop.f32.mrf.mxu0  ;;  %v1960_v8 = vrot.slane %v5168_v62, 2 }
 0x235   : > { %4260 = vmatpush.msrb.mxu0 %v4013_v48 }
 0x236   : > { %4837 = vmatmul.msk.f32.gmra.mxu0 %vm712_vm1, %v2785_v6  ;;  %v2160_v6 = vadd.f32 %v2088_v57, %v5982_v0  ;;  %v1961_v62 = vsel %vm1067_vm2, %v1958_v56, %v1960_v8  ;;  %v588_v0 = vld [vmem:[%s6006_s25 + $0x130] sm:$0xff]  ;;  %v2501_v57 = vsel %vm634_vm0, %v2498_v42, %v2500_v35  ;;  %v6584_v42 = vpop.f32.mrf.mxu3 }
 0x237   : > { %4729 = vmatmul.msk.f32.gmra.mxu1 %vm712_vm1, %v1959_v17  ;;  %v2788_v45 = vrot.slane %v588_v0, 2 }
 0x238   : > { %4765 = vmatmul.msk.f32.gmra.mxu2 %vm712_vm1, %v585_v54  ;;  %4801 = vmatmul.msk.f32.gmra.mxu3 %vm712_vm1, %v2499_v39  ;;  %v4012_v54 = vld [vmem:[%s7409_s9] sm:$0xff] }
 0x239   : > { %v4032_v39 = vld [vmem:[%s7410_s10 + $0x20] sm:$0xff]  ;;  %4261 = vmatpush.msrb.mxu0 %v4012_v54  ;;  %v2502_v54 = vrot.slane %v588_v0, 1 }
 0x23a   : > { %4144 = vmatpush.msrb.mxu3 %v4032_v39 }
 0x23b   : > { %v2334_v17 = vpop.f32.mrf.mxu2 }
 0x23c   : > { %v6567_v41 = vadd.f32 %v2334_v17, %v2160_v6  ;;  %v2091_v2 = vpop.f32.mrf.mxu1  ;;  %v6579_v48 = vpop.f32.mrf.mxu0  ;;  %v5169_v6 = vld [vmem:[%s5528_s28 + $0x130] sm:$0xff] }
 0x23d   : > { %7421 = vst [vmem:[#allocation8_spill] sm:$0xff] %v6579_v48  ;;  %v1962_v17 = vrot.slane %v5169_v6, 2  ;;  %v2161_v56 = vadd.f32 %v2091_v2, %v5997_v4  ;;  %v2503_v48 = vsel %vm634_vm0, %v2500_v35, %v2502_v54  ;;  %v2790_v4 = vrot.slane %v589_v31, 2 }
 0x23e   : > { %4838 = vmatmul.msk.f32.gmra.mxu0 %vm712_vm1, %v2787_v15  ;;  %v2688_v2 = vadd.f32 %v6401_v50, %v6290_v37  ;;  %v6609_v37 = vld [vmem:[%s7404_s4] ss:$0 sm:$0xff] }
 0x23f   : > { %4730 = vmatmul.msk.f32.gmra.mxu1 %vm712_vm1, %v1961_v62  ;;  %v2789_v62 = vsel %vm1067_vm2, %v2786_v14, %v2788_v45 }
 0x240   : > { %4766 = vmatmul.msk.f32.gmra.mxu2 %vm712_vm1, %v586_v52  ;;  %4802 = vmatmul.msk.f32.gmra.mxu3 %vm712_vm1, %v2501_v57  ;;  %v1963_v52 = vsel %vm1067_vm2, %v1960_v8, %v1962_v17  ;;  %v5170_v57 = vld [vmem:[%s5528_s28 + $0x138] sm:$0x3]  ;;  %v2504_v8 = vrot.slane %v589_v31, 1 }
 0x241   : > { %v1964_v14 = vrot.slane %v5170_v57, 2 }
 0x243   : > { %v2337_v39 = vpop.f32.mrf.mxu2 }
 0x244   : > { %v6586_v15 = vadd.f32 %v2337_v39, %v2161_v56  ;;  %v2094_v28 = vpop.f32.mrf.mxu1  ;;  %v6600_v56 = vpop.f32.mrf.mxu0 }
 0x245   : > { %v2162_v6 = vadd.f32 %v2094_v28, %v6016_v59  ;;  %v2505_v59 = vsel %vm634_vm0, %v2502_v54, %v2504_v8  ;;  %v2689_v28 = vadd.f32 %v6429_v10, %v6310_v3  ;;  %v2690_v3 = vadd.f32 %v6452_v61, %v6330_v60 }
 0x246   : > { %4839 = vmatmul.msk.f32.gmra.mxu0 %vm712_vm1, %v2789_v62  ;;  %v2791_v62 = vsel %vm1067_vm2, %v2788_v45, %v2790_v4 }
 0x247   : > { %4731 = vmatmul.msk.f32.gmra.mxu1 %vm712_vm1, %v1963_v52  ;;  %v6612_v52 = vpop.f32.mrf.mxu3  ;;  %v2975_v54 = vadd.f32 %v6292_v27, %v2689_v28  ;;  %v4031_v27 = vld [vmem:[%s7410_s10 + $0x18] sm:$0xff]  ;;  %v2976_v8 = vadd.f32 %v6312_v24, %v2690_v3 }
 0x248   : > { %4767 = vmatmul.msk.f32.gmra.mxu2 %vm712_vm1, %v587_v33  ;;  %4803 = vmatmul.msk.f32.gmra.mxu3 %vm712_vm1, %v2503_v48  ;;  %v2974_v33 = vadd.f32 %v6270_v47, %v2688_v2  ;;  %v1965_v48 = vsel %vm1067_vm2, %v1962_v17, %v1964_v14 }
 0x249   : > { %v3011_v10 = vadd.f32 %v6609_v37, %v2975_v54  ;;  %4145 = vmatpush.msrb.mxu3 %v4031_v27  ;;  %v3012_v60 = vadd.f32 %v6609_v37, %v2976_v8 }
 0x24a   : > { %v3010_v31 = vadd.f32 %v6609_v37, %v2974_v33 }
 0x24b   : > { %v2340_v35 = vpop.f32.mrf.mxu2  ;;  %v3044_v28 = vmax.f32 %v3012_v60, 0.0 }
 0x24c   : > { %v6602_v39 = vadd.f32 %v2340_v35, %v2162_v6  ;;  %v2097_v50 = vpop.f32.mrf.mxu1  ;;  %v3042_v4 = vmax.f32 %v3010_v31, 0.0  ;;  %v6626_v2 = vpop.f32.mrf.mxu0 }
 0x24d   : > { %v2163_v47 = vadd.f32 %v2097_v50, %v6033_v29 }
 0x24e   : > { %4840 = vmatmul.msk.f32.gmra.mxu0 %vm712_vm1, %v2791_v62  ;;  %v3043_v62 = vmax.f32 %v3011_v10, 0.0 }
 0x24f   : > { %4732 = vmatmul.msk.f32.gmra.mxu1 %vm712_vm1, %v1965_v48 }
 0x250   : > { %4768 = vmatmul.msk.f32.gmra.mxu2 %vm712_vm1, %v588_v0  ;;  %4804 = vmatmul.msk.f32.gmra.mxu3 %vm712_vm1, %v2505_v59  ;;  %v6628_v0 = vpop.f32.mrf.mxu3 }
 0x253   : > { %v2343_v45 = vpop.f32.mrf.mxu2 }
 0x254   : > { %v6623_v17 = vadd.f32 %v2343_v45, %v2163_v47  ;;  %v2100_v57 = vpop.f32.mrf.mxu1  ;;  %v6640_v33 = vpop.f32.mrf.mxu0  ;;  %v2692_v47 = vadd.f32 %v6522_v22, %v6369_v5  ;;  %v2693_v5 = vadd.f32 %v6561_v21, %v6389_v12  ;;  %v2694_v12 = vadd.f32 %v6584_v42, %v6411_v44 }
 0x255   : > { %v2164_v29 = vadd.f32 %v2100_v57, %v6047_v46  ;;  %v2691_v46 = vadd.f32 %v6488_v55, %v6349_v38 }
 0x256   : > { %4262 = vmatmul.f32.vlgmr.msrb.gmra.mxu0 %v3042_v4  ;;  %v2979_v27 = vadd.f32 %v6371_v20, %v2693_v5  ;;  %v4030_v20 = vld [vmem:[%s7410_s10 + $0x10] sm:$0xff]  ;;  %v2980_v60 = vadd.f32 %v6395_v26, %v2694_v12 }
 0x257   : > { %3110 = vmatmul.f32.vlgmr.msrb.gmra.mxu1 %v3042_v4  ;;  %v2977_v24 = vadd.f32 %v6332_v1, %v2691_v46  ;;  %v2978_v1 = vadd.f32 %v6351_v7, %v2692_v47  ;;  %4146 = vmatpush.msrb.mxu3 %v4030_v20 }
 0x258   : > { %3275 = vmatmul.f32.vlgmr.msrb.gmra.mxu2 %v3042_v4  ;;  %v6645_v61 = vpop.f32.mrf.mxu3  ;;  %v3015_v21 = vadd.f32 %v6609_v37, %v2979_v27  ;;  %v3016_v42 = vadd.f32 %v6609_v37, %v2980_v60 }
 0x259   : > { %v3013_v55 = vadd.f32 %v6609_v37, %v2977_v24  ;;  %v3014_v22 = vadd.f32 %v6609_v37, %v2978_v1  ;;  %v2696_v1 = vadd.f32 %v6628_v0, %v6454_v36 }
 0x25a   : > { %v3047_v24 = vmax.f32 %v3015_v21, 0.0 }
 0x25b   : > { %v2346_v14 = vpop.f32.mrf.mxu2  ;;  %v3045_v3 = vmax.f32 %v3013_v55, 0.0  ;;  %v3046_v8 = vmax.f32 %v3014_v22, 0.0 }
 0x25c   : > { %v6634_v6 = vadd.f32 %v2346_v14, %v2164_v29  ;;  %v2103_v35 = vpop.f32.mrf.mxu1  ;;  %v6653_v38 = vpop.f32.mrf.mxu0 }
 0x25d   : > { %v2165_v50 = vadd.f32 %v2103_v35, %v6065_v63 }
 0x25e   : > { %4265 = vmatmul.f32.gmra.mxu0 %v3043_v62 }
 0x25f   : > { %3113 = vmatmul.f32.gmra.mxu1 %v3043_v62 }
 0x260   : > { %3278 = vmatmul.f32.gmra.mxu2 %v3043_v62  ;;  %v6657_v4 = vpop.f32.mrf.mxu3 }
 0x263   : > { %v2349_v48 = vpop.f32.mrf.mxu2 }
 0x264   : > { %v6648_v59 = vadd.f32 %v2349_v48, %v2165_v50  ;;  %v2106_v31 = vpop.f32.mrf.mxu1 }
 0x265   : > { %v2166_v45 = vadd.f32 %v2106_v31, %v6078_v32  ;;  %v6666_v32 = vpop.f32.mrf.mxu0 }
 0x266   : > { %4268 = vmatmul.f32.gmra.mxu0 %v3044_v28 }
 0x267   : > { %3116 = vmatmul.f32.gmra.mxu1 %v3044_v28 }
 0x268   : > { %3281 = vmatmul.f32.gmra.mxu2 %v3044_v28  ;;  %v6671_v35 = vpop.f32.mrf.mxu3 }
 0x26b   : > { %v2352_v63 = vpop.f32.mrf.mxu2 }
 0x26c   : > { %v6659_v54 = vadd.f32 %v2352_v63, %v2166_v45  ;;  %v2109_v57 = vpop.f32.mrf.mxu1  ;;  %v3048_v45 = vmax.f32 %v3016_v42, 0.0 }
 0x26d   : > { %v2167_v10 = vadd.f32 %v2109_v57, %v6097_v51  ;;  %v6683_v50 = vpop.f32.mrf.mxu0 }
 0x26e   : > { %4271 = vmatmul.f32.gmra.mxu0 %v3045_v3 }
 0x26f   : > { %3119 = vmatmul.f32.gmra.mxu1 %v3045_v3 }
 0x270   : > { %3284 = vmatmul.f32.gmra.mxu2 %v3045_v3  ;;  %v6685_v44 = vpop.f32.mrf.mxu3 }
 0x273   : > { %v2355_v29 = vpop.f32.mrf.mxu2 }
 0x274   : > { %v6668_v14 = vadd.f32 %v2355_v29, %v2167_v10  ;;  %v2112_v7 = vpop.f32.mrf.mxu1  ;;  %v2697_v10 = vadd.f32 %v6645_v61, %v6477_v19  ;;  %v2698_v19 = vadd.f32 %v6657_v4, %v6509_v58 }
 0x275   : > { %v2168_v51 = vadd.f32 %v2112_v7, %v6109_v34  ;;  %v2695_v34 = vadd.f32 %v6612_v52, %v6432_v49  ;;  %v6694_v63 = vpop.f32.mrf.mxu0 }
 0x276   : > { %4274 = vmatmul.f32.gmra.mxu0 %v3046_v8  ;;  %v2984_v20 = vadd.f32 %v6512_v40, %v2698_v19 }
 0x277   : > { %3122 = vmatmul.f32.gmra.mxu1 %v3046_v8  ;;  %v2981_v26 = vadd.f32 %v6418_v9, %v2695_v34  ;;  %v2982_v9 = vadd.f32 %v6447_v18, %v2696_v1  ;;  %v2983_v18 = vadd.f32 %v6475_v23, %v2697_v10  ;;  %v4029_v23 = vld [vmem:[%s7410_s10 + $0x8] sm:$0xff]  ;;  %v7424_v10 = vld [vmem:[#allocation4_spill] sm:$0xff] }
 0x278   : > { %3287 = vmatmul.f32.gmra.mxu2 %v3046_v8  ;;  %v6699_v52 = vpop.f32.mrf.mxu3  ;;  %4147 = vmatpush.msrb.mxu3 %v4029_v23  ;;  %v3020_v58 = vadd.f32 %v6609_v37, %v2984_v20 }
 0x279   : > { %v3017_v49 = vadd.f32 %v6609_v37, %v2981_v26  ;;  %v3018_v0 = vadd.f32 %v6609_v37, %v2982_v9  ;;  %v3019_v61 = vadd.f32 %v6609_v37, %v2983_v18 }
 0x27a   : > { %v3052_v26 = vmax.f32 %v3020_v58, 0.0 }
 0x27b   : > { %v2358_v62 = vpop.f32.mrf.mxu2  ;;  %v3049_v22 = vmax.f32 %v3017_v49, 0.0  ;;  %v3050_v12 = vmax.f32 %v3018_v0, 0.0 }
 0x27c   : > { %v6677_v46 = vadd.f32 %v2358_v62, %v2168_v51  ;;  %v2115_v48 = vpop.f32.mrf.mxu1 }
 0x27d   : > { %v2169_v31 = vadd.f32 %v2115_v48, %v6127_v43  ;;  %v6707_v36 = vpop.f32.mrf.mxu0  ;;  %v3051_v48 = vmax.f32 %v3019_v61, 0.0 }
 0x27e   : > { %4277 = vmatmul.f32.gmra.mxu0 %v3047_v24 }
 0x27f   : > { %3125 = vmatmul.f32.gmra.mxu1 %v3047_v24 }
 0x280   : > { %3290 = vmatmul.f32.gmra.mxu2 %v3047_v24  ;;  %v2634_v27 = vpop.f32.mrf.mxu3 }
 0x281   : > { %v2702_v19 = vadd.f32 %v2634_v27, %v6602_v39  ;;  %v7426_v27 = vld [vmem:[#allocation6_spill] sm:$0xff] }
 0x283   : > { %v2361_v28 = vpop.f32.mrf.mxu2 }
 0x284   : > { %v6691_v47 = vadd.f32 %v2361_v28, %v2169_v31  ;;  %v2118_v55 = vpop.f32.mrf.mxu1 }
 0x285   : > { %v2170_v43 = vadd.f32 %v2118_v55, %v6140_v25  ;;  %v6718_v51 = vpop.f32.mrf.mxu0 }
 0x286   : > { %4280 = vmatmul.f32.gmra.mxu0 %v3048_v45 }
 0x287   : > { %3128 = vmatmul.f32.gmra.mxu1 %v3048_v45 }
 0x288   : > { %3293 = vmatmul.f32.gmra.mxu2 %v3048_v45  ;;  %v2637_v24 = vpop.f32.mrf.mxu3  ;;  %v7422_v45 = vld [vmem:[#allocation3_spill] sm:$0xff] }
 0x28b   : > { %v2364_v57 = vpop.f32.mrf.mxu2 }
 0x28c   : > { %v6702_v3 = vadd.f32 %v2364_v57, %v2170_v43  ;;  %v2121_v5 = vpop.f32.mrf.mxu1  ;;  %v7423_v43 = vld [vmem:[#allocation8_spill] sm:$0xff] }
 0x28d   : > { %v2171_v29 = vadd.f32 %v2121_v5, %v6159_v11  ;;  %v6733_v40 = vpop.f32.mrf.mxu0 }
 0x28e   : > { %4283 = vmatmul.f32.gmra.mxu0 %v3049_v22 }
 0x28f   : > { %3131 = vmatmul.f32.gmra.mxu1 %v3049_v22 }
 0x290   : > { %3296 = vmatmul.f32.gmra.mxu2 %v3049_v22  ;;  %v2640_v55 = vpop.f32.mrf.mxu3  ;;  %v2701_v22 = vadd.f32 %v6699_v52, %v6586_v15  ;;  %v7425_v52 = vld [vmem:[#allocation5_spill] sm:$0xff] }
 0x292   : > { %v2987_v18 = vadd.f32 %v6600_v56, %v2701_v22 }
 0x293   : > { %v2367_v25 = vpop.f32.mrf.mxu2 }
 0x294   : > { %v6711_v7 = vadd.f32 %v2367_v25, %v2171_v29  ;;  %v2124_v8 = vpop.f32.mrf.mxu1  ;;  %v3023_v15 = vadd.f32 %v6609_v37, %v2987_v18 }
 0x295   : > { %v2172_v21 = vadd.f32 %v2124_v8, %v6171_v13  ;;  %v2699_v13 = vadd.f32 %v6671_v35, %v6536_v53  ;;  %v2700_v53 = vadd.f32 %v6685_v44, %v6567_v41  ;;  %v6742_v5 = vpop.f32.mrf.mxu0 }
 0x296   : > { %4286 = vmatmul.f32.gmra.mxu0 %v3050_v12 }
 0x297   : > { %3134 = vmatmul.f32.gmra.mxu1 %v3050_v12  ;;  %v2985_v31 = vadd.f32 %v6551_v30, %v2699_v13  ;;  %v2986_v30 = vadd.f32 %v7423_v43, %v2700_v53  ;;  %v2703_v13 = vadd.f32 %v2637_v24, %v6623_v17  ;;  %v7427_v24 = vld [vmem:[#allocation7_spill] sm:$0xff] }
 0x298   : > { %3299 = vmatmul.f32.gmra.mxu2 %v3050_v12  ;;  %v2643_v44 = vpop.f32.mrf.mxu3 }
 0x299   : > { %v3021_v35 = vadd.f32 %v6609_v37, %v2985_v31  ;;  %v3022_v41 = vadd.f32 %v6609_v37, %v2986_v30  ;;  %v2705_v22 = vadd.f32 %v2643_v44, %v6648_v59  ;;  %v6786_v59 = vld [vmem:[%s7408_s8] ss:$0 sm:$0xff] }
 0x29a   : > { %v4028_v44 = vld [vmem:[%s7410_s10] sm:$0xff] }
 0x29b   : > { %v2370_v11 = vpop.f32.mrf.mxu2  ;;  %v3053_v9 = vmax.f32 %v3021_v35, 0.0  ;;  %v3054_v12 = vmax.f32 %v3022_v41, 0.0  ;;  %v2704_v35 = vadd.f32 %v2640_v55, %v6634_v6  ;;  %v7428_v55 = vld [vmem:[#allocation2_spill] sm:$0xff]  ;;  %4148 = vmatpush.msrb.mxu3 %v4028_v44 }
 0x29c   : > { %v6720_v62 = vadd.f32 %v2370_v11, %v2172_v21  ;;  %v2127_v60 = vpop.f32.mrf.mxu1 }
 0x29d   : > { %v2173_v4 = vadd.f32 %v2127_v60, %v6189_v16  ;;  %v6752_v61 = vpop.f32.mrf.mxu0  ;;  %v2988_v60 = vadd.f32 %v6626_v2, %v2702_v19  ;;  %v2990_v43 = vadd.f32 %v6653_v38, %v2704_v35 }
 0x29e   : > { %4289 = vmatmul.f32.gmra.mxu0 %v3051_v48 }
 0x29f   : > { %3137 = vmatmul.f32.gmra.mxu1 %v3051_v48  ;;  %v3024_v39 = vadd.f32 %v6609_v37, %v2988_v60  ;;  %v3026_v6 = vadd.f32 %v6609_v37, %v2990_v43 }
 0x2a0   : > { %3302 = vmatmul.f32.gmra.mxu2 %v3051_v48  ;;  %v2646_v23 = vpop.f32.mrf.mxu3  ;;  %v3055_v48 = vmax.f32 %v3023_v15, 0.0 }
 0x2a1   : > { %v3056_v2 = vmax.f32 %v3024_v39, 0.0  ;;  %v3058_v18 = vmax.f32 %v3026_v6, 0.0 }
 0x2a3   : > { %v2373_v34 = vpop.f32.mrf.mxu2 }
 0x2a4   : > { %v6730_v42 = vadd.f32 %v2373_v34, %v2173_v4  ;;  %v2130_v28 = vpop.f32.mrf.mxu1 }
 0x2a5   : > { %v2174_v16 = vadd.f32 %v2130_v28, %v7422_v45  ;;  %v6762_v4 = vpop.f32.mrf.mxu0  ;;  %v2989_v28 = vadd.f32 %v6640_v33, %v2703_v13 }
 0x2a6   : > { %4292 = vmatmul.f32.gmra.mxu0 %v3052_v26 }
 0x2a7   : > { %3140 = vmatmul.f32.gmra.mxu1 %v3052_v26  ;;  %v3025_v17 = vadd.f32 %v6609_v37, %v2989_v28 }
 0x2a8   : > { %3305 = vmatmul.f32.gmra.mxu2 %v3052_v26  ;;  %v2649_v53 = vpop.f32.mrf.mxu3 }
 0x2ab   : > { %v2376_v1 = vpop.f32.mrf.mxu2 }
 0x2ac   : > { %v6739_v49 = vadd.f32 %v2376_v1, %v2174_v16  ;;  %v2133_v57 = vpop.f32.mrf.mxu1 }
 0x2ad   : > { %v2175_v0 = vadd.f32 %v2133_v57, %v7424_v10  ;;  %v6773_v30 = vpop.f32.mrf.mxu0  ;;  %v3057_v57 = vmax.f32 %v3025_v17, 0.0 }
 0x2ae   : > { %4295 = vmatmul.f32.gmra.mxu0 %v3053_v9 }
 0x2af   : > { %3143 = vmatmul.f32.gmra.mxu1 %v3053_v9 }
 0x2b0   : > { %3308 = vmatmul.f32.gmra.mxu2 %v3053_v9  ;;  %v2652_v9 = vpop.f32.mrf.mxu3 }
 0x2b3   : > { %v2379_v29 = vpop.f32.mrf.mxu2 }
 0x2b4   : > { %v6748_v25 = vadd.f32 %v2379_v29, %v2175_v0  ;;  %v2136_v8 = vpop.f32.mrf.mxu1  ;;  %v2991_v29 = vadd.f32 %v6666_v32, %v2705_v22 }
 0x2b5   : > { %v2176_v21 = vadd.f32 %v2136_v8, %v7425_v52  ;;  %v6781_v8 = vpop.f32.mrf.mxu0 }
 0x2b6   : > { %4298 = vmatmul.f32.gmra.mxu0 %v3054_v12  ;;  %v3027_v32 = vadd.f32 %v6609_v37, %v2991_v29 }
 0x2b7   : > { %3146 = vmatmul.f32.gmra.mxu1 %v3054_v12 }
 0x2b8   : > { %3311 = vmatmul.f32.gmra.mxu2 %v3054_v12  ;;  %v2706_v12 = vadd.f32 %v2646_v23, %v6659_v54  ;;  %v2655_v19 = vpop.f32.mrf.mxu3  ;;  %v3059_v60 = vmax.f32 %v3027_v32, 0.0 }
 0x2b9   : > { %v2709_v22 = vadd.f32 %v2655_v19, %v6691_v47 }
 0x2bb   : > { %v2382_v11 = vpop.f32.mrf.mxu2  ;;  %v2995_v29 = vadd.f32 %v6718_v51, %v2709_v22 }
 0x2bc   : > { %v6756_v20 = vadd.f32 %v2382_v11, %v2176_v21  ;;  %v2139_v56 = vpop.f32.mrf.mxu1  ;;  %v2992_v21 = vadd.f32 %v6683_v50, %v2706_v12 }
 0x2bd   : > { %v2177_v58 = vadd.f32 %v2139_v56, %v7426_v27  ;;  %v6798_v54 = vpop.f32.mrf.mxu0 }
 0x2be   : > { %4301 = vmatmul.f32.gmra.mxu0 %v3055_v48  ;;  %v3028_v23 = vadd.f32 %v6609_v37, %v2992_v21 }
 0x2bf   : > { %3149 = vmatmul.f32.gmra.mxu1 %v3055_v48 }
 0x2c0   : > { %3314 = vmatmul.f32.gmra.mxu2 %v3055_v48  ;;  %v2707_v48 = vadd.f32 %v2649_v53, %v6668_v14  ;;  %v6801_v39 = vpop.f32.mrf.mxu3  ;;  %v2708_v14 = vadd.f32 %v2652_v9, %v6677_v46 }
 0x2c2   : > { %v2993_v50 = vadd.f32 %v6694_v63, %v2707_v48  ;;  %v6814_v63 = vld [vmem:[%s7406_s6] ss:$0 sm:$0xff] }
 0x2c3   : > { %v2385_v34 = vpop.f32.mrf.mxu2 }
 0x2c4   : > { %v6764_v31 = vadd.f32 %v2385_v34, %v2177_v58  ;;  %v2142_v26 = vpop.f32.mrf.mxu1  ;;  %v3060_v34 = vmax.f32 %v3028_v23, 0.0  ;;  %v3029_v53 = vadd.f32 %v6609_v37, %v2993_v50 }
 0x2c5   : > { %v2178_v45 = vadd.f32 %v2142_v26, %v7427_v24  ;;  %v6809_v35 = vpop.f32.mrf.mxu0 }
 0x2c6   : > { %4304 = vmatmul.f32.gmra.mxu0 %v3056_v2  ;;  %v3061_v43 = vmax.f32 %v3029_v53, 0.0 }
 0x2c7   : > { %3152 = vmatmul.f32.gmra.mxu1 %v3056_v2 }
 0x2c8   : > { %3317 = vmatmul.f32.gmra.mxu2 %v3056_v2  ;;  %v6820_v46 = vpop.f32.mrf.mxu3 }
 0x2cb   : > { %v2388_v16 = vpop.f32.mrf.mxu2 }
 0x2cc   : > { %v6770_v1 = vadd.f32 %v2388_v16, %v2178_v45  ;;  %v2145_v33 = vpop.f32.mrf.mxu1  ;;  %v2994_v45 = vadd.f32 %v6707_v36, %v2708_v14 }
 0x2cd   : > { %v2179_v41 = vadd.f32 %v2145_v33, %v7428_v55  ;;  %v6830_v32 = vpop.f32.mrf.mxu0 }
 0x2ce   : > { %4307 = vmatmul.f32.gmra.mxu0 %v3057_v57  ;;  %v3030_v36 = vadd.f32 %v6609_v37, %v2994_v45 }
 0x2cf   : > { %3155 = vmatmul.f32.gmra.mxu1 %v3057_v57 }
 0x2d0   : > { %3320 = vmatmul.f32.gmra.mxu2 %v3057_v57  ;;  %v6843_v50 = vpop.f32.mrf.mxu3 }
 0x2d3   : > { %v2391_v10 = vpop.f32.mrf.mxu2 }
 0x2d4   : > { %v6778_v0 = vadd.f32 %v2391_v10, %v2179_v41  ;;  %v3111_v38 = vpop.f32.mrf.mxu1 }
 0x2d5   : > { %v3112_v6 = vadd.f32 %v6814_v63, %v3111_v38 }
 0x2d6   : > { %4310 = vmatmul.f32.gmra.mxu0 %v3058_v18 }
 0x2d7   : > { %3158 = vmatmul.f32.gmra.mxu1 %v3058_v18 }
 0x2d8   : > { %3323 = vmatmul.f32.gmra.mxu2 %v3058_v18 }
 0x2db   : > { %v3276_v15 = vpop.f32.mrf.mxu2 }
 0x2dc   : > { %v3277_v52 = vadd.f32 %v6786_v59, %v3276_v15  ;;  %v6795_v11 = vpop.f32.mrf.mxu1  ;;  %v3062_v15 = vmax.f32 %v3030_v36, 0.0  ;;  %v6859_v36 = vpop.f32.mrf.mxu0 }
 0x2dd   : > { %v3115_v23 = vadd.f32 %v6814_v63, %v6795_v11  ;;  %v2710_v11 = vadd.f32 %v6801_v39, %v6702_v3 }
 0x2de   : > { %v4841_v56 = vmul.f32 -1.442695, %v3277_v52  ;;  %4313 = vmatmul.f32.gmra.mxu0 %v3059_v60 }
 0x2df   : > { %3161 = vmatmul.f32.gmra.mxu1 %v3059_v60  ;;  %v2996_v3 = vadd.f32 %v6733_v40, %v2710_v11 }
 0x2e0   : > { %4932 = vpow2.f32 %v4841_v56  ;;  %3326 = vmatmul.f32.gmra.mxu2 %v3059_v60 }
 0x2e3   : > { %v3279_v13 = vpop.f32.mrf.mxu2 }
 0x2e4   : > { %v3280_v27 = vadd.f32 %v6786_v59, %v3279_v13  ;;  %v6805_v58 = vpop.f32.mrf.mxu1 }
 0x2e6   : > { %v4933_v28 = vpop.eup %4932  ;;  %v4842_v26 = vmul.f32 -1.442695, %v3280_v27  ;;  %4316 = vmatmul.f32.gmra.mxu0 %v3060_v34  ;;  %v3031_v27 = vadd.f32 %v6609_v37, %v2995_v29 }
 0x2e7   : > { %v3468_v2 = vadd.f32 1.0, %v4933_v28  ;;  %3164 = vmatmul.f32.gmra.mxu1 %v3060_v34 }
 0x2e8   : > { %4934 = vpow2.f32 %v4842_v26  ;;  %3329 = vmatmul.f32.gmra.mxu2 %v3060_v34 }
 0x2e9   : > { %4936 = vrcp.f32 %v3468_v2  ;;  %v3511_v18 = vand.u32 2147483648, %v3468_v2  ;;  %v3509_v38 = vand.u32 2147483647, %v3468_v2  ;;  %vm3505_vm4 = vweird.f32 %v3468_v2 }
 0x2eb   : > { %v3282_v17 = vpop.f32.mrf.mxu2  ;;  %v3512_v48 = vor.u32 1.1754944e-38, %v3511_v18  ;;  %vm3510_vm6 = vcmp.eq.f32.partialorder %v3509_v38, 8.507059e+37 }
 0x2ec   : > { %v3283_v24 = vadd.f32 %v6786_v59, %v3282_v17  ;;  %v6818_v16 = vpop.f32.mrf.mxu1 }
 0x2ed   : > { %v3121_v11 = vadd.f32 %v6814_v63, %v6818_v16 }
 0x2ee   : > { %v4935_v33 = vpop.eup %4934  ;;  %v4843_v57 = vmul.f32 -1.442695, %v3283_v24  ;;  %4319 = vmatmul.f32.gmra.mxu0 %v3061_v43 }
 0x2ef   : > { %v4937_v9 = vpop.eup %4936  ;;  %v6824_v55 = vadd.f32 1.0, %v4935_v33  ;;  %3167 = vmatmul.f32.gmra.mxu1 %v3061_v43 }
 0x2f0   : > { %v3501_v41 = vmul.f32 %v4937_v9, %v3468_v2  ;;  %4938 = vpow2.f32 %v4843_v57  ;;  %3332 = vmatmul.f32.gmra.mxu2 %v3061_v43  ;;  %vm3506_vm3 = vweird.f32 %v4937_v9  ;;  %v3063_v57 = vmax.f32 %v3031_v27, 0.0 }
 0x2f1   : > { %4940 = vrcp.f32 %v6824_v55  ;;  %vm6834_vm5 = vmor %vm3505_vm4, %vm3506_vm3  ;;  %v3526_v24 = vand.u32 2147483648, %v6824_v55  ;;  %v3524_v33 = vand.u32 2147483647, %v6824_v55  ;;  %vm3520_vm9 = vweird.f32 %v6824_v55 }
 0x2f2   : > { %v3502_v10 = vsub.f32 1.0, %v3501_v41  ;;  %4942 = vtanh.f32 %v3112_v6 }
 0x2f3   : > { %v3285_v44 = vpop.f32.mrf.mxu2  ;;  %v3527_v18 = vor.u32 1.1754944e-38, %v3526_v24  ;;  %vm3525_vm11 = vcmp.eq.f32.partialorder %v3524_v33, 8.507059e+37  ;;  %v6887_v24 = vpop.f32.mrf.mxu0 }
 0x2f4   : > { %v3503_v47 = vmul.f32 %v4937_v9, %v3502_v10  ;;  %v3286_v12 = vadd.f32 %v6786_v59, %v3285_v44  ;;  %v6832_v19 = vpop.f32.mrf.mxu1  ;;  %v3118_v10 = vadd.f32 %v6814_v63, %v6805_v58  ;;  %v3032_v58 = vadd.f32 %v6609_v37, %v2996_v3 }
 0x2f6   : > { %v4939_v52 = vpop.eup %4938  ;;  %v3504_v21 = vadd.f32 %v4937_v9, %v3503_v47  ;;  %v4844_v60 = vmul.f32 -1.442695, %v3286_v12  ;;  %4322 = vmatmul.f32.gmra.mxu0 %v3062_v15  ;;  %v6870_v12 = vpop.f32.mrf.mxu3 }
 0x2f7   : > { %v4941_v56 = vpop.eup %4940  ;;  %v6840_v13 = vadd.f32 1.0, %v4939_v52  ;;  %3170 = vmatmul.f32.gmra.mxu1 %v3062_v15 }
 0x2f8   : > { %v3508_v34 = vsel %vm6834_vm5, %v4937_v9, %v3504_v21  ;;  %v3516_v28 = vmul.f32 %v4941_v56, %v6824_v55  ;;  %4944 = vpow2.f32 %v4844_v60  ;;  %3335 = vmatmul.f32.gmra.mxu2 %v3062_v15  ;;  %v4943_v26 = vpop.eup %4942  ;;  %vm3521_vm8 = vweird.f32 %v4941_v56 }
 0x2f9   : > { %4946 = vrcp.f32 %v6840_v13  ;;  %v3513_v2 = vsel %vm3510_vm6, %v3512_v48, %v3508_v34  ;;  %vm3522_vm10 = vmor %vm3520_vm9, %vm3521_vm8  ;;  %v2711_v55 = vadd.f32 %v6820_v46, %v6711_v7  ;;  %v3541_v60 = vand.u32 2147483648, %v6840_v13 }
 0x2fa   : > { %v3517_v14 = vsub.f32 1.0, %v3516_v28  ;;  %v3980_v53 = vmul.f32 %v4943_v26, %v3513_v2  ;;  %4948 = vtanh.f32 %v3115_v23  ;;  %v3539_v7 = vand.u32 2147483647, %v6840_v13 }
 0x2fb   : > { %v3288_v17 = vpop.f32.mrf.mxu2  ;;  %v2997_v46 = vadd.f32 %v6742_v5, %v2711_v55  ;;  %v3064_v23 = vmax.f32 %v3032_v58, 0.0  ;;  %vm3535_vm13 = vweird.f32 %v6840_v13  ;;  %v3124_v55 = vadd.f32 %v6814_v63, %v6832_v19 }
 0x2fc   : > { %v3289_v45 = vadd.f32 %v6786_v59, %v3288_v17  ;;  %4873 = vmatmul.msk.f32.vlgmr.msrb.gmra.mxu3 %vm4036_vm7, %v3980_v53  ;;  %v3518_v43 = vmul.f32 %v4941_v56, %v3517_v14  ;;  %v6856_v39 = vpop.f32.mrf.mxu1  ;;  %v3542_v14 = vor.u32 1.1754944e-38, %v3541_v60  ;;  %vm3540_vm15 = vcmp.eq.f32.partialorder %v3539_v7, 8.507059e+37 }
 0x2fe   : > { %v4945_v9 = vpop.eup %4944  ;;  %v4845_v22 = vmul.f32 -1.442695, %v3289_v45  ;;  %v3519_v6 = vadd.f32 %v4941_v56, %v3518_v43  ;;  %4325 = vmatmul.f32.gmra.mxu0 %v3063_v57  ;;  %v3033_v45 = vadd.f32 %v6609_v37, %v2997_v46 }
 0x2ff   : > { %v4947_v41 = vpop.eup %4946  ;;  %v6863_v29 = vadd.f32 1.0, %v4945_v9  ;;  %3173 = vmatmul.f32.gmra.mxu1 %v3063_v57  ;;  %v2670_v9 = vpop.f32.mrf.mxu3 }
 0x300   : > { %v3531_v40 = vmul.f32 %v4947_v41, %v6840_v13  ;;  %4950 = vpow2.f32 %v4845_v22  ;;  %3338 = vmatmul.f32.gmra.mxu2 %v3063_v57  ;;  %v3523_v44 = vsel %vm3522_vm10, %v4941_v56, %v3519_v6  ;;  %v4949_v47 = vpop.eup %4948  ;;  %vm3536_vm12 = vweird.f32 %v4947_v41 }
 0x301   : > { %4952 = vrcp.f32 %v6863_v29  ;;  %v3528_v38 = vsel %vm3525_vm11, %v3527_v18, %v3523_v44  ;;  %vm3537_vm14 = vmor %vm3535_vm13, %vm3536_vm12  ;;  %v2712_v13 = vadd.f32 %v6843_v50, %v6720_v62  ;;  %v3556_v57 = vand.u32 2147483648, %v6863_v29 }
 0x302   : > { %v3532_v15 = vsub.f32 1.0, %v3531_v40  ;;  %v3981_v52 = vmul.f32 %v4949_v47, %v3528_v38  ;;  %4954 = vtanh.f32 %v3118_v10  ;;  %v3554_v62 = vand.u32 2147483647, %v6863_v29 }
 0x303   : > { %v3291_v21 = vpop.f32.mrf.mxu2  ;;  %v2998_v50 = vadd.f32 %v6752_v61, %v2712_v13  ;;  %v3065_v10 = vmax.f32 %v3033_v45, 0.0  ;;  %vm3550_vm1 = vweird.f32 %v6863_v29  ;;  %v3557_v58 = vor.u32 1.1754944e-38, %v3556_v57 }
 0x304   : > { %v3292_v56 = vadd.f32 %v6786_v59, %v3291_v21  ;;  %4874 = vmatmul.msk.f32.gmra.mxu3 %vm4036_vm7, %v3981_v52  ;;  %v3533_v51 = vmul.f32 %v4947_v41, %v3532_v15  ;;  %v6877_v48 = vpop.f32.mrf.mxu1  ;;  %vm3555_vm3 = vcmp.eq.f32.partialorder %v3554_v62, 8.507059e+37 }
 0x305   : > { %v3034_v19 = vadd.f32 %v6609_v37, %v2998_v50 }
 0x306   : > { %v4951_v27 = vpop.eup %4950  ;;  %v4846_v34 = vmul.f32 -1.442695, %v3292_v56  ;;  %v3534_v28 = vadd.f32 %v4947_v41, %v3533_v51  ;;  %4328 = vmatmul.f32.gmra.mxu0 %v3064_v23  ;;  %v6908_v51 = vpop.f32.mrf.mxu0 }
 0x307   : > { %v4953_v26 = vpop.eup %4952  ;;  %v6882_v2 = vadd.f32 1.0, %v4951_v27  ;;  %3176 = vmatmul.f32.gmra.mxu1 %v3064_v23 }
 0x308   : > { %v3546_v53 = vmul.f32 %v4953_v26, %v6863_v29  ;;  %4956 = vpow2.f32 %v4846_v34  ;;  %3341 = vmatmul.f32.gmra.mxu2 %v3064_v23  ;;  %v3538_v5 = vsel %vm3537_vm14, %v4947_v41, %v3534_v28  ;;  %v4955_v17 = vpop.eup %4954  ;;  %vm3551_vm0 = vweird.f32 %v4953_v26 }
 0x309   : > { %4958 = vrcp.f32 %v6882_v2  ;;  %v3543_v16 = vsel %vm3540_vm15, %v3542_v14, %v3538_v5  ;;  %vm3552_vm2 = vmor %vm3550_vm1, %vm3551_vm0  ;;  %v2713_v29 = vadd.f32 %v6870_v12, %v6730_v42  ;;  %v3571_v46 = vand.u32 2147483648, %v6882_v2 }
 0x30a   : > { %v3547_v43 = vsub.f32 1.0, %v3546_v53  ;;  %v3982_v33 = vmul.f32 %v4955_v17, %v3543_v16  ;;  %4960 = vtanh.f32 %v3121_v11  ;;  %v3569_v42 = vand.u32 2147483647, %v6882_v2  ;;  %v2673_v11 = vpop.f32.mrf.mxu3 }
 0x30b   : > { %v3294_v3 = vpop.f32.mrf.mxu2  ;;  %v2999_v12 = vadd.f32 %v6762_v4, %v2713_v29  ;;  %v3066_v28 = vmax.f32 %v3034_v19, 0.0  ;;  %vm3565_vm5 = vweird.f32 %v6882_v2  ;;  %v3127_v17 = vadd.f32 %v6814_v63, %v6856_v39 }
 0x30c   : > { %v3295_v22 = vadd.f32 %v6786_v59, %v3294_v3  ;;  %4875 = vmatmul.msk.f32.gmra.mxu3 %vm4036_vm7, %v3982_v33  ;;  %v3548_v6 = vmul.f32 %v4953_v26, %v3547_v43  ;;  %v6896_v41 = vpop.f32.mrf.mxu1  ;;  %v3572_v16 = vor.u32 1.1754944e-38, %v3571_v46  ;;  %vm3570_vm8 = vcmp.eq.f32.partialorder %v3569_v42, 8.507059e+37 }
 0x30d   : > { %v2714_v33 = vadd.f32 %v2670_v9, %v6739_v49  ;;  %v3035_v39 = vadd.f32 %v6609_v37, %v2999_v12 }
 0x30e   : > { %v4957_v18 = vpop.eup %4956  ;;  %v4847_v40 = vmul.f32 -1.442695, %v3295_v22  ;;  %v3549_v44 = vadd.f32 %v4953_v26, %v3548_v6  ;;  %4331 = vmatmul.f32.gmra.mxu0 %v3065_v10  ;;  %v6931_v9 = vpop.f32.mrf.mxu0 }
 0x30f   : > { %v4959_v47 = vpop.eup %4958  ;;  %v6901_v38 = vadd.f32 1.0, %v4957_v18  ;;  %3179 = vmatmul.f32.gmra.mxu1 %v3065_v10  ;;  %v3000_v49 = vadd.f32 %v6773_v30, %v2714_v33 }
 0x310   : > { %v3561_v15 = vmul.f32 %v4959_v47, %v6882_v2  ;;  %4962 = vpow2.f32 %v4847_v40  ;;  %3344 = vmatmul.f32.gmra.mxu2 %v3065_v10  ;;  %v3553_v61 = vsel %vm3552_vm2, %v4953_v26, %v3549_v44  ;;  %v4961_v52 = vpop.eup %4960  ;;  %vm3566_vm4 = vweird.f32 %v4959_v47 }
 0x311   : > { %4964 = vrcp.f32 %v6901_v38  ;;  %v3558_v21 = vsel %vm3555_vm3, %v3557_v58, %v3553_v61  ;;  %vm3567_vm6 = vmor %vm3565_vm5, %vm3566_vm4  ;;  %v3586_v6 = vand.u32 2147483648, %v6901_v38  ;;  %v3584_v10 = vand.u32 2147483647, %v6901_v38 }
 0x312   : > { %v3562_v60 = vsub.f32 1.0, %v3561_v15  ;;  %v3983_v56 = vmul.f32 %v4961_v52, %v3558_v21  ;;  %4966 = vtanh.f32 %v3124_v55  ;;  %v3067_v40 = vmax.f32 %v3035_v39, 0.0  ;;  %v2676_v30 = vpop.f32.mrf.mxu3 }
 0x313   : > { %v3297_v7 = vpop.f32.mrf.mxu2  ;;  %vm3580_vm10 = vweird.f32 %v6901_v38  ;;  %v3130_v15 = vadd.f32 %v6814_v63, %v6877_v48  ;;  %v3587_v52 = vor.u32 1.1754944e-38, %v3586_v6  ;;  %vm3585_vm12 = vcmp.eq.f32.partialorder %v3584_v10, 8.507059e+37 }
 0x314   : > { %v3298_v23 = vadd.f32 %v6786_v59, %v3297_v7  ;;  %4876 = vmatmul.msk.f32.gmra.mxu3 %vm4036_vm7, %v3983_v56  ;;  %v3563_v27 = vmul.f32 %v4959_v47, %v3562_v60  ;;  %v6915_v34 = vpop.f32.mrf.mxu1  ;;  %v3036_v48 = vadd.f32 %v6609_v37, %v3000_v49 }
 0x316   : > { %v4963_v26 = vpop.eup %4962  ;;  %v4848_v14 = vmul.f32 -1.442695, %v3298_v23  ;;  %v3564_v53 = vadd.f32 %v4959_v47, %v3563_v27  ;;  %4334 = vmatmul.f32.gmra.mxu0 %v3066_v28 }
 0x317   : > { %v4965_v5 = vpop.eup %4964  ;;  %v6920_v13 = vadd.f32 1.0, %v4963_v26  ;;  %3182 = vmatmul.f32.gmra.mxu1 %v3066_v28  ;;  %v3068_v26 = vmax.f32 %v3036_v48, 0.0 }
 0x318   : > { %v3576_v4 = vmul.f32 %v4965_v5, %v6901_v38  ;;  %4968 = vpow2.f32 %v4848_v14  ;;  %3347 = vmatmul.f32.gmra.mxu2 %v3066_v28  ;;  %v3568_v45 = vsel %vm3567_vm6, %v4959_v47, %v3564_v53  ;;  %v4967_v43 = vpop.eup %4966  ;;  %vm3581_vm9 = vweird.f32 %v4965_v5 }
 0x319   : > { %4970 = vrcp.f32 %v6920_v13  ;;  %v3573_v2 = vsel %vm3570_vm8, %v3572_v16, %v3568_v45  ;;  %vm3582_vm11 = vmor %vm3580_vm10, %vm3581_vm9  ;;  %v2715_v38 = vadd.f32 %v2673_v11, %v6748_v25  ;;  %v3601_v23 = vand.u32 2147483648, %v6920_v13 }
 0x31a   : > { %v3577_v3 = vsub.f32 1.0, %v3576_v4  ;;  %v3984_v57 = vmul.f32 %v4967_v43, %v3573_v2  ;;  %4972 = vtanh.f32 %v3127_v17  ;;  %v3599_v12 = vand.u32 2147483647, %v6920_v13  ;;  %v2679_v39 = vpop.f32.mrf.mxu3 }
 0x31b   : > { %v3300_v22 = vpop.f32.mrf.mxu2  ;;  %v3001_v25 = vadd.f32 %v6781_v8, %v2715_v38  ;;  %vm3595_vm14 = vweird.f32 %v6920_v13  ;;  %v3133_v17 = vadd.f32 %v6814_v63, %v6896_v41  ;;  %v3602_v4 = vor.u32 1.1754944e-38, %v3601_v23  ;;  %v6964_v41 = vld [vmem:[%s7404_s4] ss:$0 sm:$0xff] }
 0x31c   : > { %v3301_v62 = vadd.f32 %v6786_v59, %v3300_v22  ;;  %4877 = vmatmul.msk.f32.gmra.mxu3 %vm4036_vm7, %v3984_v57  ;;  %v3578_v50 = vmul.f32 %v4965_v5, %v3577_v3  ;;  %v6933_v18 = vpop.f32.mrf.mxu1  ;;  %vm3600_vm0 = vcmp.eq.f32.partialorder %v3599_v12, 8.507059e+37 }
 0x31d   : > { %v3037_v2 = vadd.f32 %v6964_v41, %v3001_v25 }
 0x31e   : > { %v4969_v44 = vpop.eup %4968  ;;  %v4849_v47 = vmul.f32 -1.442695, %v3301_v62  ;;  %v3579_v55 = vadd.f32 %v4965_v5, %v3578_v50  ;;  %4337 = vmatmul.f32.gmra.mxu0 %v3067_v40 }
 0x31f   : > { %v4971_v58 = vpop.eup %4970  ;;  %v6938_v61 = vadd.f32 1.0, %v4969_v44  ;;  %3185 = vmatmul.f32.gmra.mxu1 %v3067_v40 }
 0x320   : > { %v3591_v29 = vmul.f32 %v4971_v58, %v6920_v13  ;;  %4974 = vpow2.f32 %v4849_v47  ;;  %3350 = vmatmul.f32.gmra.mxu2 %v3067_v40  ;;  %v3583_v21 = vsel %vm3582_vm11, %v4965_v5, %v3579_v55  ;;  %v4973_v19 = vpop.eup %4972  ;;  %vm3596_vm13 = vweird.f32 %v4971_v58  ;;  %v6952_v5 = vpop.f32.mrf.mxu0 }
 0x321   : > { %4976 = vrcp.f32 %v6938_v61  ;;  %v3588_v60 = vsel %vm3585_vm12, %v3587_v52, %v3583_v21  ;;  %vm3597_vm15 = vmor %vm3595_vm14, %vm3596_vm13  ;;  %v2716_v13 = vadd.f32 %v2676_v30, %v6756_v20  ;;  %v3616_v6 = vand.u32 2147483648, %v6938_v61 }
 0x322   : > { %v3592_v56 = vsub.f32 1.0, %v3591_v29  ;;  %v3985_v7 = vmul.f32 %v4973_v19, %v3588_v60  ;;  %4978 = vtanh.f32 %v3130_v15  ;;  %v3614_v50 = vand.u32 2147483647, %v6938_v61 }
 0x323   : > { %v3303_v46 = vpop.f32.mrf.mxu2  ;;  %v3002_v10 = vadd.f32 %v6798_v54, %v2716_v13  ;;  %v3069_v40 = vmax.f32 %v3037_v2, 0.0  ;;  %vm3610_vm2 = vweird.f32 %v6938_v61  ;;  %v3136_v15 = vadd.f32 %v6814_v63, %v6915_v34 }
 0x324   : > { %v3304_v27 = vadd.f32 %v6786_v59, %v3303_v46  ;;  %4878 = vmatmul.msk.f32.gmra.mxu3 %vm4036_vm7, %v3985_v7  ;;  %v3593_v42 = vmul.f32 %v4971_v58, %v3592_v56  ;;  %v6949_v28 = vpop.f32.mrf.mxu1  ;;  %v3617_v30 = vor.u32 1.1754944e-38, %v3616_v6  ;;  %vm3615_vm4 = vcmp.eq.f32.partialorder %v3614_v50, 8.507059e+37  ;;  %v2682_v46 = vpop.f32.mrf.mxu3 }
 0x325   : > { %v2717_v19 = vadd.f32 %v2679_v39, %v6764_v31  ;;  %v3038_v38 = vadd.f32 %v6964_v41, %v3002_v10 }
 0x326   : > { %v4975_v37 = vpop.eup %4974  ;;  %v4850_v11 = vmul.f32 -1.442695, %v3304_v27  ;;  %v3594_v14 = vadd.f32 %v4971_v58, %v3593_v42  ;;  %4340 = vmatmul.f32.gmra.mxu0 %v3068_v26 }
 0x327   : > { %v4977_v53 = vpop.eup %4976  ;;  %v6956_v16 = vadd.f32 1.0, %v4975_v37  ;;  %3188 = vmatmul.f32.gmra.mxu1 %v3068_v26  ;;  %v3003_v42 = vadd.f32 %v6809_v35, %v2717_v19  ;;  %v3070_v25 = vmax.f32 %v3038_v38, 0.0 }
 0x328   : > { %v3606_v8 = vmul.f32 %v4977_v53, %v6938_v61  ;;  %4980 = vpow2.f32 %v4850_v11  ;;  %3353 = vmatmul.f32.gmra.mxu2 %v3068_v26  ;;  %v3598_v45 = vsel %vm3597_vm15, %v4971_v58, %v3594_v14  ;;  %v4979_v43 = vpop.eup %4978  ;;  %vm3611_vm1 = vweird.f32 %v4977_v53  ;;  %v6981_v61 = vpop.f32.mrf.mxu0 }
 0x329   : > { %4982 = vrcp.f32 %v6956_v16  ;;  %v3603_v33 = vsel %vm3600_vm0, %v3602_v4, %v3598_v45  ;;  %vm3612_vm3 = vmor %vm3610_vm2, %vm3611_vm1  ;;  %v3631_v7 = vand.u32 2147483648, %v6956_v16  ;;  %v3629_v31 = vand.u32 2147483647, %v6956_v16 }
 0x32a   : > { %v3607_v3 = vsub.f32 1.0, %v3606_v8  ;;  %v3986_v57 = vmul.f32 %v4979_v43, %v3603_v33  ;;  %4984 = vtanh.f32 %v3133_v17  ;;  %vm3625_vm6 = vweird.f32 %v6956_v16 }
 0x32b   : > { %v3306_v22 = vpop.f32.mrf.mxu2  ;;  %v3632_v4 = vor.u32 1.1754944e-38, %v3631_v7  ;;  %vm3630_vm9 = vcmp.eq.f32.partialorder %v3629_v31, 8.507059e+37  ;;  %v2718_v43 = vadd.f32 %v2682_v46, %v6770_v1 }
 0x32c   : > { %v3307_v62 = vadd.f32 %v6786_v59, %v3306_v22  ;;  %4879 = vmatmul.msk.f32.gmra.mxu3 %vm4036_vm7, %v3986_v57  ;;  %v3608_v20 = vmul.f32 %v4977_v53, %v3607_v3  ;;  %v6972_v49 = vpop.f32.mrf.mxu1  ;;  %v2685_v10 = vpop.f32.mrf.mxu3 }
 0x32d   : > { %v3004_v6 = vadd.f32 %v6830_v32, %v2718_v43 }
 0x32e   : > { %v4981_v44 = vpop.eup %4980  ;;  %v4851_v47 = vmul.f32 -1.442695, %v3307_v62  ;;  %v3609_v55 = vadd.f32 %v4977_v53, %v3608_v20  ;;  %4343 = vmatmul.f32.gmra.mxu0 %v3069_v40 }
 0x32f   : > { %v4983_v58 = vpop.eup %4982  ;;  %v6977_v52 = vadd.f32 1.0, %v4981_v44  ;;  %3191 = vmatmul.f32.gmra.mxu1 %v3069_v40 }
 0x330   : > { %v3621_v29 = vmul.f32 %v4983_v58, %v6956_v16  ;;  %4986 = vpow2.f32 %v4851_v47  ;;  %3356 = vmatmul.f32.gmra.mxu2 %v3069_v40  ;;  %v3613_v54 = vsel %vm3612_vm3, %v4977_v53, %v3609_v55  ;;  %v4985_v21 = vpop.eup %4984  ;;  %vm3626_vm5 = vweird.f32 %v4983_v58  ;;  %v7001_v2 = vpop.f32.mrf.mxu0 }
 0x331   : > { %4988 = vrcp.f32 %v6977_v52  ;;  %v3618_v34 = vsel %vm3615_vm4, %v3617_v30, %v3613_v54  ;;  %v3139_v53 = vadd.f32 %v6814_v63, %v6933_v18  ;;  %vm3627_vm8 = vmor %vm3625_vm6, %vm3626_vm5  ;;  %v3039_v18 = vadd.f32 %v6964_v41, %v3003_v42 }
 0x332   : > { %v3622_v60 = vsub.f32 1.0, %v3621_v29  ;;  %v3987_v48 = vmul.f32 %v4985_v21, %v3618_v34  ;;  %4990 = vtanh.f32 %v3136_v15  ;;  %v3646_v3 = vand.u32 2147483648, %v6977_v52 }
 0x333   : > { %v3309_v56 = vpop.f32.mrf.mxu2  ;;  %v3644_v1 = vand.u32 2147483647, %v6977_v52  ;;  %v3071_v20 = vmax.f32 %v3039_v18, 0.0  ;;  %vm3640_vm11 = vweird.f32 %v6977_v52  ;;  %v3142_v55 = vadd.f32 %v6814_v63, %v6949_v28 }
 0x334   : > { %v3310_v23 = vadd.f32 %v6786_v59, %v3309_v56  ;;  %4880 = vmatmul.msk.f32.gmra.mxu3 %vm4036_vm7, %v3987_v48  ;;  %v3623_v27 = vmul.f32 %v4983_v58, %v3622_v60  ;;  %v6990_v12 = vpop.f32.mrf.mxu1  ;;  %v3647_v15 = vor.u32 1.1754944e-38, %v3646_v3  ;;  %v2719_v54 = vadd.f32 %v2685_v10, %v6778_v0 }
 0x335   : > { %vm3645_vm13 = vcmp.eq.f32.partialorder %v3644_v1, 8.507059e+37  ;;  %v3040_v28 = vadd.f32 %v6964_v41, %v3004_v6  ;;  %v3148_v1 = vadd.f32 %v6814_v63, %v6990_v12 }
 0x336   : > { %v4987_v26 = vpop.eup %4986  ;;  %v4852_v37 = vmul.f32 -1.442695, %v3310_v23  ;;  %v3624_v11 = vadd.f32 %v4983_v58, %v3623_v27  ;;  %4346 = vmatmul.f32.gmra.mxu0 %v3070_v25  ;;  %v3005_v0 = vadd.f32 %v6859_v36, %v2719_v54 }
 0x337   : > { %v4989_v14 = vpop.eup %4988  ;;  %v6995_v17 = vadd.f32 1.0, %v4987_v26  ;;  %3194 = vmatmul.f32.gmra.mxu1 %v3070_v25  ;;  %v3072_v23 = vmax.f32 %v3040_v28, 0.0  ;;  %v3145_v26 = vadd.f32 %v6814_v63, %v6972_v49 }
 0x338   : > { %v3636_v8 = vmul.f32 %v4989_v14, %v6977_v52  ;;  %4992 = vpow2.f32 %v4852_v37  ;;  %3359 = vmatmul.f32.gmra.mxu2 %v3070_v25  ;;  %v3628_v35 = vsel %vm3627_vm8, %v4983_v58, %v3624_v11  ;;  %v4991_v45 = vpop.eup %4990  ;;  %vm3641_vm10 = vweird.f32 %v4989_v14  ;;  %v7024_v7 = vpop.f32.mrf.mxu0 }
 0x339   : > { %4994 = vrcp.f32 %v6995_v17  ;;  %v3633_v16 = vsel %vm3630_vm9, %v3632_v4, %v3628_v35  ;;  %vm3642_vm12 = vmor %vm3640_vm11, %vm3641_vm10  ;;  %v3661_v38 = vand.u32 2147483648, %v6995_v17  ;;  %v3659_v56 = vand.u32 2147483647, %v6995_v17 }
 0x33a   : > { %v3637_v13 = vsub.f32 1.0, %v3636_v8  ;;  %v3988_v33 = vmul.f32 %v4991_v45, %v3633_v16  ;;  %4996 = vtanh.f32 %v3139_v53  ;;  %vm3655_vm15 = vweird.f32 %v6995_v17 }
 0x33b   : > { %v3312_v39 = vpop.f32.mrf.mxu2  ;;  %v3662_v11 = vor.u32 1.1754944e-38, %v3661_v38  ;;  %vm3660_vm1 = vcmp.eq.f32.partialorder %v3659_v56, 8.507059e+37  ;;  %v3041_v4 = vadd.f32 %v6964_v41, %v3005_v0 }
 0x33c   : > { %v3313_v57 = vadd.f32 %v6786_v59, %v3312_v39  ;;  %4881 = vmatmul.msk.f32.gmra.mxu3 %vm4036_vm7, %v3988_v33  ;;  %v3638_v22 = vmul.f32 %v4989_v14, %v3637_v13  ;;  %v7008_v62 = vpop.f32.mrf.mxu1 }
 0x33d   : > { %v3073_v33 = vmax.f32 %v3041_v4, 0.0 }
 0x33e   : > { %v4993_v50 = vpop.eup %4992  ;;  %v4853_v40 = vmul.f32 -1.442695, %v3313_v57  ;;  %v3639_v44 = vadd.f32 %v4989_v14, %v3638_v22  ;;  %4349 = vmatmul.f32.gmra.mxu0 %v3071_v20 }
 0x33f   : > { %v4995_v47 = vpop.eup %4994  ;;  %v7013_v58 = vadd.f32 1.0, %v4993_v50  ;;  %3197 = vmatmul.f32.gmra.mxu1 %v3071_v20 }
 0x340   : > { %v3651_v32 = vmul.f32 %v4995_v47, %v6995_v17  ;;  %4998 = vpow2.f32 %v4853_v40  ;;  %3362 = vmatmul.f32.gmra.mxu2 %v3071_v20  ;;  %v3643_v30 = vsel %vm3642_vm12, %v4989_v14, %v3639_v44  ;;  %v4997_v29 = vpop.eup %4996  ;;  %vm3656_vm14 = vweird.f32 %v4995_v47  ;;  %v7043_v22 = vpop.f32.mrf.mxu0 }
 0x341   : > { %5000 = vrcp.f32 %v7013_v58  ;;  %v3648_v52 = vsel %vm3645_vm13, %v3647_v15, %v3643_v30  ;;  %vm3657_vm0 = vmor %vm3655_vm15, %vm3656_vm14  ;;  %v3676_v45 = vand.u32 2147483648, %v7013_v58  ;;  %v3674_v18 = vand.u32 2147483647, %v7013_v58 }
 0x342   : > { %v3652_v21 = vsub.f32 1.0, %v3651_v32  ;;  %v3989_v19 = vmul.f32 %v4997_v29, %v3648_v52  ;;  %5002 = vtanh.f32 %v3142_v55  ;;  %vm3670_vm3 = vweird.f32 %v7013_v58 }
 0x343   : > { %v3315_v34 = vpop.f32.mrf.mxu2  ;;  %v3677_v20 = vor.u32 1.1754944e-38, %v3676_v45  ;;  %vm3675_vm5 = vcmp.eq.f32.partialorder %v3674_v18, 8.507059e+37 }
 0x344   : > { %v3316_v60 = vadd.f32 %v6786_v59, %v3315_v34  ;;  %4882 = vmatmul.msk.f32.gmra.mxu3 %vm4036_vm7, %v3989_v19  ;;  %v3653_v48 = vmul.f32 %v4995_v47, %v3652_v21  ;;  %v7026_v46 = vpop.f32.mrf.mxu1  ;;  %v3151_v19 = vadd.f32 %v6814_v63, %v7008_v62 }
 0x346   : > { %v4999_v27 = vpop.eup %4998  ;;  %v4854_v31 = vmul.f32 -1.442695, %v3316_v60  ;;  %v3654_v42 = vadd.f32 %v4995_v47, %v3653_v48  ;;  %4352 = vmatmul.f32.gmra.mxu0 %v3072_v23 }
 0x347   : > { %v5001_v25 = vpop.eup %5000  ;;  %v7031_v37 = vadd.f32 1.0, %v4999_v27  ;;  %3200 = vmatmul.f32.gmra.mxu1 %v3072_v23 }
 0x348   : > { %v3666_v36 = vmul.f32 %v5001_v25, %v7013_v58  ;;  %5004 = vpow2.f32 %v4854_v31  ;;  %3365 = vmatmul.f32.gmra.mxu2 %v3072_v23  ;;  %v3658_v14 = vsel %vm3657_vm0, %v4995_v47, %v3654_v42  ;;  %v5003_v53 = vpop.eup %5002  ;;  %vm3671_vm2 = vweird.f32 %v5001_v25 }
 0x349   : > { %5006 = vrcp.f32 %v7031_v37  ;;  %v3663_v17 = vsel %vm3660_vm1, %v3662_v11, %v3658_v14  ;;  %vm3672_vm4 = vmor %vm3670_vm3, %vm3671_vm2  ;;  %v3691_v58 = vand.u32 2147483648, %v7031_v37  ;;  %v3689_v30 = vand.u32 2147483647, %v7031_v37 }
 0x34a   : > { %v3667_v8 = vsub.f32 1.0, %v3666_v36  ;;  %v3990_v49 = vmul.f32 %v5003_v53, %v3663_v17  ;;  %5008 = vtanh.f32 %v3145_v26  ;;  %vm3685_vm8 = vweird.f32 %v7031_v37 }
 0x34b   : > { %v3318_v35 = vpop.f32.mrf.mxu2  ;;  %v3692_v38 = vor.u32 1.1754944e-38, %v3691_v58  ;;  %vm3690_vm10 = vcmp.eq.f32.partialorder %v3689_v30, 8.507059e+37  ;;  %v3154_v17 = vadd.f32 %v6814_v63, %v7026_v46  ;;  %v7076_v46 = vld [vmem:[%s7408_s8] ss:$0 sm:$0xff] }
 0x34c   : > { %v3319_v43 = vadd.f32 %v6786_v59, %v3318_v35  ;;  %4883 = vmatmul.msk.f32.gmra.mxu3 %vm4036_vm7, %v3990_v49  ;;  %v3668_v16 = vmul.f32 %v5001_v25, %v3667_v8  ;;  %v7040_v13 = vpop.f32.mrf.mxu1 }
 0x34e   : > { %v5005_v39 = vpop.eup %5004  ;;  %v4855_v3 = vmul.f32 -1.442695, %v3319_v43  ;;  %v3669_v41 = vadd.f32 %v5001_v25, %v3668_v16  ;;  %4355 = vmatmul.f32.gmra.mxu0 %v3073_v33 }
 0x34f   : > { %v5007_v57 = vpop.eup %5006  ;;  %v7047_v6 = vadd.f32 1.0, %v5005_v39  ;;  %3203 = vmatmul.f32.gmra.mxu1 %v3073_v33 }
 0x350   : > { %v3681_v50 = vmul.f32 %v5007_v57, %v7031_v37  ;;  %5010 = vpow2.f32 %v4855_v3  ;;  %3368 = vmatmul.f32.gmra.mxu2 %v3073_v33  ;;  %v3673_v10 = vsel %vm3672_vm4, %v5001_v25, %v3669_v41  ;;  %v5009_v40 = vpop.eup %5008  ;;  %vm3686_vm6 = vweird.f32 %v5007_v57 }
 0x351   : > { %5012 = vrcp.f32 %v7047_v6  ;;  %v3678_v44 = vsel %vm3675_vm5, %v3677_v20, %v3673_v10  ;;  %vm3687_vm9 = vmor %vm3685_vm8, %vm3686_vm6  ;;  %v3706_v42 = vand.u32 2147483648, %v7047_v6  ;;  %v3704_v26 = vand.u32 2147483647, %v7047_v6 }
 0x352   : > { %v3682_v47 = vsub.f32 1.0, %v3681_v50  ;;  %v3991_v55 = vmul.f32 %v5009_v40, %v3678_v44  ;;  %5014 = vtanh.f32 %v3148_v1  ;;  %vm3700_vm12 = vweird.f32 %v7047_v6 }
 0x353   : > { %v3321_v12 = vpop.f32.mrf.mxu2  ;;  %vm3705_vm14 = vcmp.eq.f32.partialorder %v3704_v26, 8.507059e+37  ;;  %v3157_v10 = vadd.f32 %v6814_v63, %v7040_v13 }
 0x354   : > { %v3322_v15 = vadd.f32 %v6786_v59, %v3321_v12  ;;  %4884 = vmatmul.msk.f32.gmra.mxu3 %vm4036_vm7, %v3991_v55  ;;  %v3683_v32 = vmul.f32 %v5007_v57, %v3682_v47  ;;  %v7055_v29 = vpop.f32.mrf.mxu1 }
 0x356   : > { %v5011_v54 = vpop.eup %5010  ;;  %v4856_v52 = vmul.f32 -1.442695, %v3322_v15  ;;  %v3684_v28 = vadd.f32 %v5007_v57, %v3683_v32 }
 0x357   : > { %v5013_v21 = vpop.eup %5012  ;;  %v3482_v34 = vadd.f32 1.0, %v5011_v54 }
 0x358   : > { %v3696_v60 = vmul.f32 %v5013_v21, %v7047_v6  ;;  %5016 = vpow2.f32 %v4856_v52  ;;  %v3688_v48 = vsel %vm3687_vm9, %v5007_v57, %v3684_v28  ;;  %v5015_v56 = vpop.eup %5014  ;;  %vm3701_vm11 = vweird.f32 %v5013_v21 }
 0x359   : > { %5018 = vrcp.f32 %v3482_v34  ;;  %v3693_v0 = vsel %vm3690_vm10, %v3692_v38, %v3688_v48  ;;  %vm3702_vm13 = vmor %vm3700_vm12, %vm3701_vm11  ;;  %v3721_v33 = vand.u32 2147483648, %v3482_v34  ;;  %v3719_v41 = vand.u32 2147483647, %v3482_v34 }
 0x35a   : > { %v3697_v23 = vsub.f32 1.0, %v3696_v60  ;;  %v3992_v27 = vmul.f32 %v5015_v56, %v3693_v0  ;;  %5020 = vtanh.f32 %v3151_v19  ;;  %vm3715_vm0 = vweird.f32 %v3482_v34  ;;  %v7098_v60 = vld [vmem:[%s7406_s6] ss:$0 sm:$0xff] }
 0x35b   : > { %v3324_v31 = vpop.f32.mrf.mxu2  ;;  %v3722_v44 = vor.u32 1.1754944e-38, %v3721_v33  ;;  %vm3720_vm2 = vcmp.eq.f32.partialorder %v3719_v41, 8.507059e+37  ;;  %v3160_v48 = vadd.f32 %v7098_v60, %v7055_v29 }
 0x35c   : > { %v3325_v25 = vadd.f32 %v6786_v59, %v3324_v31  ;;  %4885 = vmatmul.msk.f32.gmra.mxu3 %vm4036_vm7, %v3992_v27  ;;  %v3698_v62 = vmul.f32 %v5013_v21, %v3697_v23  ;;  %v7065_v37 = vpop.f32.mrf.mxu1  ;;  %v3707_v59 = vor.u32 1.1754944e-38, %v3706_v42 }
 0x35e   : > { %v5017_v11 = vpop.eup %5016  ;;  %v4857_v36 = vmul.f32 -1.442695, %v3325_v25  ;;  %v3699_v14 = vadd.f32 %v5013_v21, %v3698_v62 }
 0x35f   : > { %v5019_v53 = vpop.eup %5018  ;;  %v7070_v4 = vadd.f32 1.0, %v5017_v11 }
 0x360   : > { %v3711_v8 = vmul.f32 %v5019_v53, %v3482_v34  ;;  %5022 = vpow2.f32 %v4857_v36  ;;  %v3703_v49 = vsel %vm3702_vm13, %v5013_v21, %v3699_v14  ;;  %v5021_v35 = vpop.eup %5020  ;;  %vm3716_vm15 = vweird.f32 %v5019_v53 }
 0x361   : > { %5024 = vrcp.f32 %v7070_v4  ;;  %v3708_v45 = vsel %vm3705_vm14, %v3707_v59, %v3703_v49  ;;  %vm3717_vm1 = vmor %vm3715_vm0, %vm3716_vm15  ;;  %v3736_v54 = vand.u32 2147483648, %v7070_v4  ;;  %v3734_v52 = vand.u32 2147483647, %v7070_v4 }
 0x362   : > { %v3712_v43 = vsub.f32 1.0, %v3711_v8  ;;  %v3993_v16 = vmul.f32 %v5021_v35, %v3708_v45  ;;  %5026 = vtanh.f32 %v3154_v17  ;;  %vm3730_vm4 = vweird.f32 %v7070_v4 }
 0x363   : > { %v3327_v18 = vpop.f32.mrf.mxu2  ;;  %v3737_v0 = vor.u32 1.1754944e-38, %v3736_v54  ;;  %vm3735_vm6 = vcmp.eq.f32.partialorder %v3734_v52, 8.507059e+37  ;;  %v3163_v49 = vadd.f32 %v7098_v60, %v7065_v37  ;;  %vm4395_vm0 = vcmask 31744  }
 0x364   : > { %v3328_v39 = vadd.f32 %v7076_v46, %v3327_v18  ;;  %4886 = vmatmul.msk.f32.gmra.mxu3 %vm4036_vm7, %v3993_v16  ;;  %v3713_v3 = vmul.f32 %v5019_v53, %v3712_v43  ;;  %v7080_v57 = vpop.f32.mrf.mxu1 }
 0x366   : > { %v5023_v1 = vpop.eup %5022  ;;  %v4858_v6 = vmul.f32 -1.442695, %v3328_v39  ;;  %v3714_v20 = vadd.f32 %v5019_v53, %v3713_v3 }
 0x367   : > { %v5025_v50 = vpop.eup %5024  ;;  %v7084_v40 = vadd.f32 1.0, %v5023_v1 }
 0x368   : > { %v3726_v47 = vmul.f32 %v5025_v50, %v7070_v4  ;;  %5028 = vpow2.f32 %v4858_v6  ;;  %v3718_v55 = vsel %vm3717_vm1, %v5019_v53, %v3714_v20  ;;  %v5027_v12 = vpop.eup %5026  ;;  %vm3731_vm3 = vweird.f32 %v5025_v50 }
 0x369   : > { %5030 = vrcp.f32 %v7084_v40  ;;  %v3723_v58 = vsel %vm3720_vm2, %v3722_v44, %v3718_v55  ;;  %vm3732_vm5 = vmor %vm3730_vm4, %vm3731_vm3  ;;  %v3751_v11 = vand.u32 2147483648, %v7084_v40  ;;  %v3749_v14 = vand.u32 2147483647, %v7084_v40 }
 0x36a   : > { %v3727_v15 = vsub.f32 1.0, %v3726_v47  ;;  %v3994_v32 = vmul.f32 %v5027_v12, %v3723_v58  ;;  %5032 = vtanh.f32 %v3157_v10  ;;  %vm3745_vm9 = vweird.f32 %v7084_v40 }
 0x36b   : > { %v3330_v30 = vpop.f32.mrf.mxu2  ;;  %v3752_v45 = vor.u32 1.1754944e-38, %v3751_v11  ;;  %vm3750_vm11 = vcmp.eq.f32.partialorder %v3749_v14, 8.507059e+37  ;;  %v3166_v55 = vadd.f32 %v7098_v60, %v7080_v57 }
 0x36c   : > { %v3331_v63 = vadd.f32 %v7076_v46, %v3330_v30  ;;  %4887 = vmatmul.msk.f32.gmra.mxu3 %vm4036_vm7, %v3994_v32  ;;  %v3728_v13 = vmul.f32 %v5025_v50, %v3727_v15  ;;  %v7092_v28 = vpop.f32.mrf.mxu1 }
 0x36e   : > { %v5029_v21 = vpop.eup %5028  ;;  %v4859_v19 = vmul.f32 -1.442695, %v3331_v63  ;;  %v3729_v34 = vadd.f32 %v5025_v50, %v3728_v13 }
 0x36f   : > { %v5031_v38 = vpop.eup %5030  ;;  %v3485_v56 = vadd.f32 1.0, %v5029_v21 }
 0x370   : > { %v3741_v23 = vmul.f32 %v5031_v38, %v7084_v40  ;;  %5034 = vpow2.f32 %v4859_v19  ;;  %v3733_v27 = vsel %vm3732_vm5, %v5025_v50, %v3729_v34  ;;  %v5033_v31 = vpop.eup %5032  ;;  %vm3746_vm8 = vweird.f32 %v5031_v38  ;;  %v7126_v40 = vld [vmem:[%s7411_s11] ss:$0 sm:$0xff] }
 0x371   : > { %5036 = vrcp.f32 %v3485_v56  ;;  %v3738_v42 = vsel %vm3735_vm6, %v3737_v0, %v3733_v27  ;;  %vm3747_vm10 = vmor %vm3745_vm9, %vm3746_vm8  ;;  %v3764_v41 = vand.u32 2147483647, %v3485_v56  ;;  %v3766_v1 = vand.u32 2147483648, %v3485_v56 }
 0x372   : > { %v3742_v25 = vsub.f32 1.0, %v3741_v23  ;;  %v3995_v62 = vmul.f32 %v5033_v31, %v3738_v42  ;;  %5038 = vtanh.f32 %v3160_v48  ;;  %vm3760_vm13 = vweird.f32 %v3485_v56 }
 0x373   : > { %v3333_v26 = vpop.f32.mrf.mxu2  ;;  %vm3765_vm15 = vcmp.eq.f32.partialorder %v3764_v41, 8.507059e+37  ;;  %v3767_v15 = vor.u32 1.1754944e-38, %v3766_v1  ;;  %v3169_v42 = vadd.f32 %v7098_v60, %v7092_v28 }
 0x374   : > { %v3334_v29 = vadd.f32 %v7076_v46, %v3333_v26  ;;  %4888 = vmatmul.msk.f32.gmra.mxu3 %vm4036_vm7, %v3995_v62  ;;  %v3743_v36 = vmul.f32 %v5031_v38, %v3742_v25  ;;  %v7109_v4 = vpop.f32.mrf.mxu1 }
 0x376   : > { %v5035_v53 = vpop.eup %5034  ;;  %v4860_v17 = vmul.f32 -1.442695, %v3334_v29  ;;  %v3744_v59 = vadd.f32 %v5031_v38, %v3743_v36 }
 0x377   : > { %v5037_v8 = vpop.eup %5036  ;;  %v7114_v35 = vadd.f32 1.0, %v5035_v53 }
 0x378   : > { %v3756_v43 = vmul.f32 %v5037_v8, %v3485_v56  ;;  %5040 = vpow2.f32 %v4860_v17  ;;  %v3748_v16 = vsel %vm3747_vm10, %v5031_v38, %v3744_v59  ;;  %v5039_v18 = vpop.eup %5038  ;;  %vm3761_vm12 = vweird.f32 %v5037_v8 }
 0x379   : > { %5042 = vrcp.f32 %v7114_v35  ;;  %v3753_v33 = vsel %vm3750_vm11, %v3752_v45, %v3748_v16  ;;  %vm3762_vm14 = vmor %vm3760_vm13, %vm3761_vm12  ;;  %v3781_v38 = vand.u32 2147483648, %v7114_v35  ;;  %vm3775_vm2 = vweird.f32 %v7114_v35 }
 0x37a   : > { %v3757_v39 = vsub.f32 1.0, %v3756_v43  ;;  %v3996_v3 = vmul.f32 %v5039_v18, %v3753_v33  ;;  %5044 = vtanh.f32 %v3163_v49 }
 0x37b   : > { %v3336_v37 = vpop.f32.mrf.mxu2  ;;  %v3782_v26 = vor.u32 1.1754944e-38, %v3781_v38 }
 0x37c   : > { %v3337_v6 = vadd.f32 %v7076_v46, %v3336_v37  ;;  %4889 = vmatmul.msk.f32.gmra.mxu3 %vm4036_vm7, %v3996_v3  ;;  %v3758_v20 = vmul.f32 %v5037_v8, %v3757_v39  ;;  %v7133_v30 = vpop.f32.mrf.mxu1  ;;  %v3172_v3 = vadd.f32 %v7098_v60, %v7109_v4 }
 0x37e   : > { %v5041_v50 = vpop.eup %5040  ;;  %v4861_v10 = vmul.f32 -1.442695, %v3337_v6  ;;  %v3759_v44 = vadd.f32 %v5037_v8, %v3758_v20 }
 0x37f   : > { %v5043_v47 = vpop.eup %5042  ;;  %v7130_v12 = vadd.f32 1.0, %v5041_v50  ;;  %v4150_v58 = vpop.f32.mrf.mxu3 }
 0x380   : > { %v3771_v32 = vmul.f32 %v5043_v47, %v7114_v35  ;;  %5046 = vpow2.f32 %v4861_v10  ;;  %v4264_v54 = vadd.f32 %v6887_v24, %v4150_v58  ;;  %v3763_v63 = vsel %vm3762_vm14, %v5037_v8, %v3759_v44  ;;  %v5045_v13 = vpop.eup %5044  ;;  %v7173_v44 = vpop.f32.mrf.mxu0 }
 0x381   : > { %5048 = vrcp.f32 %v7130_v12  ;;  %v3768_v57 = vsel %vm3765_vm15, %v3767_v15, %v3763_v63  ;;  %v3779_v24 = vand.u32 2147483647, %v7114_v35  ;;  %vm3776_vm1 = vweird.f32 %v5043_v47 }
 0x382   : > { %v3772_v52 = vsub.f32 1.0, %v3771_v32  ;;  %v4363_v21 = vadd.f32 %v7126_v40, %v4264_v54  ;;  %v3997_v19 = vmul.f32 %v5045_v13, %v3768_v57  ;;  %5050 = vtanh.f32 %v3166_v55  ;;  %vm3777_vm3 = vmor %vm3775_vm2, %vm3776_vm1 }
 0x383   : > { %v3339_v34 = vpop.f32.mrf.mxu2  ;;  %vm3780_vm4 = vcmp.eq.f32.partialorder %v3779_v24, 8.507059e+37  ;;  %v3794_v35 = vand.u32 2147483647, %v7130_v12  ;;  %v3796_v45 = vand.u32 2147483648, %v7130_v12  ;;  %vm3790_vm6 = vweird.f32 %v7130_v12 }
 0x384   : > { %4396 = vst.msk [vmem:[%s7140_s17] sm:$0xff] %vm4395_vm0, %v4363_v21  ;;  %v3340_v48 = vadd.f32 %v7076_v46, %v3339_v34  ;;  %4890 = vmatmul.msk.f32.gmra.mxu3 %vm4036_vm7, %v3997_v19  ;;  %v3773_v56 = vmul.f32 %v5043_v47, %v3772_v52  ;;  %v7157_v59 = vpop.f32.mrf.mxu1  ;;  %v3175_v19 = vadd.f32 %v7098_v60, %v7133_v30 }
 0x385   : > { %vm3795_vm9 = vcmp.eq.f32.partialorder %v3794_v35, 8.507059e+37  ;;  %v3797_v1 = vor.u32 1.1754944e-38, %v3796_v45 }
 0x386   : > { %v5047_v0 = vpop.eup %5046  ;;  %v4862_v23 = vmul.f32 -1.442695, %v3340_v48  ;;  %v3774_v27 = vadd.f32 %v5043_v47, %v3773_v56 }
 0x387   : > { %v5049_v31 = vpop.eup %5048  ;;  %v7152_v25 = vadd.f32 1.0, %v5047_v0  ;;  %v4153_v62 = vpop.f32.mrf.mxu3 }
 0x388   : > { %v3786_v11 = vmul.f32 %v5049_v31, %v7130_v12  ;;  %5052 = vpow2.f32 %v4862_v23  ;;  %v4267_v29 = vadd.f32 %v6908_v51, %v4153_v62  ;;  %v3778_v36 = vsel %vm3777_vm3, %v5043_v47, %v3774_v27  ;;  %v5051_v14 = vpop.eup %5050 }
 0x389   : > { %5054 = vrcp.f32 %v7152_v25  ;;  %v3783_v53 = vsel %vm3780_vm4, %v3782_v26, %v3778_v36  ;;  %vm3791_vm5 = vweird.f32 %v5049_v31  ;;  %v3809_v15 = vand.u32 2147483647, %v7152_v25 }
 0x38a   : > { %v3787_v17 = vsub.f32 1.0, %v3786_v11  ;;  %v4364_v28 = vadd.f32 %v7126_v40, %v4267_v29  ;;  %v3998_v8 = vmul.f32 %v5051_v14, %v3783_v53  ;;  %5056 = vtanh.f32 %v3169_v42  ;;  %vm3792_vm8 = vmor %vm3790_vm6, %vm3791_vm5 }
 0x38b   : > { %v3342_v49 = vpop.f32.mrf.mxu2  ;;  %v3811_v32 = vand.u32 2147483648, %v7152_v25  ;;  %vm3805_vm11 = vweird.f32 %v7152_v25  ;;  %vm3810_vm13 = vcmp.eq.f32.partialorder %v3809_v15, 8.507059e+37 }
 0x38c   : > { %4397 = vst.msk [vmem:[%s7140_s17 + $0x8] sm:$0xff] %vm4395_vm0, %v4364_v28  ;;  %v3343_v51 = vadd.f32 %v7076_v46, %v3342_v49  ;;  %4891 = vmatmul.msk.f32.gmra.mxu3 %vm4036_vm7, %v3998_v8  ;;  %v3788_v43 = vmul.f32 %v5049_v31, %v3787_v17  ;;  %v7179_v54 = vpop.f32.mrf.mxu1  ;;  %v3178_v8 = vadd.f32 %v7098_v60, %v7157_v59 }
 0x38d   : > { %v3812_v38 = vor.u32 1.1754944e-38, %v3811_v32 }
 0x38e   : > { %v5053_v16 = vpop.eup %5052  ;;  %v4863_v18 = vmul.f32 -1.442695, %v3343_v51  ;;  %v3789_v33 = vadd.f32 %v5049_v31, %v3788_v43 }
 0x38f   : > { %v5055_v39 = vpop.eup %5054  ;;  %v7169_v37 = vadd.f32 1.0, %v5053_v16  ;;  %v4156_v41 = vpop.f32.mrf.mxu3 }
 0x390   : > { %v3801_v6 = vmul.f32 %v5055_v39, %v7152_v25  ;;  %5058 = vpow2.f32 %v4863_v18  ;;  %v4270_v20 = vadd.f32 %v6931_v9, %v4156_v41  ;;  %v3793_v50 = vsel %vm3792_vm8, %v5049_v31, %v3789_v33  ;;  %v5057_v10 = vpop.eup %5056  ;;  %v7194_v25 = vpop.f32.mrf.mxu0 }
 0x391   : > { %5060 = vrcp.f32 %v7169_v37  ;;  %v3798_v47 = vsel %vm3795_vm9, %v3797_v1, %v3793_v50  ;;  %vm3806_vm10 = vweird.f32 %v5055_v39  ;;  %v3824_v26 = vand.u32 2147483647, %v7169_v37 }
 0x392   : > { %v3802_v4 = vsub.f32 1.0, %v3801_v6  ;;  %v4365_v55 = vadd.f32 %v7126_v40, %v4270_v20  ;;  %v3999_v12 = vmul.f32 %v5057_v10, %v3798_v47  ;;  %5062 = vtanh.f32 %v3172_v3  ;;  %vm3807_vm12 = vmor %vm3805_vm11, %vm3806_vm10 }
 0x393   : > { %v3345_v58 = vpop.f32.mrf.mxu2  ;;  %v3826_v11 = vand.u32 2147483648, %v7169_v37  ;;  %vm3820_vm15 = vweird.f32 %v7169_v37  ;;  %vm3825_vm2 = vcmp.eq.f32.partialorder %v3824_v26, 8.507059e+37 }
 0x394   : > { %4398 = vst.msk [vmem:[%s7140_s17 + $0x10] sm:$0xff] %vm4395_vm0, %v4365_v55  ;;  %v3346_v9 = vadd.f32 %v7076_v46, %v3345_v58  ;;  %4892 = vmatmul.msk.f32.gmra.mxu3 %vm4036_vm7, %v3999_v12  ;;  %v3803_v63 = vmul.f32 %v5055_v39, %v3802_v4  ;;  %v7202_v14 = vpop.f32.mrf.mxu1  ;;  %v3181_v55 = vadd.f32 %v7098_v60, %v7179_v54 }
 0x395   : > { %v3827_v45 = vor.u32 1.1754944e-38, %v3826_v11 }
 0x396   : > { %v5059_v13 = vpop.eup %5058  ;;  %v4864_v57 = vmul.f32 -1.442695, %v3346_v9  ;;  %v3804_v52 = vadd.f32 %v5055_v39, %v3803_v63 }
 0x397   : > { %v5061_v21 = vpop.eup %5060  ;;  %v7188_v34 = vadd.f32 1.0, %v5059_v13  ;;  %v4159_v24 = vpop.f32.mrf.mxu3 }
 0x398   : > { %v3816_v48 = vmul.f32 %v5061_v21, %v7169_v37  ;;  %5064 = vpow2.f32 %v4864_v57  ;;  %v4273_v56 = vadd.f32 %v6952_v5, %v4159_v24  ;;  %v3808_v0 = vsel %vm3807_vm12, %v5055_v39, %v3804_v52  ;;  %v5063_v23 = vpop.eup %5062  ;;  %v7219_v20 = vpop.f32.mrf.mxu0 }
 0x399   : > { %5066 = vrcp.f32 %v7188_v34  ;;  %v3813_v27 = vsel %vm3810_vm13, %v3812_v38, %v3808_v0  ;;  %vm3821_vm14 = vweird.f32 %v5061_v21  ;;  %v3839_v41 = vand.u32 2147483647, %v7188_v34 }
 0x39a   : > { %v3817_v31 = vsub.f32 1.0, %v3816_v48  ;;  %v4366_v30 = vadd.f32 %v7126_v40, %v4273_v56  ;;  %v4000_v42 = vmul.f32 %v5063_v23, %v3813_v27  ;;  %5068 = vtanh.f32 %v3175_v19  ;;  %vm3822_vm1 = vmor %vm3820_vm15, %vm3821_vm14 }
 0x39b   : > { %v3348_v62 = vpop.f32.mrf.mxu2  ;;  %v3841_v1 = vand.u32 2147483648, %v7188_v34  ;;  %vm3835_vm4 = vweird.f32 %v7188_v34  ;;  %vm3840_vm6 = vcmp.eq.f32.partialorder %v3839_v41, 8.507059e+37 }
 0x39c   : > { %4399 = vst.msk [vmem:[%s7140_s17 + $0x18] sm:$0xff] %vm4395_vm0, %v4366_v30  ;;  %v3349_v5 = vadd.f32 %v7076_v46, %v3348_v62  ;;  %4893 = vmatmul.msk.f32.gmra.mxu3 %vm4036_vm7, %v4000_v42  ;;  %v3818_v29 = vmul.f32 %v5061_v21, %v3817_v31  ;;  %v3186_v9 = vpop.f32.mrf.mxu1  ;;  %v3184_v30 = vadd.f32 %v7098_v60, %v7202_v14 }
 0x39d   : > { %v3842_v15 = vor.u32 1.1754944e-38, %v3841_v1 }
 0x39e   : > { %v5065_v36 = vpop.eup %5064  ;;  %v4865_v53 = vmul.f32 -1.442695, %v3349_v5  ;;  %v3819_v17 = vadd.f32 %v5061_v21, %v3818_v29 }
 0x39f   : > { %v5067_v28 = vpop.eup %5066  ;;  %v7207_v49 = vadd.f32 1.0, %v5065_v36  ;;  %v4162_v35 = vpop.f32.mrf.mxu3 }
 0x3a0   : > { %v3831_v51 = vmul.f32 %v5067_v28, %v7188_v34  ;;  %5070 = vpow2.f32 %v4865_v53  ;;  %v4276_v43 = vadd.f32 %v6981_v61, %v4162_v35  ;;  %v3823_v16 = vsel %vm3822_vm1, %v5061_v21, %v3819_v17  ;;  %v5069_v18 = vpop.eup %5068  ;;  %v7237_v31 = vpop.f32.mrf.mxu0 }
 0x3a1   : > { %5072 = vrcp.f32 %v7207_v49  ;;  %v3828_v33 = vsel %vm3825_vm2, %v3827_v45, %v3823_v16  ;;  %vm3836_vm3 = vweird.f32 %v5067_v28  ;;  %v3854_v24 = vand.u32 2147483647, %v7207_v49 }
 0x3a2   : > { %v3832_v39 = vsub.f32 1.0, %v3831_v51  ;;  %v4367_v59 = vadd.f32 %v7126_v40, %v4276_v43  ;;  %v4001_v3 = vmul.f32 %v5069_v18, %v3828_v33  ;;  %5074 = vtanh.f32 %v3178_v8  ;;  %vm3837_vm5 = vmor %vm3835_vm4, %vm3836_vm3 }
 0x3a3   : > { %v3351_v37 = vpop.f32.mrf.mxu2  ;;  %v3856_v38 = vand.u32 2147483648, %v7207_v49  ;;  %vm3850_vm9 = vweird.f32 %v7207_v49  ;;  %vm3855_vm11 = vcmp.eq.f32.partialorder %v3854_v24, 8.507059e+37 }
 0x3a4   : > { %4400 = vst.msk [vmem:[%s7140_s17 + $0x20] sm:$0xff] %vm4395_vm0, %v4367_v59  ;;  %v3352_v6 = vadd.f32 %v7076_v46, %v3351_v37  ;;  %4894 = vmatmul.msk.f32.gmra.mxu3 %vm4036_vm7, %v4001_v3  ;;  %v3833_v61 = vmul.f32 %v5067_v28, %v3832_v39  ;;  %v3187_v39 = vadd.f32 %v7098_v60, %v3186_v9 }
 0x3a5   : > { %v3857_v26 = vor.u32 1.1754944e-38, %v3856_v38 }
 0x3a6   : > { %v5071_v50 = vpop.eup %5070  ;;  %v4866_v10 = vmul.f32 -1.442695, %v3352_v6  ;;  %v3834_v47 = vadd.f32 %v5067_v28, %v3833_v61 }
 0x3a7   : > { %v5073_v4 = vpop.eup %5072  ;;  %v7224_v12 = vadd.f32 1.0, %v5071_v50  ;;  %v4165_v58 = vpop.f32.mrf.mxu3 }
 0x3a8   : > { %v3846_v32 = vmul.f32 %v5073_v4, %v7207_v49  ;;  %5076 = vpow2.f32 %v4866_v10  ;;  %v4279_v63 = vadd.f32 %v7001_v2, %v4165_v58  ;;  %v3838_v13 = vsel %vm3837_vm5, %v5067_v28, %v3834_v47  ;;  %v5075_v57 = vpop.eup %5074  ;;  %v3189_v28 = vpop.f32.mrf.mxu1 }
 0x3a9   : > { %5078 = vrcp.f32 %v7224_v12  ;;  %v3843_v52 = vsel %vm3840_vm6, %v3842_v15, %v3838_v13  ;;  %vm3851_vm8 = vweird.f32 %v5073_v4  ;;  %v3869_v35 = vand.u32 2147483647, %v7224_v12  ;;  %v7259_v50 = vpop.f32.mrf.mxu0 }
 0x3aa   : > { %v3847_v21 = vsub.f32 1.0, %v3846_v32  ;;  %v4368_v54 = vadd.f32 %v7126_v40, %v4279_v63  ;;  %v4002_v19 = vmul.f32 %v5075_v57, %v3843_v52  ;;  %5080 = vtanh.f32 %v3181_v55  ;;  %vm3852_vm10 = vmor %vm3850_vm9, %vm3851_vm8 }
 0x3ab   : > { %v3354_v34 = vpop.f32.mrf.mxu2  ;;  %v3871_v45 = vand.u32 2147483648, %v7224_v12  ;;  %vm3865_vm13 = vweird.f32 %v7224_v12  ;;  %vm3870_vm15 = vcmp.eq.f32.partialorder %v3869_v35, 8.507059e+37 }
 0x3ac   : > { %4401 = vst.msk [vmem:[%s7140_s17 + $0x28] sm:$0xff] %vm4395_vm0, %v4368_v54  ;;  %v3355_v48 = vadd.f32 %v7076_v46, %v3354_v34  ;;  %4895 = vmatmul.msk.f32.gmra.mxu3 %vm4036_vm7, %v4002_v19  ;;  %v3848_v2 = vmul.f32 %v5073_v4, %v3847_v21  ;;  %v3190_v21 = vadd.f32 %v7098_v60, %v3189_v28 }
 0x3ad   : > { %v3872_v37 = vor.u32 1.1754944e-38, %v3871_v45 }
 0x3ae   : > { %v5077_v56 = vpop.eup %5076  ;;  %v4867_v0 = vmul.f32 -1.442695, %v3355_v48  ;;  %v3849_v23 = vadd.f32 %v5073_v4, %v3848_v2 }
 0x3af   : > { %v5079_v27 = vpop.eup %5078  ;;  %v7241_v42 = vadd.f32 1.0, %v5077_v56  ;;  %v4168_v62 = vpop.f32.mrf.mxu3 }
 0x3b0   : > { %v3861_v11 = vmul.f32 %v5079_v27, %v7224_v12  ;;  %5082 = vpow2.f32 %v4867_v0  ;;  %v4282_v5 = vadd.f32 %v7024_v7, %v4168_v62  ;;  %v3853_v29 = vsel %vm3852_vm10, %v5073_v4, %v3849_v23  ;;  %v5081_v36 = vpop.eup %5080  ;;  %v3192_v32 = vpop.f32.mrf.mxu1 }
 0x3b1   : > { %5084 = vrcp.f32 %v7241_v42  ;;  %v3858_v53 = vsel %vm3855_vm11, %v3857_v26, %v3853_v29  ;;  %vm3866_vm12 = vweird.f32 %v5079_v27  ;;  %v3884_v58 = vand.u32 2147483647, %v7241_v42 }
 0x3b2   : > { %v3862_v17 = vsub.f32 1.0, %v3861_v11  ;;  %v4369_v14 = vadd.f32 %v7126_v40, %v4282_v5  ;;  %v4003_v8 = vmul.f32 %v5081_v36, %v3858_v53  ;;  %5086 = vtanh.f32 %v3184_v30  ;;  %vm3867_vm14 = vmor %vm3865_vm13, %vm3866_vm12  ;;  %v7277_v30 = vpop.f32.mrf.mxu0 }
 0x3b3   : > { %v3357_v49 = vpop.f32.mrf.mxu2  ;;  %v3886_v15 = vand.u32 2147483648, %v7241_v42  ;;  %vm3880_vm2 = vweird.f32 %v7241_v42  ;;  %vm3885_vm4 = vcmp.eq.f32.partialorder %v3884_v58, 8.507059e+37  ;;  %v3193_v28 = vadd.f32 %v7098_v60, %v3192_v32 }
 0x3b4   : > { %4402 = vst.msk [vmem:[%s7140_s17 + $0x30] sm:$0xff] %vm4395_vm0, %v4369_v14  ;;  %v3358_v7 = vadd.f32 %v7076_v46, %v3357_v49  ;;  %4896 = vmatmul.msk.f32.gmra.mxu3 %vm4036_vm7, %v4003_v8  ;;  %v3863_v51 = vmul.f32 %v5079_v27, %v3862_v17 }
 0x3b5   : > { %v3887_v34 = vor.u32 1.1754944e-38, %v3886_v15 }
 0x3b6   : > { %v5083_v43 = vpop.eup %5082  ;;  %v4868_v16 = vmul.f32 -1.442695, %v3358_v7  ;;  %v3864_v18 = vadd.f32 %v5079_v27, %v3863_v51 }
 0x3b7   : > { %v5085_v33 = vpop.eup %5084  ;;  %v7255_v59 = vadd.f32 1.0, %v5083_v43  ;;  %v4171_v3 = vpop.f32.mrf.mxu3 }
 0x3b8   : > { %v3876_v41 = vmul.f32 %v5085_v33, %v7241_v42  ;;  %5088 = vpow2.f32 %v4868_v16  ;;  %v4285_v1 = vadd.f32 %v7043_v22, %v4171_v3  ;;  %v3868_v6 = vsel %vm3867_vm14, %v5079_v27, %v3864_v18  ;;  %v5087_v61 = vpop.eup %5086  ;;  %v3195_v29 = vpop.f32.mrf.mxu1 }
 0x3b9   : > { %5090 = vrcp.f32 %v7255_v59  ;;  %v3873_v10 = vsel %vm3870_vm15, %v3872_v37, %v3868_v6  ;;  %vm3881_vm1 = vweird.f32 %v5085_v33  ;;  %v3899_v62 = vand.u32 2147483647, %v7255_v59 }
 0x3ba   : > { %v3877_v47 = vsub.f32 1.0, %v3876_v41  ;;  %v4370_v4 = vadd.f32 %v7126_v40, %v4285_v1  ;;  %v4004_v55 = vmul.f32 %v5087_v61, %v3873_v10  ;;  %5092 = vtanh.f32 %v3187_v39  ;;  %vm3882_vm3 = vmor %vm3880_vm2, %vm3881_vm1  ;;  %v7299_v41 = vpop.f32.mrf.mxu0 }
 0x3bb   : > { %v3360_v12 = vpop.f32.mrf.mxu2  ;;  %v3901_v26 = vand.u32 2147483648, %v7255_v59  ;;  %vm3895_vm6 = vweird.f32 %v7255_v59  ;;  %vm3900_vm9 = vcmp.eq.f32.partialorder %v3899_v62, 8.507059e+37 }
 0x3bc   : > { %4403 = vst.msk [vmem:[%s7140_s17 + $0x38] sm:$0xff] %vm4395_vm0, %v4370_v4  ;;  %v3361_v22 = vadd.f32 %v7076_v46, %v3360_v12  ;;  %4897 = vmatmul.msk.f32.gmra.mxu3 %vm4036_vm7, %v4004_v55  ;;  %v3878_v9 = vmul.f32 %v5085_v33, %v3877_v47  ;;  %v3196_v47 = vadd.f32 %v7098_v60, %v3195_v29 }
 0x3bd   : > { %v3902_v49 = vor.u32 1.1754944e-38, %v3901_v26 }
 0x3be   : > { %v5089_v63 = vpop.eup %5088  ;;  %v4869_v13 = vmul.f32 -1.442695, %v3361_v22  ;;  %v3879_v57 = vadd.f32 %v5085_v33, %v3878_v9 }
 0x3bf   : > { %v5091_v52 = vpop.eup %5090  ;;  %v7271_v54 = vadd.f32 1.0, %v5089_v63  ;;  %v4174_v19 = vpop.f32.mrf.mxu3 }
 0x3c0   : > { %v3891_v24 = vmul.f32 %v5091_v52, %v7255_v59  ;;  %5094 = vpow2.f32 %v4869_v13  ;;  %v4288_v38 = vadd.f32 %v7173_v44, %v4174_v19  ;;  %v3883_v48 = vsel %vm3882_vm3, %v5085_v33, %v3879_v57  ;;  %v5093_v2 = vpop.eup %5092  ;;  %v3198_v15 = vpop.f32.mrf.mxu1 }
 0x3c1   : > { %5096 = vrcp.f32 %v7271_v54  ;;  %v3888_v56 = vsel %vm3885_vm4, %v3887_v34, %v3883_v48  ;;  %vm3896_vm5 = vweird.f32 %v5091_v52  ;;  %v3914_v59 = vand.u32 2147483647, %v7271_v54 }
 0x3c2   : > { %v3892_v0 = vsub.f32 1.0, %v3891_v24  ;;  %v4371_v23 = vadd.f32 %v7126_v40, %v4288_v38  ;;  %v4005_v27 = vmul.f32 %v5093_v2, %v3888_v56  ;;  %5098 = vtanh.f32 %v3190_v21  ;;  %vm3897_vm8 = vmor %vm3895_vm6, %vm3896_vm5  ;;  %v7316_v56 = vpop.f32.mrf.mxu0 }
 0x3c3   : > { %v3363_v42 = vpop.f32.mrf.mxu2  ;;  %v3916_v3 = vand.u32 2147483648, %v7271_v54  ;;  %vm3910_vm11 = vweird.f32 %v7271_v54  ;;  %vm3915_vm13 = vcmp.eq.f32.partialorder %v3914_v59, 8.507059e+37 }
 0x3c4   : > { %4404 = vst.msk [vmem:[%s7140_s17 + $0x40] sm:$0xff] %vm4395_vm0, %v4371_v23  ;;  %v3364_v44 = vadd.f32 %v7076_v46, %v3363_v42  ;;  %4898 = vmatmul.msk.f32.gmra.mxu3 %vm4036_vm7, %v4005_v27  ;;  %v3893_v11 = vmul.f32 %v5091_v52, %v3892_v0  ;;  %v3199_v0 = vadd.f32 %v7098_v60, %v3198_v15 }
 0x3c5   : > { %v3917_v12 = vor.u32 1.1754944e-38, %v3916_v3 }
 0x3c6   : > { %v5095_v5 = vpop.eup %5094  ;;  %v4870_v36 = vmul.f32 -1.442695, %v3364_v44  ;;  %v3894_v53 = vadd.f32 %v5091_v52, %v3893_v11 }
 0x3c7   : > { %v5097_v17 = vpop.eup %5096  ;;  %v7287_v14 = vadd.f32 1.0, %v5095_v5  ;;  %v4177_v8 = vpop.f32.mrf.mxu3 }
 0x3c8   : > { %v3906_v35 = vmul.f32 %v5097_v17, %v7271_v54  ;;  %5100 = vpow2.f32 %v4870_v36  ;;  %v4291_v45 = vadd.f32 %v7194_v25, %v4177_v8  ;;  %v3898_v7 = vsel %vm3897_vm8, %v5091_v52, %v3894_v53  ;;  %v5099_v51 = vpop.eup %5098  ;;  %v3201_v29 = vpop.f32.mrf.mxu1 }
 0x3c9   : > { %5102 = vrcp.f32 %v7287_v14  ;;  %v3903_v43 = vsel %vm3900_vm9, %v3902_v49, %v3898_v7  ;;  %vm3911_vm10 = vweird.f32 %v5097_v17  ;;  %v3929_v54 = vand.u32 2147483647, %v7287_v14 }
 0x3ca   : > { %v3907_v16 = vsub.f32 1.0, %v3906_v35  ;;  %v4372_v18 = vadd.f32 %v7126_v40, %v4291_v45  ;;  %v4006_v33 = vmul.f32 %v5099_v51, %v3903_v43  ;;  %5104 = vtanh.f32 %v3193_v28  ;;  %vm3912_vm12 = vmor %vm3910_vm11, %vm3911_vm10 }
 0x3cb   : > { %v3366_v39 = vpop.f32.mrf.mxu2  ;;  %v3931_v19 = vand.u32 2147483648, %v7287_v14  ;;  %vm3925_vm15 = vweird.f32 %v7287_v14  ;;  %vm3930_vm2 = vcmp.eq.f32.partialorder %v3929_v54, 8.507059e+37  ;;  %v3202_v35 = vadd.f32 %v7098_v60, %v3201_v29 }
 0x3cc   : > { %4405 = vst.msk [vmem:[%s7140_s17 + $0x48] sm:$0xff] %vm4395_vm0, %v4372_v18  ;;  %v3367_v37 = vadd.f32 %v7076_v46, %v3366_v39  ;;  %4899 = vmatmul.msk.f32.gmra.mxu3 %vm4036_vm7, %v4006_v33  ;;  %v3908_v25 = vmul.f32 %v5097_v17, %v3907_v16  ;;  %v4311_v39 = vpop.f32.mrf.mxu0 }
 0x3ce   : > { %v5101_v1 = vpop.eup %5100  ;;  %v4871_v6 = vmul.f32 -1.442695, %v3367_v37  ;;  %v3909_v61 = vadd.f32 %v5097_v17, %v3908_v25 }
 0x3cf   : > { %v5103_v10 = vpop.eup %5102  ;;  %v7303_v4 = vadd.f32 1.0, %v5101_v1  ;;  %v4180_v55 = vpop.f32.mrf.mxu3 }
 0x3d0   : > { %v3921_v58 = vmul.f32 %v5103_v10, %v7287_v14  ;;  %5106 = vpow2.f32 %v4871_v6  ;;  %v4294_v32 = vadd.f32 %v7219_v20, %v4180_v55  ;;  %v3913_v22 = vsel %vm3912_vm12, %v5097_v17, %v3909_v61  ;;  %v5105_v9 = vpop.eup %5104  ;;  %v3204_v6 = vpop.f32.mrf.mxu1 }
 0x3d1   : > { %5108 = vrcp.f32 %v7303_v4  ;;  %v3918_v63 = vsel %vm3915_vm13, %v3917_v12, %v3913_v22  ;;  %vm3926_vm14 = vweird.f32 %v5103_v10  ;;  %v3946_v17 = vand.u32 2147483648, %v7303_v4 }
 0x3d2   : > { %v3922_v13 = vsub.f32 1.0, %v3921_v58  ;;  %v4373_v57 = vadd.f32 %v7126_v40, %v4294_v32  ;;  %v4007_v52 = vmul.f32 %v5105_v9, %v3918_v63  ;;  %5110 = vtanh.f32 %v3196_v47  ;;  %vm3927_vm1 = vmor %vm3925_vm15, %vm3926_vm14 }
 0x3d3   : > { %v3369_v21 = vpop.f32.mrf.mxu2  ;;  %vm3940_vm4 = vweird.f32 %v7303_v4  ;;  %v3947_v51 = vor.u32 1.1754944e-38, %v3946_v17 }
 0x3d4   : > { %4406 = vst.msk [vmem:[%s7140_s17 + $0x50] sm:$0xff] %vm4395_vm0, %v4373_v57  ;;  %v3370_v34 = vadd.f32 %v7076_v46, %v3369_v21  ;;  %4900 = vmatmul.msk.f32.gmra.mxu3 %vm4036_vm7, %v4007_v52  ;;  %v3923_v20 = vmul.f32 %v5103_v10, %v3922_v13  ;;  %v3932_v46 = vor.u32 1.1754944e-38, %v3931_v19  ;;  %v4314_v52 = vpop.f32.mrf.mxu0 }
 0x3d6   : > { %v5107_v24 = vpop.eup %5106  ;;  %v4872_v38 = vmul.f32 -1.442695, %v3370_v34  ;;  %v3924_v48 = vadd.f32 %v5103_v10, %v3923_v20 }
 0x3d7   : > { %v5109_v2 = vpop.eup %5108  ;;  %v3498_v23 = vadd.f32 1.0, %v5107_v24  ;;  %v4183_v27 = vpop.f32.mrf.mxu3 }
 0x3d8   : > { %v3936_v42 = vmul.f32 %v5109_v2, %v7303_v4  ;;  %5112 = vpow2.f32 %v4872_v38  ;;  %v4297_v62 = vadd.f32 %v7237_v31, %v4183_v27  ;;  %v3928_v26 = vsel %vm3927_vm1, %v5103_v10, %v3924_v48  ;;  %v5111_v44 = vpop.eup %5110 }
 0x3d9   : > { %5114 = vrcp.f32 %v3498_v23  ;;  %v3933_v11 = vsel %vm3930_vm2, %v3932_v46, %v3928_v26  ;;  %vm3941_vm3 = vweird.f32 %v5109_v2  ;;  %v3944_v31 = vand.u32 2147483647, %v7303_v4 }
 0x3da   : > { %v3937_v5 = vsub.f32 1.0, %v3936_v42  ;;  %v4374_v36 = vadd.f32 %v7126_v40, %v4297_v62  ;;  %v4008_v53 = vmul.f32 %v5111_v44, %v3933_v11  ;;  %5116 = vtanh.f32 %v3199_v0  ;;  %vm3942_vm5 = vmor %vm3940_vm4, %vm3941_vm3 }
 0x3db   : > { %vm3945_vm6 = vcmp.eq.f32.partialorder %v3944_v31, 8.507059e+37  ;;  %v3961_v1 = vand.u32 2147483648, %v3498_v23  ;;  %vm3955_vm9 = vweird.f32 %v3498_v23  ;;  %v3205_v4 = vadd.f32 %v7098_v60, %v3204_v6 }
 0x3dc   : > { %4407 = vst.msk [vmem:[%s7140_s17 + $0x58] sm:$0xff] %vm4395_vm0, %v4374_v36  ;;  %4901 = vmatmul.msk.f32.gmra.mxu3 %vm4036_vm7, %v4008_v53  ;;  %v3938_v28 = vmul.f32 %v5109_v2, %v3937_v5 }
 0x3dd   : > { %v3962_v12 = vor.u32 1.1754944e-38, %v3961_v1 }
 0x3de   : > { %v5113_v14 = vpop.eup %5112  ;;  %v3939_v8 = vadd.f32 %v5109_v2, %v3938_v28 }
 0x3df   : > { %v5115_v49 = vpop.eup %5114  ;;  %v3499_v45 = vadd.f32 1.0, %v5113_v14  ;;  %v4186_v7 = vpop.f32.mrf.mxu3 }
 0x3e0   : > { %v3951_v43 = vmul.f32 %v5115_v49, %v3498_v23  ;;  %v4300_v16 = vadd.f32 %v7259_v50, %v4186_v7  ;;  %v3943_v18 = vsel %vm3942_vm5, %v5109_v2, %v3939_v8  ;;  %v5117_v33 = vpop.eup %5116  ;;  %vm3956_vm8 = vweird.f32 %v5115_v49 }
 0x3e1   : > { %5118 = vrcp.f32 %v3499_v45  ;;  %v3948_v59 = vsel %vm3945_vm6, %v3947_v51, %v3943_v18  ;;  %v3959_v50 = vand.u32 2147483647, %v3498_v23  ;;  %vm3957_vm10 = vmor %vm3955_vm9, %vm3956_vm8  ;;  %v3976_v21 = vand.u32 2147483648, %v3499_v45  ;;  %v4317_v23 = vpop.f32.mrf.mxu0 }
 0x3e2   : > { %v3952_v3 = vsub.f32 1.0, %v3951_v43  ;;  %v4375_v37 = vadd.f32 %v7126_v40, %v4300_v16  ;;  %v4009_v25 = vmul.f32 %v5117_v33, %v3948_v59  ;;  %5120 = vtanh.f32 %v3202_v35 }
 0x3e3   : > { %vm3960_vm11 = vcmp.eq.f32.partialorder %v3959_v50, 8.507059e+37  ;;  %5122 = vtanh.f32 %v3205_v4  ;;  %v3974_v54 = vand.u32 2147483647, %v3499_v45  ;;  %vm3970_vm13 = vweird.f32 %v3499_v45 }
 0x3e4   : > { %4408 = vst.msk [vmem:[%s7140_s17 + $0x60] sm:$0xff] %vm4395_vm0, %v4375_v37  ;;  %4902 = vmatmul.msk.f32.gmra.mxu3 %vm4036_vm7, %v4009_v25  ;;  %v3953_v61 = vmul.f32 %v5115_v49, %v3952_v3  ;;  %v3977_v34 = vor.u32 1.1754944e-38, %v3976_v21 }
 0x3e5   : > { %vm3975_vm15 = vcmp.eq.f32.partialorder %v3974_v54, 8.507059e+37 }
 0x3e6   : > { %v3954_v10 = vadd.f32 %v5115_v49, %v3953_v61 }
 0x3e7   : > { %v5119_v47 = vpop.eup %5118  ;;  %v4189_v55 = vpop.f32.mrf.mxu3 }
 0x3e8   : > { %v3966_v58 = vmul.f32 %v5119_v47, %v3499_v45  ;;  %v4303_v15 = vadd.f32 %v7277_v30, %v4189_v55  ;;  %v3958_v32 = vsel %vm3957_vm10, %v5115_v49, %v3954_v10  ;;  %v5121_v22 = vpop.eup %5120  ;;  %vm3971_vm12 = vweird.f32 %v5119_v47 }
 0x3e9   : > { %v3963_v9 = vsel %vm3960_vm11, %v3962_v12, %v3958_v32  ;;  %vm3972_vm14 = vmor %vm3970_vm13, %vm3971_vm12  ;;  %v5123_v38 = vpop.eup %5122 }
 0x3ea   : > { %v3967_v63 = vsub.f32 1.0, %v3966_v58  ;;  %v4376_v13 = vadd.f32 %v7126_v40, %v4303_v15  ;;  %v4010_v57 = vmul.f32 %v5121_v22, %v3963_v9 }
 0x3ec   : > { %4409 = vst.msk [vmem:[%s7140_s17 + $0x68] sm:$0xff] %vm4395_vm0, %v4376_v13  ;;  %4903 = vmatmul.msk.f32.gmra.mxu3 %vm4036_vm7, %v4010_v57  ;;  %v3968_v60 = vmul.f32 %v5119_v47, %v3967_v63 }
 0x3ee   : > { %v3969_v30 = vadd.f32 %v5119_v47, %v3968_v60 }
 0x3ef   : > { %v4192_v19 = vpop.f32.mrf.mxu3 }
 0x3f0   : > { %v4306_v20 = vadd.f32 %v7299_v41, %v4192_v19  ;;  %v3973_v24 = vsel %vm3972_vm14, %v5119_v47, %v3969_v30  ;;  %v4320_v41 = vpop.f32.mrf.mxu0 }
 0x3f1   : > { %v3978_v48 = vsel %vm3975_vm15, %v3977_v34, %v3973_v24  ;;  %v5174_v34 = vld [vmem:[%s7411_s11] ss:$0 sm:$0xff] }
 0x3f2   : > { %v4377_v2 = vadd.f32 %v7126_v40, %v4306_v20  ;;  %v4011_v0 = vmul.f32 %v5123_v38, %v3978_v48 }
 0x3f4   : > { %4410 = vst.msk [vmem:[%s7140_s17 + $0x70] sm:$0xff] %vm4395_vm0, %v4377_v2  ;;  %4904 = vmatmul.msk.f32.gmra.mxu3 %vm4036_vm7, %v4011_v0 }
 0x3f7   : > { %v4195_v27 = vpop.f32.mrf.mxu3 }
 0x3f8   : > { %v4309_v46 = vadd.f32 %v7316_v56, %v4195_v27  ;;  %v4323_v29 = vpop.f32.mrf.mxu0 }
 0x3fa   : > { %v4378_v42 = vadd.f32 %v7126_v40, %v4309_v46 }
 0x3fc   : > { %4411 = vst.msk [vmem:[%s7140_s17 + $0x78] sm:$0xff] %vm4395_vm0, %v4378_v42 }
 0x3ff   : > { %v4198_v62 = vpop.f32.mrf.mxu3 }
 0x400   : > { %v4312_v26 = vadd.f32 %v4311_v39, %v4198_v62  ;;  %v4326_v28 = vpop.f32.mrf.mxu0 }
 0x402   : > { %v4379_v44 = vadd.f32 %v7126_v40, %v4312_v26 }
 0x404   : > { %4412 = vst.msk [vmem:[%s7140_s17 + $0x80] sm:$0xff] %vm4395_vm0, %v4379_v44 }
 0x407   : > { %v4201_v11 = vpop.f32.mrf.mxu3 }
 0x408   : > { %v4315_v5 = vadd.f32 %v4314_v52, %v4201_v11  ;;  %v4329_v49 = vpop.f32.mrf.mxu0 }
 0x40a   : > { %v4380_v36 = vadd.f32 %v7126_v40, %v4315_v5 }
 0x40c   : > { %4413 = vst.msk [vmem:[%s7140_s17 + $0x88] sm:$0xff] %vm4395_vm0, %v4380_v36 }
 0x40f   : > { %v4204_v56 = vpop.f32.mrf.mxu3 }
 0x410   : > { %v4318_v53 = vadd.f32 %v4317_v23, %v4204_v56  ;;  %v4332_v51 = vpop.f32.mrf.mxu0 }
 0x412   : > { %v4381_v17 = vadd.f32 %v7126_v40, %v4318_v53 }
 0x414   : > { %4414 = vst.msk [vmem:[%s7140_s17 + $0x90] sm:$0xff] %vm4395_vm0, %v4381_v17 }
 0x417   : > { %v4207_v31 = vpop.f32.mrf.mxu3 }
 0x418   : > { %v4321_v14 = vadd.f32 %v4320_v41, %v4207_v31  ;;  %v4335_v59 = vpop.f32.mrf.mxu0 }
 0x41a   : > { %v4382_v8 = vadd.f32 %v7126_v40, %v4321_v14 }
 0x41c   : > { %4415 = vst.msk [vmem:[%s7140_s17 + $0x98] sm:$0xff] %vm4395_vm0, %v4382_v8 }
 0x41f   : > { %v4210_v35 = vpop.f32.mrf.mxu3 }
 0x420   : > { %v4324_v45 = vadd.f32 %v4323_v29, %v4210_v35  ;;  %v4338_v6 = vpop.f32.mrf.mxu0 }
 0x422   : > { %v4383_v7 = vadd.f32 %v7126_v40, %v4324_v45 }
 0x424   : > { %4416 = vst.msk [vmem:[%s7140_s17 + $0xa0] sm:$0xff] %vm4395_vm0, %v4383_v7 }
 0x427   : > { %v4213_v43 = vpop.f32.mrf.mxu3 }
 0x428   : > { %v4327_v16 = vadd.f32 %v4326_v28, %v4213_v43  ;;  %v4341_v47 = vpop.f32.mrf.mxu0 }
 0x42a   : > { %v4384_v18 = vadd.f32 %v7126_v40, %v4327_v16 }
 0x42c   : > { %4417 = vst.msk [vmem:[%s7140_s17 + $0xa8] sm:$0xff] %vm4395_vm0, %v4384_v18 }
 0x42f   : > { %v4216_v33 = vpop.f32.mrf.mxu3 }
 0x430   : > { %v4330_v39 = vadd.f32 %v4329_v49, %v4216_v33  ;;  %v4344_v58 = vpop.f32.mrf.mxu0 }
 0x432   : > { %v4385_v3 = vadd.f32 %v7126_v40, %v4330_v39 }
 0x434   : > { %4418 = vst.msk [vmem:[%s7140_s17 + $0xb0] sm:$0xff] %vm4395_vm0, %v4385_v3 }
 0x437   : > { %v4219_v37 = vpop.f32.mrf.mxu3 }
 0x438   : > { %v4333_v25 = vadd.f32 %v4332_v51, %v4219_v37  ;;  %v4347_v13 = vpop.f32.mrf.mxu0 }
 0x43a   : > { %v4386_v1 = vadd.f32 %v7126_v40, %v4333_v25 }
 0x43c   : > { %4419 = vst.msk [vmem:[%s7140_s17 + $0xb8] sm:$0xff] %vm4395_vm0, %v4386_v1 }
 0x43f   : > { %v4222_v61 = vpop.f32.mrf.mxu3 }
 0x440   : > { %v4336_v50 = vadd.f32 %v4335_v59, %v4222_v61  ;;  %v4350_v54 = vpop.f32.mrf.mxu0 }
 0x442   : > { %v4387_v10 = vadd.f32 %v7126_v40, %v4336_v50 }
 0x444   : > { %4420 = vst.msk [vmem:[%s7140_s17 + $0xc0] sm:$0xff] %vm4395_vm0, %v4387_v10 }
 0x447   : > { %v4225_v4 = vpop.f32.mrf.mxu3 }
 0x448   : > { %v4339_v55 = vadd.f32 %v4338_v6, %v4225_v4  ;;  %v4353_v24 = vpop.f32.mrf.mxu0 }
 0x44a   : > { %v4388_v12 = vadd.f32 %v7126_v40, %v4339_v55 }
 0x44c   : > { %4421 = vst.msk [vmem:[%s7140_s17 + $0xc8] sm:$0xff] %vm4395_vm0, %v4388_v12 }
 0x44f   : > { %v4228_v15 = vpop.f32.mrf.mxu3 }
 0x450   : > { %v4342_v32 = vadd.f32 %v4341_v47, %v4228_v15 }
 0x452   : > { %v4389_v22 = vadd.f32 %v7126_v40, %v4342_v32 }
 0x454   : > { %4422 = vst.msk [vmem:[%s7140_s17 + $0xd0] sm:$0xff] %vm4395_vm0, %v4389_v22 }
 0x457   : > { %v4231_v9 = vpop.f32.mrf.mxu3 }
 0x458   : > { %v4345_v63 = vadd.f32 %v4344_v58, %v4231_v9 }
 0x45a   : > { %v4390_v57 = vadd.f32 %v7126_v40, %v4345_v63 }
 0x45c   : > { %4423 = vst.msk [vmem:[%s7140_s17 + $0xd8] sm:$0xff] %vm4395_vm0, %v4390_v57 }
 0x45f   : > { %v4234_v52 = vpop.f32.mrf.mxu3 }
 0x460   : > { %v4348_v21 = vadd.f32 %v4347_v13, %v4234_v52 }
 0x462   : > { %v4391_v60 = vadd.f32 %v7126_v40, %v4348_v21  ;;  %v4356_v40 = vpop.f32.mrf.mxu0 }
 0x464   : > { %4424 = vst.msk [vmem:[%s7140_s17 + $0xe0] sm:$0xff] %vm4395_vm0, %v4391_v60 }
 0x467   : > { %v4237_v30 = vpop.f32.mrf.mxu3 }
 0x468   : > { %v4351_v19 = vadd.f32 %v4350_v54, %v4237_v30 }
 0x46a   : > { %v4392_v20 = vadd.f32 %v5174_v34, %v4351_v19 }
 0x46c   : > { %4425 = vst.msk [vmem:[%s7140_s17 + $0xe8] sm:$0xff] %vm4395_vm0, %v4392_v20 }
 0x46f   : > { %v4240_v38 = vpop.f32.mrf.mxu3 }
 0x470   : > { %v4354_v48 = vadd.f32 %v4353_v24, %v4240_v38 }
 0x472   : > { %v4393_v2 = vadd.f32 %v5174_v34, %v4354_v48 }
 0x474   : > { %4426 = vst.msk [vmem:[%s7140_s17 + $0xf0] sm:$0xff] %vm4395_vm0, %v4393_v2 }
 0x477   : > { %v4243_v0 = vpop.f32.mrf.mxu3 }
 0x478   : > { %v4357_v23 = vadd.f32 %v4356_v40, %v4243_v0 }
 0x47a   : > { %v4394_v27 = vadd.f32 %v5174_v34, %v4357_v23 }
 0x47c   : > { %4427 = vst.msk [vmem:[%s7140_s17 + $0xf8] sm:$0xff] %vm4395_vm0, %v4394_v27 }
 0x47d PF: > { %s22_s21 = sadd.s32 1, %s5181_s21  }
 0x47e   : > { %p19_p5 = scmp.ge.s32.totalorder %s22_s21, 6  }
 0x480   :  { %21 = sbr.rel (!%p19_p5) target bundleno = 1 (0x1), region = 112 }

</bundles_post_ra>
